<compile_context>
chip_gen: v6e
topology: v6e:2x2x1
jax: 0.10.0
libtpu: 0.0.40
codegen_flags: <defaults>
</compile_context>

<pallas_src>
import functools
import math

import jax
import jax.numpy as jnp
from jax import lax
from jax.experimental import pallas as pl
from jax.experimental.pallas import tpu as pltpu

# ----------------------------- model config (small, synthetic) -----------------------------
HIDDEN = 128          # lane-dense carried activation width
HEADS = 2
HEAD_DIM = HIDDEN // HEADS
INTER = 256
VOCAB = 64
MAX_POS = 32
TYPE_VOCAB = 2
VIS_FEAT_DIM = 16
VIS_POS_DIM = 4
L_LAYERS = 1          # args.llayers
R_LAYERS = 1          # args.rlayers
X_LAYERS = 1          # args.xlayers
LN_EPS = 1e-12
MASK_NEG = -10000.0
_BF16 = jnp.bfloat16


def _fs(shape):
    """Full-array BlockSpec (no grid)."""
    zeros = (0,) * len(shape)
    return pl.BlockSpec(shape, lambda: zeros)


# ----------------------------- in-kernel value helpers -----------------------------
def _mm(a, b):
    """bf16 MXU matmul with f32 accumulation."""
    return jnp.dot(a.astype(_BF16), b.astype(_BF16), preferred_element_type=jnp.float32)


def _ln_val(x, g, b):
    mu = jnp.mean(x, axis=-1, keepdims=True)
    var = jnp.mean(jnp.square(x - mu), axis=-1, keepdims=True)
    return (x - mu) * jax.lax.rsqrt(var + LN_EPS) * g + b


def _gelu(x):
    # TODO(synk): BERT uses erf-GELU; tanh approximation used here (numerically close, EUP-friendly).
    c = math.sqrt(2.0 / math.pi)
    return 0.5 * x * (1.0 + jnp.tanh(c * (x + 0.044715 * x * x * x)))


def _mha_core(q2, k2, v2, add_mask, wo, bo, g, beta, resid, *, B, Sq, Skv):
    """Multi-head attention from pre-projected q/k/v (B*Sq,H)/(B*Skv,H) values.
    Scale is already folded into the Q weights.  Returns residual-LayerNormed (B*Sq, H)."""
    q3 = q2.reshape(B, Sq, HIDDEN)
    k3 = k2.reshape(B, Skv, HIDDEN)
    v3 = v2.reshape(B, Skv, HIDDEN)
    ctx_heads = []
    for h in range(HEADS):  # static unroll (HEADS=2); Mosaic lacks multi-batch-dim dot_general
        sl = slice(h * HEAD_DIM, (h + 1) * HEAD_DIM)
        s = jnp.einsum("bqd,bkd->bqk",
                       q3[:, :, sl].astype(_BF16), k3[:, :, sl].astype(_BF16),
                       preferred_element_type=jnp.float32)
        if add_mask is not None:
            s = s + add_mask
        s = s - jnp.max(s, axis=-1, keepdims=True)
        probs = jnp.exp(s)
        probs = probs * pl.reciprocal(jnp.sum(probs, axis=-1, keepdims=True), approx=True)
        ctx = jnp.einsum("bqk,bkd->bqd",
                         probs.astype(_BF16), v3[:, :, sl].astype(_BF16),
                         preferred_element_type=jnp.float32)
        ctx_heads.append(ctx.reshape(B * Sq, HEAD_DIM))
    ctx_all = jnp.concatenate(ctx_heads, axis=-1)          # (B*Sq, H) -> single K=H wo push
    out = _mm(ctx_all, wo) + bo
    return _ln_val(out + resid, g, beta)


def _ffn_block(x2, fp):
    h = _gelu(_mm(x2, fp["wi"][...]) + fp["bi"][...])
    o = _mm(h, fp["wo"][...]) + fp["bo"][...]
    return _ln_val(o + x2, fp["ln_g"][...], fp["ln_b"][...])


def _self_layer(x2, add_mask, lp, *, B, S):
    """Whole BERT layer (self-attention block + FFN block) on VMEM-resident values."""
    ap = lp["att"]
    H = HIDDEN
    qkv = _mm(x2, ap["wqkv"][...]) + ap["bqkv"][...]       # one lane-dense matmul, N=3H
    a = _mha_core(qkv[:, :H], qkv[:, H:2 * H], qkv[:, 2 * H:], add_mask,
                  ap["wo"][...], ap["bo"][...], ap["ln_g"][...], ap["ln_b"][...], x2,
                  B=B, Sq=S, Skv=S)
    return _ffn_block(a, lp["ffn"])


def _cross_pair(lang, vis, l_add, v_add, cp, *, B, S, V):
    """Shared-weight bidirectional cross attention (lang<-vis and vis<-lang).
    Q and K/V projections run ONCE over the concatenated lang+vis rows."""
    H = HIDDEN
    rows_l = B * S
    both = jnp.concatenate([lang, vis], axis=0)            # (B*S + B*V, H)
    q_all = _mm(both, cp["wq"][...]) + cp["bq"][...]
    kv_all = _mm(both, cp["wkv"][...]) + cp["bkv"][...]
    q_l, q_v = q_all[:rows_l], q_all[rows_l:]
    k_l, v_l = kv_all[:rows_l, :H], kv_all[:rows_l, H:]
    k_v, v_v = kv_all[rows_l:, :H], kv_all[rows_l:, H:]
    wo, bo = cp["wo"][...], cp["bo"][...]
    g, beta = cp["ln_g"][...], cp["ln_b"][...]
    lang_x = _mha_core(q_l, k_v, v_v, v_add, wo, bo, g, beta, lang, B=B, Sq=S, Skv=V)
    vis_x = _mha_core(q_v, k_l, v_l, l_add, wo, bo, g, beta, vis, B=B, Sq=V, Skv=S)
    return lang_x, vis_x


# ----------------------------- the single fused kernel -----------------------------
def _lxrt_kernel(ids_ref, pos_ref, seg_ref, lmask_ref, feats_ref, boxes_ref,
                 *rest, treedef, B, S, V):
    w_refs, o_ref = rest[:-1], rest[-1]
    p = jax.tree_util.tree_unflatten(treedef, list(w_refs))

    BS = B * S
    # --- BERT embeddings: one-hot matmul gathers (tables live in VMEM) + LayerNorm ---
    emb = p["emb"]
    ids, pos, seg = ids_ref[...], pos_ref[...], seg_ref[...]            # (BS, 1) int32
    oh_w = jnp.where(lax.broadcasted_iota(jnp.int32, (BS, VOCAB), 1) == ids, 1.0, 0.0)
    oh_p = jnp.where(lax.broadcasted_iota(jnp.int32, (BS, MAX_POS), 1) == pos, 1.0, 0.0)
    e = _mm(oh_w, emb["word"][...]) + _mm(oh_p, emb["pos"][...])
    t = emb["type"][...].astype(jnp.float32)                             # (2, H)
    e = e + t[0:1, :] + seg.astype(jnp.float32) * (t[1:2, :] - t[0:1, :])
    lang = _ln_val(e, emb["ln_g"][...], emb["ln_b"][...])                # (B*S, H)

    # --- visual feature encoder: (LN(fc(feats)) + LN(fc(boxes))) / 2 ---
    vp = p["visn"]
    vx = _ln_val(_mm(feats_ref[...], vp["wf"][...]) + vp["bf"][...], vp["gf"][...], vp["cf"][...])
    vy = _ln_val(_mm(boxes_ref[...], vp["wb"][...]) + vp["bb"][...], vp["gb"][...], vp["cb"][...])
    vis = 0.5 * (vx + vy)                                                # (B*V, H)

    # --- additive masks (broadcast in-kernel; visual_attention_mask=None -> no mask) ---
    l_add = ((1.0 - lmask_ref[...]) * MASK_NEG)[:, None, :]              # (B, 1, S)
    v_add = None

    # --- language-only layers ---
    for lp in p["l_layers"]:
        lang = _self_layer(lang, l_add, lp, B=B, S=S)
    # --- visual (relation) layers ---
    for rp in p["r_layers"]:
        vis = _self_layer(vis, v_add, rp, B=B, S=V)
    # --- cross-modality layers: shared cross-attn, then per-stream self-attn + FFN ---
    for xp in p["x_layers"]:
        lang_x, vis_x = _cross_pair(lang, vis, l_add, v_add, xp["cross"], B=B, S=S, V=V)
        lang = _self_layer(lang_x, l_add, xp["lang"], B=B, S=S)
        vis = _self_layer(vis_x, v_add, xp["vis"], B=B, S=V)

    # --- pooler (mode='x'): CLS token -> dense -> tanh ---
    lang3 = lang.reshape(B, S, HIDDEN)
    cls = lax.slice_in_dim(lang3, 0, 1, axis=1).reshape(B, HIDDEN)
    o_ref[...] = jnp.tanh(_mm(cls, p["pooler"]["w"][...]) + p["pooler"]["b"][...])


# ----------------------------- wrapper (one pallas_call for the whole forward) ---------------
@jax.jit
def lxrt_forward(params, input_ids, token_position, segment_ids, input_mask, feats, boxes):
    B, S = input_ids.shape
    V = feats.shape[1]
    data_in = [
        input_ids.reshape(B * S, 1).astype(jnp.int32),
        token_position.reshape(B * S, 1).astype(jnp.int32),
        segment_ids.reshape(B * S, 1).astype(jnp.int32),
        input_mask.astype(jnp.float32),                    # (B, S)
        feats.reshape(B * V, VIS_FEAT_DIM),
        boxes.reshape(B * V, VIS_POS_DIM),
    ]
    flat_w, treedef = jax.tree_util.tree_flatten(params)
    in_specs = [_fs(x.shape) for x in data_in] + [_fs(w.shape) for w in flat_w]
    kern = functools.partial(_lxrt_kernel, treedef=treedef, B=B, S=S, V=V)
    return pl.pallas_call(
        kern,
        out_shape=jax.ShapeDtypeStruct((B, HIDDEN), jnp.float32),
        in_specs=in_specs,
        out_specs=_fs((B, HIDDEN)),
        compiler_params=pltpu.CompilerParams(vmem_limit_bytes=32 * 1024 * 1024),
    )(*data_in, *flat_w)


# ----------------------------- parameters (deterministic synthetic init, pre-packed) ---------
def init_params(key):
    keys = iter(jax.random.split(key, 256))
    q_scale = 1.0 / math.sqrt(HEAD_DIM)

    def rand(*shape):
        return jax.random.normal(next(keys), shape, jnp.float32) * 0.02

    def self_attn_p():
        # 1/sqrt(head_dim) folded into the Q block of the fused QKV weight at prep time.
        wqkv = jnp.concatenate(
            [rand(HIDDEN, HIDDEN) * q_scale, rand(HIDDEN, HIDDEN), rand(HIDDEN, HIDDEN)],
            axis=1).astype(_BF16)
        return {"wqkv": wqkv,
                "bqkv": jnp.zeros((1, 3 * HIDDEN), jnp.float32),
                "wo": rand(HIDDEN, HIDDEN).astype(_BF16),
                "bo": jnp.zeros((1, HIDDEN), jnp.float32),
                "ln_g": jnp.ones((1, HIDDEN), jnp.float32),
                "ln_b": jnp.zeros((1, HIDDEN), jnp.float32)}

    def cross_attn_p():
        return {"wq": (rand(HIDDEN, HIDDEN) * q_scale).astype(_BF16),
                "bq": jnp.zeros((1, HIDDEN), jnp.float32),
                "wkv": jnp.concatenate([rand(HIDDEN, HIDDEN), rand(HIDDEN, HIDDEN)],
                                       axis=1).astype(_BF16),
                "bkv": jnp.zeros((1, 2 * HIDDEN), jnp.float32),
                "wo": rand(HIDDEN, HIDDEN).astype(_BF16),
                "bo": jnp.zeros((1, HIDDEN), jnp.float32),
                "ln_g": jnp.ones((1, HIDDEN), jnp.float32),
                "ln_b": jnp.zeros((1, HIDDEN), jnp.float32)}

    def ffn_p():
        return {"wi": rand(HIDDEN, INTER).astype(_BF16),
                "bi": jnp.zeros((1, INTER), jnp.float32),
                "wo": rand(INTER, HIDDEN).astype(_BF16),
                "bo": jnp.zeros((1, HIDDEN), jnp.float32),
                "ln_g": jnp.ones((1, HIDDEN), jnp.float32),
                "ln_b": jnp.zeros((1, HIDDEN), jnp.float32)}

    def bert_layer():
        return {"att": self_attn_p(), "ffn": ffn_p()}

    def x_layer():
        # cross-attention weights shared between lang->vis and vis->lang (as in LXMERT)
        return {"cross": cross_attn_p(), "lang": bert_layer(), "vis": bert_layer()}

    return {
        "emb": {"word": rand(VOCAB, HIDDEN).astype(_BF16),
                "pos": rand(MAX_POS, HIDDEN).astype(_BF16),
                "type": rand(TYPE_VOCAB, HIDDEN).astype(_BF16),
                "ln_g": jnp.ones((1, HIDDEN), jnp.float32),
                "ln_b": jnp.zeros((1, HIDDEN), jnp.float32)},
        "visn": {"wf": rand(VIS_FEAT_DIM, HIDDEN).astype(_BF16),
                 "bf": jnp.zeros((1, HIDDEN), jnp.float32),
                 "gf": jnp.ones((1, HIDDEN), jnp.float32),
                 "cf": jnp.zeros((1, HIDDEN), jnp.float32),
                 "wb": rand(VIS_POS_DIM, HIDDEN).astype(_BF16),
                 "bb": jnp.zeros((1, HIDDEN), jnp.float32),
                 "gb": jnp.ones((1, HIDDEN), jnp.float32),
                 "cb": jnp.zeros((1, HIDDEN), jnp.float32)},
        "l_layers": [bert_layer() for _ in range(L_LAYERS)],
        "r_layers": [bert_layer() for _ in range(R_LAYERS)],
        "x_layers": [x_layer() for _ in range(X_LAYERS)],
        "pooler": {"w": rand(HIDDEN, HIDDEN).astype(_BF16),
                   "b": jnp.zeros((1, HIDDEN), jnp.float32)},
    }


# ----------------------------- main -----------------------------
if __name__ == "__main__":
    key = jax.random.PRNGKey(0)
    pkey, fkey, bkey = jax.random.split(key, 3)
    params = init_params(pkey)

    B, S, V = 2, 8, 4  # batch, max_seq_length, num visual objects

    # TODO(synk): BertTokenizer string tokenization has no Pallas/JAX equivalent;
    # the token ids / word-level positions / masks below are synthetic but shaped exactly
    # as convert_sents_to_features_sent would produce ([CLS]...[SEP] + zero padding).
    input_ids = jnp.array([[2, 10, 11, 12, 3, 0, 0, 0],
                           [2, 20, 21, 22, 23, 24, 3, 0]], dtype=jnp.int32)
    token_position = jnp.array([[1, 1, 2, 3, 1, 0, 0, 0],
                                [1, 1, 2, 2, 3, 4, 1, 0]], dtype=jnp.int32)
    input_mask = jnp.array([[1, 1, 1, 1, 1, 0, 0, 0],
                            [1, 1, 1, 1, 1, 1, 1, 0]], dtype=jnp.int32)
    segment_ids = jnp.zeros((B, S), dtype=jnp.int32)

    feats = jax.random.normal(fkey, (B, V, VIS_FEAT_DIM), jnp.float32)
    boxes = jax.random.uniform(bkey, (B, V, VIS_POS_DIM), jnp.float32)

    out = lxrt_forward(params, input_ids, token_position, segment_ids, input_mask, feats, boxes)
    out = jax.block_until_ready(out)
    assert out.shape == (B, HIDDEN) and out.dtype == jnp.float32
    assert bool(jnp.all(jnp.isfinite(out)))
    print("KERNEL_OK")
</pallas_src>

<mosaic_0001>
module attributes {stable_mosaic.version = 11 : i64} {
  func.func @_lxrt_kernel(%arg0: memref<16x1xi32, #tpu.memory_space<vmem>>, %arg1: memref<16x1xi32, #tpu.memory_space<vmem>>, %arg2: memref<16x1xi32, #tpu.memory_space<vmem>>, %arg3: memref<2x8xf32, #tpu.memory_space<vmem>>, %arg4: memref<8x16xf32, #tpu.memory_space<vmem>>, %arg5: memref<8x4xf32, #tpu.memory_space<vmem>>, %arg6: memref<1x128xf32, #tpu.memory_space<vmem>>, %arg7: memref<1x128xf32, #tpu.memory_space<vmem>>, %arg8: memref<32x128xbf16, #tpu.memory_space<vmem>>, %arg9: memref<2x128xbf16, #tpu.memory_space<vmem>>, %arg10: memref<64x128xbf16, #tpu.memory_space<vmem>>, %arg11: memref<1x128xf32, #tpu.memory_space<vmem>>, %arg12: memref<1x384xf32, #tpu.memory_space<vmem>>, %arg13: memref<1x128xf32, #tpu.memory_space<vmem>>, %arg14: memref<1x128xf32, #tpu.memory_space<vmem>>, %arg15: memref<128x128xbf16, #tpu.memory_space<vmem>>, %arg16: memref<128x384xbf16, #tpu.memory_space<vmem>>, %arg17: memref<1x256xf32, #tpu.memory_space<vmem>>, %arg18: memref<1x128xf32, #tpu.memory_space<vmem>>, %arg19: memref<1x128xf32, #tpu.memory_space<vmem>>, %arg20: memref<1x128xf32, #tpu.memory_space<vmem>>, %arg21: memref<128x256xbf16, #tpu.memory_space<vmem>>, %arg22: memref<256x128xbf16, #tpu.memory_space<vmem>>, %arg23: memref<1x128xf32, #tpu.memory_space<vmem>>, %arg24: memref<128x128xbf16, #tpu.memory_space<vmem>>, %arg25: memref<1x128xf32, #tpu.memory_space<vmem>>, %arg26: memref<1x384xf32, #tpu.memory_space<vmem>>, %arg27: memref<1x128xf32, #tpu.memory_space<vmem>>, %arg28: memref<1x128xf32, #tpu.memory_space<vmem>>, %arg29: memref<128x128xbf16, #tpu.memory_space<vmem>>, %arg30: memref<128x384xbf16, #tpu.memory_space<vmem>>, %arg31: memref<1x256xf32, #tpu.memory_space<vmem>>, %arg32: memref<1x128xf32, #tpu.memory_space<vmem>>, %arg33: memref<1x128xf32, #tpu.memory_space<vmem>>, %arg34: memref<1x128xf32, #tpu.memory_space<vmem>>, %arg35: memref<128x256xbf16, #tpu.memory_space<vmem>>, %arg36: memref<256x128xbf16, #tpu.memory_space<vmem>>, %arg37: memref<1x128xf32, #tpu.memory_space<vmem>>, %arg38: memref<1x128xf32, #tpu.memory_space<vmem>>, %arg39: memref<1x128xf32, #tpu.memory_space<vmem>>, %arg40: memref<1x128xf32, #tpu.memory_space<vmem>>, %arg41: memref<1x128xf32, #tpu.memory_space<vmem>>, %arg42: memref<1x128xf32, #tpu.memory_space<vmem>>, %arg43: memref<4x128xbf16, #tpu.memory_space<vmem>>, %arg44: memref<16x128xbf16, #tpu.memory_space<vmem>>, %arg45: memref<1x256xf32, #tpu.memory_space<vmem>>, %arg46: memref<1x128xf32, #tpu.memory_space<vmem>>, %arg47: memref<1x128xf32, #tpu.memory_space<vmem>>, %arg48: memref<1x128xf32, #tpu.memory_space<vmem>>, %arg49: memref<1x128xf32, #tpu.memory_space<vmem>>, %arg50: memref<128x256xbf16, #tpu.memory_space<vmem>>, %arg51: memref<128x128xbf16, #tpu.memory_space<vmem>>, %arg52: memref<128x128xbf16, #tpu.memory_space<vmem>>, %arg53: memref<1x128xf32, #tpu.memory_space<vmem>>, %arg54: memref<1x384xf32, #tpu.memory_space<vmem>>, %arg55: memref<1x128xf32, #tpu.memory_space<vmem>>, %arg56: memref<1x128xf32, #tpu.memory_space<vmem>>, %arg57: memref<128x128xbf16, #tpu.memory_space<vmem>>, %arg58: memref<128x384xbf16, #tpu.memory_space<vmem>>, %arg59: memref<1x256xf32, #tpu.memory_space<vmem>>, %arg60: memref<1x128xf32, #tpu.memory_space<vmem>>, %arg61: memref<1x128xf32, #tpu.memory_space<vmem>>, %arg62: memref<1x128xf32, #tpu.memory_space<vmem>>, %arg63: memref<128x256xbf16, #tpu.memory_space<vmem>>, %arg64: memref<256x128xbf16, #tpu.memory_space<vmem>>, %arg65: memref<1x128xf32, #tpu.memory_space<vmem>>, %arg66: memref<1x384xf32, #tpu.memory_space<vmem>>, %arg67: memref<1x128xf32, #tpu.memory_space<vmem>>, %arg68: memref<1x128xf32, #tpu.memory_space<vmem>>, %arg69: memref<128x128xbf16, #tpu.memory_space<vmem>>, %arg70: memref<128x384xbf16, #tpu.memory_space<vmem>>, %arg71: memref<1x256xf32, #tpu.memory_space<vmem>>, %arg72: memref<1x128xf32, #tpu.memory_space<vmem>>, %arg73: memref<1x128xf32, #tpu.memory_space<vmem>>, %arg74: memref<1x128xf32, #tpu.memory_space<vmem>>, %arg75: memref<128x256xbf16, #tpu.memory_space<vmem>>, %arg76: memref<256x128xbf16, #tpu.memory_space<vmem>>, %arg77: memref<2x128xf32, #tpu.memory_space<vmem>>) attributes {dimension_semantics = [], scalar_prefetch = 0 : i64, scratch_operands = 0 : i64, tpu.core_type = #tpu.core_type<tc>} {
    %c0 = arith.constant 0 : index
    %c0_0 = arith.constant 0 : index
    %0 = vector.load %arg0[%c0, %c0_0] : memref<16x1xi32, #tpu.memory_space<vmem>>, vector<16x1xi32>
    %c0_1 = arith.constant 0 : index
    %c0_2 = arith.constant 0 : index
    %1 = vector.load %arg1[%c0_1, %c0_2] : memref<16x1xi32, #tpu.memory_space<vmem>>, vector<16x1xi32>
    %c0_3 = arith.constant 0 : index
    %c0_4 = arith.constant 0 : index
    %2 = vector.load %arg2[%c0_3, %c0_4] : memref<16x1xi32, #tpu.memory_space<vmem>>, vector<16x1xi32>
    %3 = tpu.iota {dimensions = array<i32: 1>} : vector<16x64xi32>
    %4 = vector.broadcast %0 : vector<16x1xi32> to vector<16x64xi32>
    %5 = arith.cmpi eq, %3, %4 : vector<16x64xi32>
    %cst = arith.constant 1.000000e+00 : f32
    %cst_5 = arith.constant 0.000000e+00 : f32
    %6 = vector.broadcast %cst : f32 to vector<16x64xf32>
    %7 = vector.broadcast %cst_5 : f32 to vector<16x64xf32>
    %8 = arith.select %5, %6, %7 : vector<16x64xi1>, vector<16x64xf32>
    %9 = tpu.iota {dimensions = array<i32: 1>} : vector<16x32xi32>
    %10 = vector.broadcast %1 : vector<16x1xi32> to vector<16x32xi32>
    %11 = arith.cmpi eq, %9, %10 : vector<16x32xi32>
    %cst_6 = arith.constant 1.000000e+00 : f32
    %cst_7 = arith.constant 0.000000e+00 : f32
    %12 = vector.broadcast %cst_6 : f32 to vector<16x32xf32>
    %13 = vector.broadcast %cst_7 : f32 to vector<16x32xf32>
    %14 = arith.select %11, %12, %13 : vector<16x32xi1>, vector<16x32xf32>
    %c0_8 = arith.constant 0 : index
    %c0_9 = arith.constant 0 : index
    %15 = vector.load %arg10[%c0_8, %c0_9] : memref<64x128xbf16, #tpu.memory_space<vmem>>, vector<64x128xbf16>
    %16 = arith.truncf %8 : vector<16x64xf32> to vector<16x64xbf16>
    %cst_10 = arith.constant dense<0.000000e+00> : vector<16x128xf32>
    %17 = tpu.matmul %16, %15, %cst_10 {dimension_numbers = #tpu.dot_dimension_numbers<[1], [0], [0], [1], [0, 0, 1, 1], [], []>} : vector<16x64xbf16>, vector<64x128xbf16>, vector<16x128xf32> -> vector<16x128xf32>
    %c0_11 = arith.constant 0 : index
    %c0_12 = arith.constant 0 : index
    %18 = vector.load %arg8[%c0_11, %c0_12] : memref<32x128xbf16, #tpu.memory_space<vmem>>, vector<32x128xbf16>
    %19 = arith.truncf %14 : vector<16x32xf32> to vector<16x32xbf16>
    %cst_13 = arith.constant dense<0.000000e+00> : vector<16x128xf32>
    %20 = tpu.matmul %19, %18, %cst_13 {dimension_numbers = #tpu.dot_dimension_numbers<[1], [0], [0], [1], [0, 0, 1, 1], [], []>} : vector<16x32xbf16>, vector<32x128xbf16>, vector<16x128xf32> -> vector<16x128xf32>
    %21 = arith.addf %17, %20 : vector<16x128xf32>
    %c0_14 = arith.constant 0 : index
    %c0_15 = arith.constant 0 : index
    %22 = vector.load %arg9[%c0_14, %c0_15] : memref<2x128xbf16, #tpu.memory_space<vmem>>, vector<2x128xbf16>
    %23 = arith.extf %22 : vector<2x128xbf16> to vector<2x128xf32>
    %24 = vector.extract_strided_slice %23 {offsets = [0, 0], sizes = [1, 128], strides = [1, 1]} : vector<2x128xf32> to vector<1x128xf32>
    %25 = vector.broadcast %24 : vector<1x128xf32> to vector<16x128xf32>
    %26 = arith.addf %21, %25 : vector<16x128xf32>
    %27 = arith.sitofp %2 : vector<16x1xi32> to vector<16x1xf32>
    %28 = vector.extract_strided_slice %23 {offsets = [1, 0], sizes = [1, 128], strides = [1, 1]} : vector<2x128xf32> to vector<1x128xf32>
    %29 = vector.extract_strided_slice %23 {offsets = [0, 0], sizes = [1, 128], strides = [1, 1]} : vector<2x128xf32> to vector<1x128xf32>
    %30 = arith.subf %28, %29 : vector<1x128xf32>
    %31 = vector.broadcast %27 : vector<16x1xf32> to vector<16x128xf32>
    %32 = vector.broadcast %30 : vector<1x128xf32> to vector<16x128xf32>
    %33 = arith.mulf %31, %32 : vector<16x128xf32>
    %34 = arith.addf %26, %33 : vector<16x128xf32>
    %c0_16 = arith.constant 0 : index
    %c0_17 = arith.constant 0 : index
    %35 = vector.load %arg7[%c0_16, %c0_17] : memref<1x128xf32, #tpu.memory_space<vmem>>, vector<1x128xf32>
    %c0_18 = arith.constant 0 : index
    %c0_19 = arith.constant 0 : index
    %36 = vector.load %arg6[%c0_18, %c0_19] : memref<1x128xf32, #tpu.memory_space<vmem>>, vector<1x128xf32>
    %cst_20 = arith.constant dense<0.000000e+00> : vector<16xf32>
    %37 = vector.multi_reduction <add>, %34, %cst_20 [1] : vector<16x128xf32> to vector<16xf32>
    %38 = vector.shape_cast %37 : vector<16xf32> to vector<16x1xf32>
    %cst_21 = arith.constant 1.280000e+02 : f32
    %39 = vector.broadcast %cst_21 : f32 to vector<16x1xf32>
    %40 = arith.divf %38, %39 : vector<16x1xf32>
    %41 = vector.broadcast %40 : vector<16x1xf32> to vector<16x128xf32>
    %42 = arith.subf %34, %41 : vector<16x128xf32>
    %43 = arith.mulf %42, %42 : vector<16x128xf32>
    %cst_22 = arith.constant dense<0.000000e+00> : vector<16xf32>
    %44 = vector.multi_reduction <add>, %43, %cst_22 [1] : vector<16x128xf32> to vector<16xf32>
    %45 = vector.shape_cast %44 : vector<16xf32> to vector<16x1xf32>
    %cst_23 = arith.constant 1.280000e+02 : f32
    %46 = vector.broadcast %cst_23 : f32 to vector<16x1xf32>
    %47 = arith.divf %45, %46 : vector<16x1xf32>
    %48 = vector.broadcast %40 : vector<16x1xf32> to vector<16x128xf32>
    %49 = arith.subf %34, %48 : vector<16x128xf32>
    %cst_24 = arith.constant 9.99999996E-13 : f32
    %50 = vector.broadcast %cst_24 : f32 to vector<16x1xf32>
    %51 = arith.addf %47, %50 : vector<16x1xf32>
    %52 = math.rsqrt %51 : vector<16x1xf32>
    %53 = vector.broadcast %52 : vector<16x1xf32> to vector<16x128xf32>
    %54 = arith.mulf %49, %53 : vector<16x128xf32>
    %55 = vector.broadcast %35 : vector<1x128xf32> to vector<16x128xf32>
    %56 = arith.mulf %54, %55 : vector<16x128xf32>
    %57 = vector.broadcast %36 : vector<1x128xf32> to vector<16x128xf32>
    %58 = arith.addf %56, %57 : vector<16x128xf32>
    %c0_25 = arith.constant 0 : index
    %c0_26 = arith.constant 0 : index
    %59 = vector.load %arg4[%c0_25, %c0_26] : memref<8x16xf32, #tpu.memory_space<vmem>>, vector<8x16xf32>
    %c0_27 = arith.constant 0 : index
    %c0_28 = arith.constant 0 : index
    %60 = vector.load %arg44[%c0_27, %c0_28] : memref<16x128xbf16, #tpu.memory_space<vmem>>, vector<16x128xbf16>
    %61 = arith.truncf %59 : vector<8x16xf32> to vector<8x16xbf16>
    %cst_29 = arith.constant dense<0.000000e+00> : vector<8x128xf32>
    %62 = tpu.matmul %61, %60, %cst_29 {dimension_numbers = #tpu.dot_dimension_numbers<[1], [0], [0], [1], [0, 0, 1, 1], [], []>} : vector<8x16xbf16>, vector<16x128xbf16>, vector<8x128xf32> -> vector<8x128xf32>
    %c0_30 = arith.constant 0 : index
    %c0_31 = arith.constant 0 : index
    %63 = vector.load %arg38[%c0_30, %c0_31] : memref<1x128xf32, #tpu.memory_space<vmem>>, vector<1x128xf32>
    %64 = vector.broadcast %63 : vector<1x128xf32> to vector<8x128xf32>
    %65 = arith.addf %62, %64 : vector<8x128xf32>
    %c0_32 = arith.constant 0 : index
    %c0_33 = arith.constant 0 : index
    %66 = vector.load %arg42[%c0_32, %c0_33] : memref<1x128xf32, #tpu.memory_space<vmem>>, vector<1x128xf32>
    %c0_34 = arith.constant 0 : index
    %c0_35 = arith.constant 0 : index
    %67 = vector.load %arg40[%c0_34, %c0_35] : memref<1x128xf32, #tpu.memory_space<vmem>>, vector<1x128xf32>
    %cst_36 = arith.constant dense<0.000000e+00> : vector<8xf32>
    %68 = vector.multi_reduction <add>, %65, %cst_36 [1] : vector<8x128xf32> to vector<8xf32>
    %69 = vector.shape_cast %68 : vector<8xf32> to vector<8x1xf32>
    %cst_37 = arith.constant 1.280000e+02 : f32
    %70 = vector.broadcast %cst_37 : f32 to vector<8x1xf32>
    %71 = arith.divf %69, %70 : vector<8x1xf32>
    %72 = vector.broadcast %71 : vector<8x1xf32> to vector<8x128xf32>
    %73 = arith.subf %65, %72 : vector<8x128xf32>
    %74 = arith.mulf %73, %73 : vector<8x128xf32>
    %cst_38 = arith.constant dense<0.000000e+00> : vector<8xf32>
    %75 = vector.multi_reduction <add>, %74, %cst_38 [1] : vector<8x128xf32> to vector<8xf32>
    %76 = vector.shape_cast %75 : vector<8xf32> to vector<8x1xf32>
    %cst_39 = arith.constant 1.280000e+02 : f32
    %77 = vector.broadcast %cst_39 : f32 to vector<8x1xf32>
    %78 = arith.divf %76, %77 : vector<8x1xf32>
    %79 = vector.broadcast %71 : vector<8x1xf32> to vector<8x128xf32>
    %80 = arith.subf %65, %79 : vector<8x128xf32>
    %cst_40 = arith.constant 9.99999996E-13 : f32
    %81 = vector.broadcast %cst_40 : f32 to vector<8x1xf32>
    %82 = arith.addf %78, %81 : vector<8x1xf32>
    %83 = math.rsqrt %82 : vector<8x1xf32>
    %84 = vector.broadcast %83 : vector<8x1xf32> to vector<8x128xf32>
    %85 = arith.mulf %80, %84 : vector<8x128xf32>
    %86 = vector.broadcast %66 : vector<1x128xf32> to vector<8x128xf32>
    %87 = arith.mulf %85, %86 : vector<8x128xf32>
    %88 = vector.broadcast %67 : vector<1x128xf32> to vector<8x128xf32>
    %89 = arith.addf %87, %88 : vector<8x128xf32>
    %c0_41 = arith.constant 0 : index
    %c0_42 = arith.constant 0 : index
    %90 = vector.load %arg5[%c0_41, %c0_42] : memref<8x4xf32, #tpu.memory_space<vmem>>, vector<8x4xf32>
    %c0_43 = arith.constant 0 : index
    %c0_44 = arith.constant 0 : index
    %91 = vector.load %arg43[%c0_43, %c0_44] : memref<4x128xbf16, #tpu.memory_space<vmem>>, vector<4x128xbf16>
    %92 = arith.truncf %90 : vector<8x4xf32> to vector<8x4xbf16>
    %cst_45 = arith.constant dense<0.000000e+00> : vector<8x128xf32>
    %93 = tpu.matmul %92, %91, %cst_45 {dimension_numbers = #tpu.dot_dimension_numbers<[1], [0], [0], [1], [0, 0, 1, 1], [], []>} : vector<8x4xbf16>, vector<4x128xbf16>, vector<8x128xf32> -> vector<8x128xf32>
    %c0_46 = arith.constant 0 : index
    %c0_47 = arith.constant 0 : index
    %94 = vector.load %arg37[%c0_46, %c0_47] : memref<1x128xf32, #tpu.memory_space<vmem>>, vector<1x128xf32>
    %95 = vector.broadcast %94 : vector<1x128xf32> to vector<8x128xf32>
    %96 = arith.addf %93, %95 : vector<8x128xf32>
    %c0_48 = arith.constant 0 : index
    %c0_49 = arith.constant 0 : index
    %97 = vector.load %arg41[%c0_48, %c0_49] : memref<1x128xf32, #tpu.memory_space<vmem>>, vector<1x128xf32>
    %c0_50 = arith.constant 0 : index
    %c0_51 = arith.constant 0 : index
    %98 = vector.load %arg39[%c0_50, %c0_51] : memref<1x128xf32, #tpu.memory_space<vmem>>, vector<1x128xf32>
    %cst_52 = arith.constant dense<0.000000e+00> : vector<8xf32>
    %99 = vector.multi_reduction <add>, %96, %cst_52 [1] : vector<8x128xf32> to vector<8xf32>
    %100 = vector.shape_cast %99 : vector<8xf32> to vector<8x1xf32>
    %cst_53 = arith.constant 1.280000e+02 : f32
    %101 = vector.broadcast %cst_53 : f32 to vector<8x1xf32>
    %102 = arith.divf %100, %101 : vector<8x1xf32>
    %103 = vector.broadcast %102 : vector<8x1xf32> to vector<8x128xf32>
    %104 = arith.subf %96, %103 : vector<8x128xf32>
    %105 = arith.mulf %104, %104 : vector<8x128xf32>
    %cst_54 = arith.constant dense<0.000000e+00> : vector<8xf32>
    %106 = vector.multi_reduction <add>, %105, %cst_54 [1] : vector<8x128xf32> to vector<8xf32>
    %107 = vector.shape_cast %106 : vector<8xf32> to vector<8x1xf32>
    %cst_55 = arith.constant 1.280000e+02 : f32
    %108 = vector.broadcast %cst_55 : f32 to vector<8x1xf32>
    %109 = arith.divf %107, %108 : vector<8x1xf32>
    %110 = vector.broadcast %102 : vector<8x1xf32> to vector<8x128xf32>
    %111 = arith.subf %96, %110 : vector<8x128xf32>
    %cst_56 = arith.constant 9.99999996E-13 : f32
    %112 = vector.broadcast %cst_56 : f32 to vector<8x1xf32>
    %113 = arith.addf %109, %112 : vector<8x1xf32>
    %114 = math.rsqrt %113 : vector<8x1xf32>
    %115 = vector.broadcast %114 : vector<8x1xf32> to vector<8x128xf32>
    %116 = arith.mulf %111, %115 : vector<8x128xf32>
    %117 = vector.broadcast %97 : vector<1x128xf32> to vector<8x128xf32>
    %118 = arith.mulf %116, %117 : vector<8x128xf32>
    %119 = vector.broadcast %98 : vector<1x128xf32> to vector<8x128xf32>
    %120 = arith.addf %118, %119 : vector<8x128xf32>
    %121 = arith.addf %89, %120 : vector<8x128xf32>
    %cst_57 = arith.constant 5.000000e-01 : f32
    %122 = vector.broadcast %cst_57 : f32 to vector<8x128xf32>
    %123 = arith.mulf %122, %121 : vector<8x128xf32>
    %c0_58 = arith.constant 0 : index
    %c0_59 = arith.constant 0 : index
    %124 = vector.load %arg3[%c0_58, %c0_59] : memref<2x8xf32, #tpu.memory_space<vmem>>, vector<2x8xf32>
    %cst_60 = arith.constant 1.000000e+00 : f32
    %125 = vector.broadcast %cst_60 : f32 to vector<2x8xf32>
    %126 = arith.subf %125, %124 : vector<2x8xf32>
    %cst_61 = arith.constant -1.000000e+04 : f32
    %127 = vector.broadcast %cst_61 : f32 to vector<2x8xf32>
    %128 = arith.mulf %126, %127 : vector<2x8xf32>
    %129 = vector.shape_cast %128 : vector<2x8xf32> to vector<2x1x8xf32>
    %c0_62 = arith.constant 0 : index
    %c0_63 = arith.constant 0 : index
    %130 = vector.load %arg16[%c0_62, %c0_63] : memref<128x384xbf16, #tpu.memory_space<vmem>>, vector<128x384xbf16>
    %131 = arith.truncf %58 : vector<16x128xf32> to vector<16x128xbf16>
    %cst_64 = arith.constant dense<0.000000e+00> : vector<16x384xf32>
    %132 = tpu.matmul %131, %130, %cst_64 {dimension_numbers = #tpu.dot_dimension_numbers<[1], [0], [0], [1], [0, 0, 1, 1], [], []>} : vector<16x128xbf16>, vector<128x384xbf16>, vector<16x384xf32> -> vector<16x384xf32>
    %c0_65 = arith.constant 0 : index
    %c0_66 = arith.constant 0 : index
    %133 = vector.load %arg12[%c0_65, %c0_66] : memref<1x384xf32, #tpu.memory_space<vmem>>, vector<1x384xf32>
    %134 = vector.broadcast %133 : vector<1x384xf32> to vector<16x384xf32>
    %135 = arith.addf %132, %134 : vector<16x384xf32>
    %136 = vector.extract_strided_slice %135 {offsets = [0, 0], sizes = [16, 128], strides = [1, 1]} : vector<16x384xf32> to vector<16x128xf32>
    %137 = vector.extract_strided_slice %135 {offsets = [0, 128], sizes = [16, 128], strides = [1, 1]} : vector<16x384xf32> to vector<16x128xf32>
    %138 = vector.extract_strided_slice %135 {offsets = [0, 256], sizes = [16, 128], strides = [1, 1]} : vector<16x384xf32> to vector<16x128xf32>
    %c0_67 = arith.constant 0 : index
    %c0_68 = arith.constant 0 : index
    %139 = vector.load %arg15[%c0_67, %c0_68] : memref<128x128xbf16, #tpu.memory_space<vmem>>, vector<128x128xbf16>
    %c0_69 = arith.constant 0 : index
    %c0_70 = arith.constant 0 : index
    %140 = vector.load %arg11[%c0_69, %c0_70] : memref<1x128xf32, #tpu.memory_space<vmem>>, vector<1x128xf32>
    %c0_71 = arith.constant 0 : index
    %c0_72 = arith.constant 0 : index
    %141 = vector.load %arg14[%c0_71, %c0_72] : memref<1x128xf32, #tpu.memory_space<vmem>>, vector<1x128xf32>
    %c0_73 = arith.constant 0 : index
    %c0_74 = arith.constant 0 : index
    %142 = vector.load %arg13[%c0_73, %c0_74] : memref<1x128xf32, #tpu.memory_space<vmem>>, vector<1x128xf32>
    %143 = vector.shape_cast %136 : vector<16x128xf32> to vector<2x8x128xf32>
    %144 = vector.shape_cast %137 : vector<16x128xf32> to vector<2x8x128xf32>
    %145 = vector.shape_cast %138 : vector<16x128xf32> to vector<2x8x128xf32>
    %146 = vector.extract_strided_slice %143 {offsets = [0, 0, 0], sizes = [2, 8, 64], strides = [1, 1, 1]} : vector<2x8x128xf32> to vector<2x8x64xf32>
    %147 = arith.truncf %146 : vector<2x8x64xf32> to vector<2x8x64xbf16>
    %148 = vector.extract_strided_slice %144 {offsets = [0, 0, 0], sizes = [2, 8, 64], strides = [1, 1, 1]} : vector<2x8x128xf32> to vector<2x8x64xf32>
    %149 = arith.truncf %148 : vector<2x8x64xf32> to vector<2x8x64xbf16>
    "tpu.trace_start"() <{level = 10 : i32, message = "bqd,bkd->bqk"}> : () -> ()
    %cst_75 = arith.constant dense<0.000000e+00> : vector<2x8x8xf32>
    %150 = tpu.matmul %147, %149, %cst_75 {dimension_numbers = #tpu.dot_dimension_numbers<[2], [2], [1], [1], [0, 0, 0, 1, 1, 1], [0], [0]>} : vector<2x8x64xbf16>, vector<2x8x64xbf16>, vector<2x8x8xf32> -> vector<2x8x8xf32>
    "tpu.trace_stop"() : () -> ()
    %151 = vector.broadcast %129 : vector<2x1x8xf32> to vector<2x8x8xf32>
    %152 = arith.addf %150, %151 : vector<2x8x8xf32>
    %cst_76 = arith.constant dense<0xFF800000> : vector<2x8xf32>
    %153 = vector.multi_reduction <maximumf>, %152, %cst_76 [2] : vector<2x8x8xf32> to vector<2x8xf32>
    %154 = vector.shape_cast %153 : vector<2x8xf32> to vector<2x8x1xf32>
    %155 = vector.broadcast %154 : vector<2x8x1xf32> to vector<2x8x8xf32>
    %156 = arith.subf %152, %155 : vector<2x8x8xf32>
    %157 = math.exp %156 : vector<2x8x8xf32>
    %cst_77 = arith.constant dense<0.000000e+00> : vector<2x8xf32>
    %158 = vector.multi_reduction <add>, %157, %cst_77 [2] : vector<2x8x8xf32> to vector<2x8xf32>
    %159 = vector.shape_cast %158 : vector<2x8xf32> to vector<2x8x1xf32>
    %160 = tpu.reciprocal %159 {approx = true} : vector<2x8x1xf32> -> vector<2x8x1xf32>
    %161 = vector.broadcast %160 : vector<2x8x1xf32> to vector<2x8x8xf32>
    %162 = arith.mulf %157, %161 : vector<2x8x8xf32>
    %163 = arith.truncf %162 : vector<2x8x8xf32> to vector<2x8x8xbf16>
    %164 = vector.extract_strided_slice %145 {offsets = [0, 0, 0], sizes = [2, 8, 64], strides = [1, 1, 1]} : vector<2x8x128xf32> to vector<2x8x64xf32>
    %165 = arith.truncf %164 : vector<2x8x64xf32> to vector<2x8x64xbf16>
    "tpu.trace_start"() <{level = 10 : i32, message = "bqk,bkd->bqd"}> : () -> ()
    %cst_78 = arith.constant dense<0.000000e+00> : vector<2x8x64xf32>
    %166 = tpu.matmul %163, %165, %cst_78 {dimension_numbers = #tpu.dot_dimension_numbers<[2], [1], [1], [2], [0, 0, 0, 1, 1, 2], [0], [0]>} : vector<2x8x8xbf16>, vector<2x8x64xbf16>, vector<2x8x64xf32> -> vector<2x8x64xf32>
    "tpu.trace_stop"() : () -> ()
    %167 = vector.shape_cast %166 : vector<2x8x64xf32> to vector<16x64xf32>
    %168 = vector.extract_strided_slice %143 {offsets = [0, 0, 64], sizes = [2, 8, 64], strides = [1, 1, 1]} : vector<2x8x128xf32> to vector<2x8x64xf32>
    %169 = arith.truncf %168 : vector<2x8x64xf32> to vector<2x8x64xbf16>
    %170 = vector.extract_strided_slice %144 {offsets = [0, 0, 64], sizes = [2, 8, 64], strides = [1, 1, 1]} : vector<2x8x128xf32> to vector<2x8x64xf32>
    %171 = arith.truncf %170 : vector<2x8x64xf32> to vector<2x8x64xbf16>
    "tpu.trace_start"() <{level = 10 : i32, message = "bqd,bkd->bqk"}> : () -> ()
    %cst_79 = arith.constant dense<0.000000e+00> : vector<2x8x8xf32>
    %172 = tpu.matmul %169, %171, %cst_79 {dimension_numbers = #tpu.dot_dimension_numbers<[2], [2], [1], [1], [0, 0, 0, 1, 1, 1], [0], [0]>} : vector<2x8x64xbf16>, vector<2x8x64xbf16>, vector<2x8x8xf32> -> vector<2x8x8xf32>
    "tpu.trace_stop"() : () -> ()
    %173 = vector.broadcast %129 : vector<2x1x8xf32> to vector<2x8x8xf32>
    %174 = arith.addf %172, %173 : vector<2x8x8xf32>
    %cst_80 = arith.constant dense<0xFF800000> : vector<2x8xf32>
    %175 = vector.multi_reduction <maximumf>, %174, %cst_80 [2] : vector<2x8x8xf32> to vector<2x8xf32>
    %176 = vector.shape_cast %175 : vector<2x8xf32> to vector<2x8x1xf32>
    %177 = vector.broadcast %176 : vector<2x8x1xf32> to vector<2x8x8xf32>
    %178 = arith.subf %174, %177 : vector<2x8x8xf32>
    %179 = math.exp %178 : vector<2x8x8xf32>
    %cst_81 = arith.constant dense<0.000000e+00> : vector<2x8xf32>
    %180 = vector.multi_reduction <add>, %179, %cst_81 [2] : vector<2x8x8xf32> to vector<2x8xf32>
    %181 = vector.shape_cast %180 : vector<2x8xf32> to vector<2x8x1xf32>
    %182 = tpu.reciprocal %181 {approx = true} : vector<2x8x1xf32> -> vector<2x8x1xf32>
    %183 = vector.broadcast %182 : vector<2x8x1xf32> to vector<2x8x8xf32>
    %184 = arith.mulf %179, %183 : vector<2x8x8xf32>
    %185 = arith.truncf %184 : vector<2x8x8xf32> to vector<2x8x8xbf16>
    %186 = vector.extract_strided_slice %145 {offsets = [0, 0, 64], sizes = [2, 8, 64], strides = [1, 1, 1]} : vector<2x8x128xf32> to vector<2x8x64xf32>
    %187 = arith.truncf %186 : vector<2x8x64xf32> to vector<2x8x64xbf16>
    "tpu.trace_start"() <{level = 10 : i32, message = "bqk,bkd->bqd"}> : () -> ()
    %cst_82 = arith.constant dense<0.000000e+00> : vector<2x8x64xf32>
    %188 = tpu.matmul %185, %187, %cst_82 {dimension_numbers = #tpu.dot_dimension_numbers<[2], [1], [1], [2], [0, 0, 0, 1, 1, 2], [0], [0]>} : vector<2x8x8xbf16>, vector<2x8x64xbf16>, vector<2x8x64xf32> -> vector<2x8x64xf32>
    "tpu.trace_stop"() : () -> ()
    %189 = vector.shape_cast %188 : vector<2x8x64xf32> to vector<16x64xf32>
    %190 = tpu.concatenate %167, %189 in 1 : vector<16x64xf32>, vector<16x64xf32> -> vector<16x128xf32>
    %191 = arith.truncf %190 : vector<16x128xf32> to vector<16x128xbf16>
    %cst_83 = arith.constant dense<0.000000e+00> : vector<16x128xf32>
    %192 = tpu.matmul %191, %139, %cst_83 {dimension_numbers = #tpu.dot_dimension_numbers<[1], [0], [0], [1], [0, 0, 1, 1], [], []>} : vector<16x128xbf16>, vector<128x128xbf16>, vector<16x128xf32> -> vector<16x128xf32>
    %193 = vector.broadcast %140 : vector<1x128xf32> to vector<16x128xf32>
    %194 = arith.addf %192, %193 : vector<16x128xf32>
    %195 = arith.addf %194, %58 : vector<16x128xf32>
    %cst_84 = arith.constant dense<0.000000e+00> : vector<16xf32>
    %196 = vector.multi_reduction <add>, %195, %cst_84 [1] : vector<16x128xf32> to vector<16xf32>
    %197 = vector.shape_cast %196 : vector<16xf32> to vector<16x1xf32>
    %cst_85 = arith.constant 1.280000e+02 : f32
    %198 = vector.broadcast %cst_85 : f32 to vector<16x1xf32>
    %199 = arith.divf %197, %198 : vector<16x1xf32>
    %200 = vector.broadcast %199 : vector<16x1xf32> to vector<16x128xf32>
    %201 = arith.subf %195, %200 : vector<16x128xf32>
    %202 = arith.mulf %201, %201 : vector<16x128xf32>
    %cst_86 = arith.constant dense<0.000000e+00> : vector<16xf32>
    %203 = vector.multi_reduction <add>, %202, %cst_86 [1] : vector<16x128xf32> to vector<16xf32>
    %204 = vector.shape_cast %203 : vector<16xf32> to vector<16x1xf32>
    %cst_87 = arith.constant 1.280000e+02 : f32
    %205 = vector.broadcast %cst_87 : f32 to vector<16x1xf32>
    %206 = arith.divf %204, %205 : vector<16x1xf32>
    %207 = vector.broadcast %199 : vector<16x1xf32> to vector<16x128xf32>
    %208 = arith.subf %195, %207 : vector<16x128xf32>
    %cst_88 = arith.constant 9.99999996E-13 : f32
    %209 = vector.broadcast %cst_88 : f32 to vector<16x1xf32>
    %210 = arith.addf %206, %209 : vector<16x1xf32>
    %211 = math.rsqrt %210 : vector<16x1xf32>
    %212 = vector.broadcast %211 : vector<16x1xf32> to vector<16x128xf32>
    %213 = arith.mulf %208, %212 : vector<16x128xf32>
    %214 = vector.broadcast %141 : vector<1x128xf32> to vector<16x128xf32>
    %215 = arith.mulf %213, %214 : vector<16x128xf32>
    %216 = vector.broadcast %142 : vector<1x128xf32> to vector<16x128xf32>
    %217 = arith.addf %215, %216 : vector<16x128xf32>
    %c0_89 = arith.constant 0 : index
    %c0_90 = arith.constant 0 : index
    %218 = vector.load %arg21[%c0_89, %c0_90] : memref<128x256xbf16, #tpu.memory_space<vmem>>, vector<128x256xbf16>
    %219 = arith.truncf %217 : vector<16x128xf32> to vector<16x128xbf16>
    %cst_91 = arith.constant dense<0.000000e+00> : vector<16x256xf32>
    %220 = tpu.matmul %219, %218, %cst_91 {dimension_numbers = #tpu.dot_dimension_numbers<[1], [0], [0], [1], [0, 0, 1, 1], [], []>} : vector<16x128xbf16>, vector<128x256xbf16>, vector<16x256xf32> -> vector<16x256xf32>
    %c0_92 = arith.constant 0 : index
    %c0_93 = arith.constant 0 : index
    %221 = vector.load %arg17[%c0_92, %c0_93] : memref<1x256xf32, #tpu.memory_space<vmem>>, vector<1x256xf32>
    %222 = vector.broadcast %221 : vector<1x256xf32> to vector<16x256xf32>
    %223 = arith.addf %220, %222 : vector<16x256xf32>
    %cst_94 = arith.constant 5.000000e-01 : f32
    %224 = vector.broadcast %cst_94 : f32 to vector<16x256xf32>
    %225 = arith.mulf %224, %223 : vector<16x256xf32>
    %cst_95 = arith.constant 4.471500e-02 : f32
    %226 = vector.broadcast %cst_95 : f32 to vector<16x256xf32>
    %227 = arith.mulf %226, %223 : vector<16x256xf32>
    %228 = arith.mulf %227, %223 : vector<16x256xf32>
    %229 = arith.mulf %228, %223 : vector<16x256xf32>
    %230 = arith.addf %223, %229 : vector<16x256xf32>
    %cst_96 = arith.constant 0.797884583 : f32
    %231 = vector.broadcast %cst_96 : f32 to vector<16x256xf32>
    %232 = arith.mulf %231, %230 : vector<16x256xf32>
    %233 = math.tanh %232 : vector<16x256xf32>
    %cst_97 = arith.constant 1.000000e+00 : f32
    %234 = vector.broadcast %cst_97 : f32 to vector<16x256xf32>
    %235 = arith.addf %234, %233 : vector<16x256xf32>
    %236 = arith.mulf %225, %235 : vector<16x256xf32>
    %c0_98 = arith.constant 0 : index
    %c0_99 = arith.constant 0 : index
    %237 = vector.load %arg22[%c0_98, %c0_99] : memref<256x128xbf16, #tpu.memory_space<vmem>>, vector<256x128xbf16>
    %238 = arith.truncf %236 : vector<16x256xf32> to vector<16x256xbf16>
    %cst_100 = arith.constant dense<0.000000e+00> : vector<16x128xf32>
    %239 = tpu.matmul %238, %237, %cst_100 {dimension_numbers = #tpu.dot_dimension_numbers<[1], [0], [0], [1], [0, 0, 1, 1], [], []>} : vector<16x256xbf16>, vector<256x128xbf16>, vector<16x128xf32> -> vector<16x128xf32>
    %c0_101 = arith.constant 0 : index
    %c0_102 = arith.constant 0 : index
    %240 = vector.load %arg18[%c0_101, %c0_102] : memref<1x128xf32, #tpu.memory_space<vmem>>, vector<1x128xf32>
    %241 = vector.broadcast %240 : vector<1x128xf32> to vector<16x128xf32>
    %242 = arith.addf %239, %241 : vector<16x128xf32>
    %243 = arith.addf %242, %217 : vector<16x128xf32>
    %c0_103 = arith.constant 0 : index
    %c0_104 = arith.constant 0 : index
    %244 = vector.load %arg20[%c0_103, %c0_104] : memref<1x128xf32, #tpu.memory_space<vmem>>, vector<1x128xf32>
    %c0_105 = arith.constant 0 : index
    %c0_106 = arith.constant 0 : index
    %245 = vector.load %arg19[%c0_105, %c0_106] : memref<1x128xf32, #tpu.memory_space<vmem>>, vector<1x128xf32>
    %cst_107 = arith.constant dense<0.000000e+00> : vector<16xf32>
    %246 = vector.multi_reduction <add>, %243, %cst_107 [1] : vector<16x128xf32> to vector<16xf32>
    %247 = vector.shape_cast %246 : vector<16xf32> to vector<16x1xf32>
    %cst_108 = arith.constant 1.280000e+02 : f32
    %248 = vector.broadcast %cst_108 : f32 to vector<16x1xf32>
    %249 = arith.divf %247, %248 : vector<16x1xf32>
    %250 = vector.broadcast %249 : vector<16x1xf32> to vector<16x128xf32>
    %251 = arith.subf %243, %250 : vector<16x128xf32>
    %252 = arith.mulf %251, %251 : vector<16x128xf32>
    %cst_109 = arith.constant dense<0.000000e+00> : vector<16xf32>
    %253 = vector.multi_reduction <add>, %252, %cst_109 [1] : vector<16x128xf32> to vector<16xf32>
    %254 = vector.shape_cast %253 : vector<16xf32> to vector<16x1xf32>
    %cst_110 = arith.constant 1.280000e+02 : f32
    %255 = vector.broadcast %cst_110 : f32 to vector<16x1xf32>
    %256 = arith.divf %254, %255 : vector<16x1xf32>
    %257 = vector.broadcast %249 : vector<16x1xf32> to vector<16x128xf32>
    %258 = arith.subf %243, %257 : vector<16x128xf32>
    %cst_111 = arith.constant 9.99999996E-13 : f32
    %259 = vector.broadcast %cst_111 : f32 to vector<16x1xf32>
    %260 = arith.addf %256, %259 : vector<16x1xf32>
    %261 = math.rsqrt %260 : vector<16x1xf32>
    %262 = vector.broadcast %261 : vector<16x1xf32> to vector<16x128xf32>
    %263 = arith.mulf %258, %262 : vector<16x128xf32>
    %264 = vector.broadcast %244 : vector<1x128xf32> to vector<16x128xf32>
    %265 = arith.mulf %263, %264 : vector<16x128xf32>
    %266 = vector.broadcast %245 : vector<1x128xf32> to vector<16x128xf32>
    %267 = arith.addf %265, %266 : vector<16x128xf32>
    %c0_112 = arith.constant 0 : index
    %c0_113 = arith.constant 0 : index
    %268 = vector.load %arg30[%c0_112, %c0_113] : memref<128x384xbf16, #tpu.memory_space<vmem>>, vector<128x384xbf16>
    %269 = arith.truncf %123 : vector<8x128xf32> to vector<8x128xbf16>
    %cst_114 = arith.constant dense<0.000000e+00> : vector<8x384xf32>
    %270 = tpu.matmul %269, %268, %cst_114 {dimension_numbers = #tpu.dot_dimension_numbers<[1], [0], [0], [1], [0, 0, 1, 1], [], []>} : vector<8x128xbf16>, vector<128x384xbf16>, vector<8x384xf32> -> vector<8x384xf32>
    %c0_115 = arith.constant 0 : index
    %c0_116 = arith.constant 0 : index
    %271 = vector.load %arg26[%c0_115, %c0_116] : memref<1x384xf32, #tpu.memory_space<vmem>>, vector<1x384xf32>
    %272 = vector.broadcast %271 : vector<1x384xf32> to vector<8x384xf32>
    %273 = arith.addf %270, %272 : vector<8x384xf32>
    %274 = vector.extract_strided_slice %273 {offsets = [0, 0], sizes = [8, 128], strides = [1, 1]} : vector<8x384xf32> to vector<8x128xf32>
    %275 = vector.extract_strided_slice %273 {offsets = [0, 128], sizes = [8, 128], strides = [1, 1]} : vector<8x384xf32> to vector<8x128xf32>
    %276 = vector.extract_strided_slice %273 {offsets = [0, 256], sizes = [8, 128], strides = [1, 1]} : vector<8x384xf32> to vector<8x128xf32>
    %c0_117 = arith.constant 0 : index
    %c0_118 = arith.constant 0 : index
    %277 = vector.load %arg29[%c0_117, %c0_118] : memref<128x128xbf16, #tpu.memory_space<vmem>>, vector<128x128xbf16>
    %c0_119 = arith.constant 0 : index
    %c0_120 = arith.constant 0 : index
    %278 = vector.load %arg25[%c0_119, %c0_120] : memref<1x128xf32, #tpu.memory_space<vmem>>, vector<1x128xf32>
    %c0_121 = arith.constant 0 : index
    %c0_122 = arith.constant 0 : index
    %279 = vector.load %arg28[%c0_121, %c0_122] : memref<1x128xf32, #tpu.memory_space<vmem>>, vector<1x128xf32>
    %c0_123 = arith.constant 0 : index
    %c0_124 = arith.constant 0 : index
    %280 = vector.load %arg27[%c0_123, %c0_124] : memref<1x128xf32, #tpu.memory_space<vmem>>, vector<1x128xf32>
    %281 = vector.shape_cast %274 : vector<8x128xf32> to vector<2x4x128xf32>
    %282 = vector.shape_cast %275 : vector<8x128xf32> to vector<2x4x128xf32>
    %283 = vector.shape_cast %276 : vector<8x128xf32> to vector<2x4x128xf32>
    %284 = vector.extract_strided_slice %281 {offsets = [0, 0, 0], sizes = [2, 4, 64], strides = [1, 1, 1]} : vector<2x4x128xf32> to vector<2x4x64xf32>
    %285 = arith.truncf %284 : vector<2x4x64xf32> to vector<2x4x64xbf16>
    %286 = vector.extract_strided_slice %282 {offsets = [0, 0, 0], sizes = [2, 4, 64], strides = [1, 1, 1]} : vector<2x4x128xf32> to vector<2x4x64xf32>
    %287 = arith.truncf %286 : vector<2x4x64xf32> to vector<2x4x64xbf16>
    "tpu.trace_start"() <{level = 10 : i32, message = "bqd,bkd->bqk"}> : () -> ()
    %cst_125 = arith.constant dense<0.000000e+00> : vector<2x4x4xf32>
    %288 = tpu.matmul %285, %287, %cst_125 {dimension_numbers = #tpu.dot_dimension_numbers<[2], [2], [1], [1], [0, 0, 0, 1, 1, 1], [0], [0]>} : vector<2x4x64xbf16>, vector<2x4x64xbf16>, vector<2x4x4xf32> -> vector<2x4x4xf32>
    "tpu.trace_stop"() : () -> ()
    %cst_126 = arith.constant dense<0xFF800000> : vector<2x4xf32>
    %289 = vector.multi_reduction <maximumf>, %288, %cst_126 [2] : vector<2x4x4xf32> to vector<2x4xf32>
    %290 = vector.shape_cast %289 : vector<2x4xf32> to vector<2x4x1xf32>
    %291 = vector.broadcast %290 : vector<2x4x1xf32> to vector<2x4x4xf32>
    %292 = arith.subf %288, %291 : vector<2x4x4xf32>
    %293 = math.exp %292 : vector<2x4x4xf32>
    %cst_127 = arith.constant dense<0.000000e+00> : vector<2x4xf32>
    %294 = vector.multi_reduction <add>, %293, %cst_127 [2] : vector<2x4x4xf32> to vector<2x4xf32>
    %295 = vector.shape_cast %294 : vector<2x4xf32> to vector<2x4x1xf32>
    %296 = tpu.reciprocal %295 {approx = true} : vector<2x4x1xf32> -> vector<2x4x1xf32>
    %297 = vector.broadcast %296 : vector<2x4x1xf32> to vector<2x4x4xf32>
    %298 = arith.mulf %293, %297 : vector<2x4x4xf32>
    %299 = arith.truncf %298 : vector<2x4x4xf32> to vector<2x4x4xbf16>
    %300 = vector.extract_strided_slice %283 {offsets = [0, 0, 0], sizes = [2, 4, 64], strides = [1, 1, 1]} : vector<2x4x128xf32> to vector<2x4x64xf32>
    %301 = arith.truncf %300 : vector<2x4x64xf32> to vector<2x4x64xbf16>
    "tpu.trace_start"() <{level = 10 : i32, message = "bqk,bkd->bqd"}> : () -> ()
    %cst_128 = arith.constant dense<0.000000e+00> : vector<2x4x64xf32>
    %302 = tpu.matmul %299, %301, %cst_128 {dimension_numbers = #tpu.dot_dimension_numbers<[2], [1], [1], [2], [0, 0, 0, 1, 1, 2], [0], [0]>} : vector<2x4x4xbf16>, vector<2x4x64xbf16>, vector<2x4x64xf32> -> vector<2x4x64xf32>
    "tpu.trace_stop"() : () -> ()
    %303 = vector.shape_cast %302 : vector<2x4x64xf32> to vector<8x64xf32>
    %304 = vector.extract_strided_slice %281 {offsets = [0, 0, 64], sizes = [2, 4, 64], strides = [1, 1, 1]} : vector<2x4x128xf32> to vector<2x4x64xf32>
    %305 = arith.truncf %304 : vector<2x4x64xf32> to vector<2x4x64xbf16>
    %306 = vector.extract_strided_slice %282 {offsets = [0, 0, 64], sizes = [2, 4, 64], strides = [1, 1, 1]} : vector<2x4x128xf32> to vector<2x4x64xf32>
    %307 = arith.truncf %306 : vector<2x4x64xf32> to vector<2x4x64xbf16>
    "tpu.trace_start"() <{level = 10 : i32, message = "bqd,bkd->bqk"}> : () -> ()
    %cst_129 = arith.constant dense<0.000000e+00> : vector<2x4x4xf32>
    %308 = tpu.matmul %305, %307, %cst_129 {dimension_numbers = #tpu.dot_dimension_numbers<[2], [2], [1], [1], [0, 0, 0, 1, 1, 1], [0], [0]>} : vector<2x4x64xbf16>, vector<2x4x64xbf16>, vector<2x4x4xf32> -> vector<2x4x4xf32>
    "tpu.trace_stop"() : () -> ()
    %cst_130 = arith.constant dense<0xFF800000> : vector<2x4xf32>
    %309 = vector.multi_reduction <maximumf>, %308, %cst_130 [2] : vector<2x4x4xf32> to vector<2x4xf32>
    %310 = vector.shape_cast %309 : vector<2x4xf32> to vector<2x4x1xf32>
    %311 = vector.broadcast %310 : vector<2x4x1xf32> to vector<2x4x4xf32>
    %312 = arith.subf %308, %311 : vector<2x4x4xf32>
    %313 = math.exp %312 : vector<2x4x4xf32>
    %cst_131 = arith.constant dense<0.000000e+00> : vector<2x4xf32>
    %314 = vector.multi_reduction <add>, %313, %cst_131 [2] : vector<2x4x4xf32> to vector<2x4xf32>
    %315 = vector.shape_cast %314 : vector<2x4xf32> to vector<2x4x1xf32>
    %316 = tpu.reciprocal %315 {approx = true} : vector<2x4x1xf32> -> vector<2x4x1xf32>
    %317 = vector.broadcast %316 : vector<2x4x1xf32> to vector<2x4x4xf32>
    %318 = arith.mulf %313, %317 : vector<2x4x4xf32>
    %319 = arith.truncf %318 : vector<2x4x4xf32> to vector<2x4x4xbf16>
    %320 = vector.extract_strided_slice %283 {offsets = [0, 0, 64], sizes = [2, 4, 64], strides = [1, 1, 1]} : vector<2x4x128xf32> to vector<2x4x64xf32>
    %321 = arith.truncf %320 : vector<2x4x64xf32> to vector<2x4x64xbf16>
    "tpu.trace_start"() <{level = 10 : i32, message = "bqk,bkd->bqd"}> : () -> ()
    %cst_132 = arith.constant dense<0.000000e+00> : vector<2x4x64xf32>
    %322 = tpu.matmul %319, %321, %cst_132 {dimension_numbers = #tpu.dot_dimension_numbers<[2], [1], [1], [2], [0, 0, 0, 1, 1, 2], [0], [0]>} : vector<2x4x4xbf16>, vector<2x4x64xbf16>, vector<2x4x64xf32> -> vector<2x4x64xf32>
    "tpu.trace_stop"() : () -> ()
    %323 = vector.shape_cast %322 : vector<2x4x64xf32> to vector<8x64xf32>
    %324 = tpu.concatenate %303, %323 in 1 : vector<8x64xf32>, vector<8x64xf32> -> vector<8x128xf32>
    %325 = arith.truncf %324 : vector<8x128xf32> to vector<8x128xbf16>
    %cst_133 = arith.constant dense<0.000000e+00> : vector<8x128xf32>
    %326 = tpu.matmul %325, %277, %cst_133 {dimension_numbers = #tpu.dot_dimension_numbers<[1], [0], [0], [1], [0, 0, 1, 1], [], []>} : vector<8x128xbf16>, vector<128x128xbf16>, vector<8x128xf32> -> vector<8x128xf32>
    %327 = vector.broadcast %278 : vector<1x128xf32> to vector<8x128xf32>
    %328 = arith.addf %326, %327 : vector<8x128xf32>
    %329 = arith.addf %328, %123 : vector<8x128xf32>
    %cst_134 = arith.constant dense<0.000000e+00> : vector<8xf32>
    %330 = vector.multi_reduction <add>, %329, %cst_134 [1] : vector<8x128xf32> to vector<8xf32>
    %331 = vector.shape_cast %330 : vector<8xf32> to vector<8x1xf32>
    %cst_135 = arith.constant 1.280000e+02 : f32
    %332 = vector.broadcast %cst_135 : f32 to vector<8x1xf32>
    %333 = arith.divf %331, %332 : vector<8x1xf32>
    %334 = vector.broadcast %333 : vector<8x1xf32> to vector<8x128xf32>
    %335 = arith.subf %329, %334 : vector<8x128xf32>
    %336 = arith.mulf %335, %335 : vector<8x128xf32>
    %cst_136 = arith.constant dense<0.000000e+00> : vector<8xf32>
    %337 = vector.multi_reduction <add>, %336, %cst_136 [1] : vector<8x128xf32> to vector<8xf32>
    %338 = vector.shape_cast %337 : vector<8xf32> to vector<8x1xf32>
    %cst_137 = arith.constant 1.280000e+02 : f32
    %339 = vector.broadcast %cst_137 : f32 to vector<8x1xf32>
    %340 = arith.divf %338, %339 : vector<8x1xf32>
    %341 = vector.broadcast %333 : vector<8x1xf32> to vector<8x128xf32>
    %342 = arith.subf %329, %341 : vector<8x128xf32>
    %cst_138 = arith.constant 9.99999996E-13 : f32
    %343 = vector.broadcast %cst_138 : f32 to vector<8x1xf32>
    %344 = arith.addf %340, %343 : vector<8x1xf32>
    %345 = math.rsqrt %344 : vector<8x1xf32>
    %346 = vector.broadcast %345 : vector<8x1xf32> to vector<8x128xf32>
    %347 = arith.mulf %342, %346 : vector<8x128xf32>
    %348 = vector.broadcast %279 : vector<1x128xf32> to vector<8x128xf32>
    %349 = arith.mulf %347, %348 : vector<8x128xf32>
    %350 = vector.broadcast %280 : vector<1x128xf32> to vector<8x128xf32>
    %351 = arith.addf %349, %350 : vector<8x128xf32>
    %c0_139 = arith.constant 0 : index
    %c0_140 = arith.constant 0 : index
    %352 = vector.load %arg35[%c0_139, %c0_140] : memref<128x256xbf16, #tpu.memory_space<vmem>>, vector<128x256xbf16>
    %353 = arith.truncf %351 : vector<8x128xf32> to vector<8x128xbf16>
    %cst_141 = arith.constant dense<0.000000e+00> : vector<8x256xf32>
    %354 = tpu.matmul %353, %352, %cst_141 {dimension_numbers = #tpu.dot_dimension_numbers<[1], [0], [0], [1], [0, 0, 1, 1], [], []>} : vector<8x128xbf16>, vector<128x256xbf16>, vector<8x256xf32> -> vector<8x256xf32>
    %c0_142 = arith.constant 0 : index
    %c0_143 = arith.constant 0 : index
    %355 = vector.load %arg31[%c0_142, %c0_143] : memref<1x256xf32, #tpu.memory_space<vmem>>, vector<1x256xf32>
    %356 = vector.broadcast %355 : vector<1x256xf32> to vector<8x256xf32>
    %357 = arith.addf %354, %356 : vector<8x256xf32>
    %cst_144 = arith.constant 5.000000e-01 : f32
    %358 = vector.broadcast %cst_144 : f32 to vector<8x256xf32>
    %359 = arith.mulf %358, %357 : vector<8x256xf32>
    %cst_145 = arith.constant 4.471500e-02 : f32
    %360 = vector.broadcast %cst_145 : f32 to vector<8x256xf32>
    %361 = arith.mulf %360, %357 : vector<8x256xf32>
    %362 = arith.mulf %361, %357 : vector<8x256xf32>
    %363 = arith.mulf %362, %357 : vector<8x256xf32>
    %364 = arith.addf %357, %363 : vector<8x256xf32>
    %cst_146 = arith.constant 0.797884583 : f32
    %365 = vector.broadcast %cst_146 : f32 to vector<8x256xf32>
    %366 = arith.mulf %365, %364 : vector<8x256xf32>
    %367 = math.tanh %366 : vector<8x256xf32>
    %cst_147 = arith.constant 1.000000e+00 : f32
    %368 = vector.broadcast %cst_147 : f32 to vector<8x256xf32>
    %369 = arith.addf %368, %367 : vector<8x256xf32>
    %370 = arith.mulf %359, %369 : vector<8x256xf32>
    %c0_148 = arith.constant 0 : index
    %c0_149 = arith.constant 0 : index
    %371 = vector.load %arg36[%c0_148, %c0_149] : memref<256x128xbf16, #tpu.memory_space<vmem>>, vector<256x128xbf16>
    %372 = arith.truncf %370 : vector<8x256xf32> to vector<8x256xbf16>
    %cst_150 = arith.constant dense<0.000000e+00> : vector<8x128xf32>
    %373 = tpu.matmul %372, %371, %cst_150 {dimension_numbers = #tpu.dot_dimension_numbers<[1], [0], [0], [1], [0, 0, 1, 1], [], []>} : vector<8x256xbf16>, vector<256x128xbf16>, vector<8x128xf32> -> vector<8x128xf32>
    %c0_151 = arith.constant 0 : index
    %c0_152 = arith.constant 0 : index
    %374 = vector.load %arg32[%c0_151, %c0_152] : memref<1x128xf32, #tpu.memory_space<vmem>>, vector<1x128xf32>
    %375 = vector.broadcast %374 : vector<1x128xf32> to vector<8x128xf32>
    %376 = arith.addf %373, %375 : vector<8x128xf32>
    %377 = arith.addf %376, %351 : vector<8x128xf32>
    %c0_153 = arith.constant 0 : index
    %c0_154 = arith.constant 0 : index
    %378 = vector.load %arg34[%c0_153, %c0_154] : memref<1x128xf32, #tpu.memory_space<vmem>>, vector<1x128xf32>
    %c0_155 = arith.constant 0 : index
    %c0_156 = arith.constant 0 : index
    %379 = vector.load %arg33[%c0_155, %c0_156] : memref<1x128xf32, #tpu.memory_space<vmem>>, vector<1x128xf32>
    %cst_157 = arith.constant dense<0.000000e+00> : vector<8xf32>
    %380 = vector.multi_reduction <add>, %377, %cst_157 [1] : vector<8x128xf32> to vector<8xf32>
    %381 = vector.shape_cast %380 : vector<8xf32> to vector<8x1xf32>
    %cst_158 = arith.constant 1.280000e+02 : f32
    %382 = vector.broadcast %cst_158 : f32 to vector<8x1xf32>
    %383 = arith.divf %381, %382 : vector<8x1xf32>
    %384 = vector.broadcast %383 : vector<8x1xf32> to vector<8x128xf32>
    %385 = arith.subf %377, %384 : vector<8x128xf32>
    %386 = arith.mulf %385, %385 : vector<8x128xf32>
    %cst_159 = arith.constant dense<0.000000e+00> : vector<8xf32>
    %387 = vector.multi_reduction <add>, %386, %cst_159 [1] : vector<8x128xf32> to vector<8xf32>
    %388 = vector.shape_cast %387 : vector<8xf32> to vector<8x1xf32>
    %cst_160 = arith.constant 1.280000e+02 : f32
    %389 = vector.broadcast %cst_160 : f32 to vector<8x1xf32>
    %390 = arith.divf %388, %389 : vector<8x1xf32>
    %391 = vector.broadcast %383 : vector<8x1xf32> to vector<8x128xf32>
    %392 = arith.subf %377, %391 : vector<8x128xf32>
    %cst_161 = arith.constant 9.99999996E-13 : f32
    %393 = vector.broadcast %cst_161 : f32 to vector<8x1xf32>
    %394 = arith.addf %390, %393 : vector<8x1xf32>
    %395 = math.rsqrt %394 : vector<8x1xf32>
    %396 = vector.broadcast %395 : vector<8x1xf32> to vector<8x128xf32>
    %397 = arith.mulf %392, %396 : vector<8x128xf32>
    %398 = vector.broadcast %378 : vector<1x128xf32> to vector<8x128xf32>
    %399 = arith.mulf %397, %398 : vector<8x128xf32>
    %400 = vector.broadcast %379 : vector<1x128xf32> to vector<8x128xf32>
    %401 = arith.addf %399, %400 : vector<8x128xf32>
    %402 = tpu.concatenate %267, %401 in 0 : vector<16x128xf32>, vector<8x128xf32> -> vector<24x128xf32>
    %c0_162 = arith.constant 0 : index
    %c0_163 = arith.constant 0 : index
    %403 = vector.load %arg52[%c0_162, %c0_163] : memref<128x128xbf16, #tpu.memory_space<vmem>>, vector<128x128xbf16>
    %404 = arith.truncf %402 : vector<24x128xf32> to vector<24x128xbf16>
    %cst_164 = arith.constant dense<0.000000e+00> : vector<24x128xf32>
    %405 = tpu.matmul %404, %403, %cst_164 {dimension_numbers = #tpu.dot_dimension_numbers<[1], [0], [0], [1], [0, 0, 1, 1], [], []>} : vector<24x128xbf16>, vector<128x128xbf16>, vector<24x128xf32> -> vector<24x128xf32>
    %c0_165 = arith.constant 0 : index
    %c0_166 = arith.constant 0 : index
    %406 = vector.load %arg47[%c0_165, %c0_166] : memref<1x128xf32, #tpu.memory_space<vmem>>, vector<1x128xf32>
    %407 = vector.broadcast %406 : vector<1x128xf32> to vector<24x128xf32>
    %408 = arith.addf %405, %407 : vector<24x128xf32>
    %c0_167 = arith.constant 0 : index
    %c0_168 = arith.constant 0 : index
    %409 = vector.load %arg50[%c0_167, %c0_168] : memref<128x256xbf16, #tpu.memory_space<vmem>>, vector<128x256xbf16>
    %410 = arith.truncf %402 : vector<24x128xf32> to vector<24x128xbf16>
    %cst_169 = arith.constant dense<0.000000e+00> : vector<24x256xf32>
    %411 = tpu.matmul %410, %409, %cst_169 {dimension_numbers = #tpu.dot_dimension_numbers<[1], [0], [0], [1], [0, 0, 1, 1], [], []>} : vector<24x128xbf16>, vector<128x256xbf16>, vector<24x256xf32> -> vector<24x256xf32>
    %c0_170 = arith.constant 0 : index
    %c0_171 = arith.constant 0 : index
    %412 = vector.load %arg45[%c0_170, %c0_171] : memref<1x256xf32, #tpu.memory_space<vmem>>, vector<1x256xf32>
    %413 = vector.broadcast %412 : vector<1x256xf32> to vector<24x256xf32>
    %414 = arith.addf %411, %413 : vector<24x256xf32>
    %415 = vector.extract_strided_slice %408 {offsets = [0, 0], sizes = [16, 128], strides = [1, 1]} : vector<24x128xf32> to vector<16x128xf32>
    %416 = vector.extract_strided_slice %414 {offsets = [16, 0], sizes = [8, 128], strides = [1, 1]} : vector<24x256xf32> to vector<8x128xf32>
    %417 = vector.extract_strided_slice %414 {offsets = [16, 128], sizes = [8, 128], strides = [1, 1]} : vector<24x256xf32> to vector<8x128xf32>
    %c0_172 = arith.constant 0 : index
    %c0_173 = arith.constant 0 : index
    %418 = vector.load %arg51[%c0_172, %c0_173] : memref<128x128xbf16, #tpu.memory_space<vmem>>, vector<128x128xbf16>
    %c0_174 = arith.constant 0 : index
    %c0_175 = arith.constant 0 : index
    %419 = vector.load %arg46[%c0_174, %c0_175] : memref<1x128xf32, #tpu.memory_space<vmem>>, vector<1x128xf32>
    %c0_176 = arith.constant 0 : index
    %c0_177 = arith.constant 0 : index
    %420 = vector.load %arg49[%c0_176, %c0_177] : memref<1x128xf32, #tpu.memory_space<vmem>>, vector<1x128xf32>
    %c0_178 = arith.constant 0 : index
    %c0_179 = arith.constant 0 : index
    %421 = vector.load %arg48[%c0_178, %c0_179] : memref<1x128xf32, #tpu.memory_space<vmem>>, vector<1x128xf32>
    %422 = vector.shape_cast %415 : vector<16x128xf32> to vector<2x8x128xf32>
    %423 = vector.shape_cast %416 : vector<8x128xf32> to vector<2x4x128xf32>
    %424 = vector.shape_cast %417 : vector<8x128xf32> to vector<2x4x128xf32>
    %425 = vector.extract_strided_slice %422 {offsets = [0, 0, 0], sizes = [2, 8, 64], strides = [1, 1, 1]} : vector<2x8x128xf32> to vector<2x8x64xf32>
    %426 = arith.truncf %425 : vector<2x8x64xf32> to vector<2x8x64xbf16>
    %427 = vector.extract_strided_slice %423 {offsets = [0, 0, 0], sizes = [2, 4, 64], strides = [1, 1, 1]} : vector<2x4x128xf32> to vector<2x4x64xf32>
    %428 = arith.truncf %427 : vector<2x4x64xf32> to vector<2x4x64xbf16>
    "tpu.trace_start"() <{level = 10 : i32, message = "bqd,bkd->bqk"}> : () -> ()
    %cst_180 = arith.constant dense<0.000000e+00> : vector<2x8x4xf32>
    %429 = tpu.matmul %426, %428, %cst_180 {dimension_numbers = #tpu.dot_dimension_numbers<[2], [2], [1], [1], [0, 0, 0, 1, 1, 1], [0], [0]>} : vector<2x8x64xbf16>, vector<2x4x64xbf16>, vector<2x8x4xf32> -> vector<2x8x4xf32>
    "tpu.trace_stop"() : () -> ()
    %cst_181 = arith.constant dense<0xFF800000> : vector<2x8xf32>
    %430 = vector.multi_reduction <maximumf>, %429, %cst_181 [2] : vector<2x8x4xf32> to vector<2x8xf32>
    %431 = vector.shape_cast %430 : vector<2x8xf32> to vector<2x8x1xf32>
    %432 = vector.broadcast %431 : vector<2x8x1xf32> to vector<2x8x4xf32>
    %433 = arith.subf %429, %432 : vector<2x8x4xf32>
    %434 = math.exp %433 : vector<2x8x4xf32>
    %cst_182 = arith.constant dense<0.000000e+00> : vector<2x8xf32>
    %435 = vector.multi_reduction <add>, %434, %cst_182 [2] : vector<2x8x4xf32> to vector<2x8xf32>
    %436 = vector.shape_cast %435 : vector<2x8xf32> to vector<2x8x1xf32>
    %437 = tpu.reciprocal %436 {approx = true} : vector<2x8x1xf32> -> vector<2x8x1xf32>
    %438 = vector.broadcast %437 : vector<2x8x1xf32> to vector<2x8x4xf32>
    %439 = arith.mulf %434, %438 : vector<2x8x4xf32>
    %440 = arith.truncf %439 : vector<2x8x4xf32> to vector<2x8x4xbf16>
    %441 = vector.extract_strided_slice %424 {offsets = [0, 0, 0], sizes = [2, 4, 64], strides = [1, 1, 1]} : vector<2x4x128xf32> to vector<2x4x64xf32>
    %442 = arith.truncf %441 : vector<2x4x64xf32> to vector<2x4x64xbf16>
    "tpu.trace_start"() <{level = 10 : i32, message = "bqk,bkd->bqd"}> : () -> ()
    %cst_183 = arith.constant dense<0.000000e+00> : vector<2x8x64xf32>
    %443 = tpu.matmul %440, %442, %cst_183 {dimension_numbers = #tpu.dot_dimension_numbers<[2], [1], [1], [2], [0, 0, 0, 1, 1, 2], [0], [0]>} : vector<2x8x4xbf16>, vector<2x4x64xbf16>, vector<2x8x64xf32> -> vector<2x8x64xf32>
    "tpu.trace_stop"() : () -> ()
    %444 = vector.shape_cast %443 : vector<2x8x64xf32> to vector<16x64xf32>
    %445 = vector.extract_strided_slice %422 {offsets = [0, 0, 64], sizes = [2, 8, 64], strides = [1, 1, 1]} : vector<2x8x128xf32> to vector<2x8x64xf32>
    %446 = arith.truncf %445 : vector<2x8x64xf32> to vector<2x8x64xbf16>
    %447 = vector.extract_strided_slice %423 {offsets = [0, 0, 64], sizes = [2, 4, 64], strides = [1, 1, 1]} : vector<2x4x128xf32> to vector<2x4x64xf32>
    %448 = arith.truncf %447 : vector<2x4x64xf32> to vector<2x4x64xbf16>
    "tpu.trace_start"() <{level = 10 : i32, message = "bqd,bkd->bqk"}> : () -> ()
    %cst_184 = arith.constant dense<0.000000e+00> : vector<2x8x4xf32>
    %449 = tpu.matmul %446, %448, %cst_184 {dimension_numbers = #tpu.dot_dimension_numbers<[2], [2], [1], [1], [0, 0, 0, 1, 1, 1], [0], [0]>} : vector<2x8x64xbf16>, vector<2x4x64xbf16>, vector<2x8x4xf32> -> vector<2x8x4xf32>
    "tpu.trace_stop"() : () -> ()
    %cst_185 = arith.constant dense<0xFF800000> : vector<2x8xf32>
    %450 = vector.multi_reduction <maximumf>, %449, %cst_185 [2] : vector<2x8x4xf32> to vector<2x8xf32>
    %451 = vector.shape_cast %450 : vector<2x8xf32> to vector<2x8x1xf32>
    %452 = vector.broadcast %451 : vector<2x8x1xf32> to vector<2x8x4xf32>
    %453 = arith.subf %449, %452 : vector<2x8x4xf32>
    %454 = math.exp %453 : vector<2x8x4xf32>
    %cst_186 = arith.constant dense<0.000000e+00> : vector<2x8xf32>
    %455 = vector.multi_reduction <add>, %454, %cst_186 [2] : vector<2x8x4xf32> to vector<2x8xf32>
    %456 = vector.shape_cast %455 : vector<2x8xf32> to vector<2x8x1xf32>
    %457 = tpu.reciprocal %456 {approx = true} : vector<2x8x1xf32> -> vector<2x8x1xf32>
    %458 = vector.broadcast %457 : vector<2x8x1xf32> to vector<2x8x4xf32>
    %459 = arith.mulf %454, %458 : vector<2x8x4xf32>
    %460 = arith.truncf %459 : vector<2x8x4xf32> to vector<2x8x4xbf16>
    %461 = vector.extract_strided_slice %424 {offsets = [0, 0, 64], sizes = [2, 4, 64], strides = [1, 1, 1]} : vector<2x4x128xf32> to vector<2x4x64xf32>
    %462 = arith.truncf %461 : vector<2x4x64xf32> to vector<2x4x64xbf16>
    "tpu.trace_start"() <{level = 10 : i32, message = "bqk,bkd->bqd"}> : () -> ()
    %cst_187 = arith.constant dense<0.000000e+00> : vector<2x8x64xf32>
    %463 = tpu.matmul %460, %462, %cst_187 {dimension_numbers = #tpu.dot_dimension_numbers<[2], [1], [1], [2], [0, 0, 0, 1, 1, 2], [0], [0]>} : vector<2x8x4xbf16>, vector<2x4x64xbf16>, vector<2x8x64xf32> -> vector<2x8x64xf32>
    "tpu.trace_stop"() : () -> ()
    %464 = vector.shape_cast %463 : vector<2x8x64xf32> to vector<16x64xf32>
    %465 = tpu.concatenate %444, %464 in 1 : vector<16x64xf32>, vector<16x64xf32> -> vector<16x128xf32>
    %466 = arith.truncf %465 : vector<16x128xf32> to vector<16x128xbf16>
    %cst_188 = arith.constant dense<0.000000e+00> : vector<16x128xf32>
    %467 = tpu.matmul %466, %418, %cst_188 {dimension_numbers = #tpu.dot_dimension_numbers<[1], [0], [0], [1], [0, 0, 1, 1], [], []>} : vector<16x128xbf16>, vector<128x128xbf16>, vector<16x128xf32> -> vector<16x128xf32>
    %468 = vector.broadcast %419 : vector<1x128xf32> to vector<16x128xf32>
    %469 = arith.addf %467, %468 : vector<16x128xf32>
    %470 = arith.addf %469, %267 : vector<16x128xf32>
    %cst_189 = arith.constant dense<0.000000e+00> : vector<16xf32>
    %471 = vector.multi_reduction <add>, %470, %cst_189 [1] : vector<16x128xf32> to vector<16xf32>
    %472 = vector.shape_cast %471 : vector<16xf32> to vector<16x1xf32>
    %cst_190 = arith.constant 1.280000e+02 : f32
    %473 = vector.broadcast %cst_190 : f32 to vector<16x1xf32>
    %474 = arith.divf %472, %473 : vector<16x1xf32>
    %475 = vector.broadcast %474 : vector<16x1xf32> to vector<16x128xf32>
    %476 = arith.subf %470, %475 : vector<16x128xf32>
    %477 = arith.mulf %476, %476 : vector<16x128xf32>
    %cst_191 = arith.constant dense<0.000000e+00> : vector<16xf32>
    %478 = vector.multi_reduction <add>, %477, %cst_191 [1] : vector<16x128xf32> to vector<16xf32>
    %479 = vector.shape_cast %478 : vector<16xf32> to vector<16x1xf32>
    %cst_192 = arith.constant 1.280000e+02 : f32
    %480 = vector.broadcast %cst_192 : f32 to vector<16x1xf32>
    %481 = arith.divf %479, %480 : vector<16x1xf32>
    %482 = vector.broadcast %474 : vector<16x1xf32> to vector<16x128xf32>
    %483 = arith.subf %470, %482 : vector<16x128xf32>
    %cst_193 = arith.constant 9.99999996E-13 : f32
    %484 = vector.broadcast %cst_193 : f32 to vector<16x1xf32>
    %485 = arith.addf %481, %484 : vector<16x1xf32>
    %486 = math.rsqrt %485 : vector<16x1xf32>
    %487 = vector.broadcast %486 : vector<16x1xf32> to vector<16x128xf32>
    %488 = arith.mulf %483, %487 : vector<16x128xf32>
    %489 = vector.broadcast %420 : vector<1x128xf32> to vector<16x128xf32>
    %490 = arith.mulf %488, %489 : vector<16x128xf32>
    %491 = vector.broadcast %421 : vector<1x128xf32> to vector<16x128xf32>
    %492 = arith.addf %490, %491 : vector<16x128xf32>
    %c0_194 = arith.constant 0 : index
    %c0_195 = arith.constant 0 : index
    %493 = vector.load %arg58[%c0_194, %c0_195] : memref<128x384xbf16, #tpu.memory_space<vmem>>, vector<128x384xbf16>
    %494 = arith.truncf %492 : vector<16x128xf32> to vector<16x128xbf16>
    %cst_196 = arith.constant dense<0.000000e+00> : vector<16x384xf32>
    %495 = tpu.matmul %494, %493, %cst_196 {dimension_numbers = #tpu.dot_dimension_numbers<[1], [0], [0], [1], [0, 0, 1, 1], [], []>} : vector<16x128xbf16>, vector<128x384xbf16>, vector<16x384xf32> -> vector<16x384xf32>
    %c0_197 = arith.constant 0 : index
    %c0_198 = arith.constant 0 : index
    %496 = vector.load %arg54[%c0_197, %c0_198] : memref<1x384xf32, #tpu.memory_space<vmem>>, vector<1x384xf32>
    %497 = vector.broadcast %496 : vector<1x384xf32> to vector<16x384xf32>
    %498 = arith.addf %495, %497 : vector<16x384xf32>
    %499 = vector.extract_strided_slice %498 {offsets = [0, 0], sizes = [16, 128], strides = [1, 1]} : vector<16x384xf32> to vector<16x128xf32>
    %500 = vector.extract_strided_slice %498 {offsets = [0, 128], sizes = [16, 128], strides = [1, 1]} : vector<16x384xf32> to vector<16x128xf32>
    %501 = vector.extract_strided_slice %498 {offsets = [0, 256], sizes = [16, 128], strides = [1, 1]} : vector<16x384xf32> to vector<16x128xf32>
    %c0_199 = arith.constant 0 : index
    %c0_200 = arith.constant 0 : index
    %502 = vector.load %arg57[%c0_199, %c0_200] : memref<128x128xbf16, #tpu.memory_space<vmem>>, vector<128x128xbf16>
    %c0_201 = arith.constant 0 : index
    %c0_202 = arith.constant 0 : index
    %503 = vector.load %arg53[%c0_201, %c0_202] : memref<1x128xf32, #tpu.memory_space<vmem>>, vector<1x128xf32>
    %c0_203 = arith.constant 0 : index
    %c0_204 = arith.constant 0 : index
    %504 = vector.load %arg56[%c0_203, %c0_204] : memref<1x128xf32, #tpu.memory_space<vmem>>, vector<1x128xf32>
    %c0_205 = arith.constant 0 : index
    %c0_206 = arith.constant 0 : index
    %505 = vector.load %arg55[%c0_205, %c0_206] : memref<1x128xf32, #tpu.memory_space<vmem>>, vector<1x128xf32>
    %506 = vector.shape_cast %499 : vector<16x128xf32> to vector<2x8x128xf32>
    %507 = vector.shape_cast %500 : vector<16x128xf32> to vector<2x8x128xf32>
    %508 = vector.shape_cast %501 : vector<16x128xf32> to vector<2x8x128xf32>
    %509 = vector.extract_strided_slice %506 {offsets = [0, 0, 0], sizes = [2, 8, 64], strides = [1, 1, 1]} : vector<2x8x128xf32> to vector<2x8x64xf32>
    %510 = arith.truncf %509 : vector<2x8x64xf32> to vector<2x8x64xbf16>
    %511 = vector.extract_strided_slice %507 {offsets = [0, 0, 0], sizes = [2, 8, 64], strides = [1, 1, 1]} : vector<2x8x128xf32> to vector<2x8x64xf32>
    %512 = arith.truncf %511 : vector<2x8x64xf32> to vector<2x8x64xbf16>
    "tpu.trace_start"() <{level = 10 : i32, message = "bqd,bkd->bqk"}> : () -> ()
    %cst_207 = arith.constant dense<0.000000e+00> : vector<2x8x8xf32>
    %513 = tpu.matmul %510, %512, %cst_207 {dimension_numbers = #tpu.dot_dimension_numbers<[2], [2], [1], [1], [0, 0, 0, 1, 1, 1], [0], [0]>} : vector<2x8x64xbf16>, vector<2x8x64xbf16>, vector<2x8x8xf32> -> vector<2x8x8xf32>
    "tpu.trace_stop"() : () -> ()
    %514 = vector.broadcast %129 : vector<2x1x8xf32> to vector<2x8x8xf32>
    %515 = arith.addf %513, %514 : vector<2x8x8xf32>
    %cst_208 = arith.constant dense<0xFF800000> : vector<2x8xf32>
    %516 = vector.multi_reduction <maximumf>, %515, %cst_208 [2] : vector<2x8x8xf32> to vector<2x8xf32>
    %517 = vector.shape_cast %516 : vector<2x8xf32> to vector<2x8x1xf32>
    %518 = vector.broadcast %517 : vector<2x8x1xf32> to vector<2x8x8xf32>
    %519 = arith.subf %515, %518 : vector<2x8x8xf32>
    %520 = math.exp %519 : vector<2x8x8xf32>
    %cst_209 = arith.constant dense<0.000000e+00> : vector<2x8xf32>
    %521 = vector.multi_reduction <add>, %520, %cst_209 [2] : vector<2x8x8xf32> to vector<2x8xf32>
    %522 = vector.shape_cast %521 : vector<2x8xf32> to vector<2x8x1xf32>
    %523 = tpu.reciprocal %522 {approx = true} : vector<2x8x1xf32> -> vector<2x8x1xf32>
    %524 = vector.broadcast %523 : vector<2x8x1xf32> to vector<2x8x8xf32>
    %525 = arith.mulf %520, %524 : vector<2x8x8xf32>
    %526 = arith.truncf %525 : vector<2x8x8xf32> to vector<2x8x8xbf16>
    %527 = vector.extract_strided_slice %508 {offsets = [0, 0, 0], sizes = [2, 8, 64], strides = [1, 1, 1]} : vector<2x8x128xf32> to vector<2x8x64xf32>
    %528 = arith.truncf %527 : vector<2x8x64xf32> to vector<2x8x64xbf16>
    "tpu.trace_start"() <{level = 10 : i32, message = "bqk,bkd->bqd"}> : () -> ()
    %cst_210 = arith.constant dense<0.000000e+00> : vector<2x8x64xf32>
    %529 = tpu.matmul %526, %528, %cst_210 {dimension_numbers = #tpu.dot_dimension_numbers<[2], [1], [1], [2], [0, 0, 0, 1, 1, 2], [0], [0]>} : vector<2x8x8xbf16>, vector<2x8x64xbf16>, vector<2x8x64xf32> -> vector<2x8x64xf32>
    "tpu.trace_stop"() : () -> ()
    %530 = vector.shape_cast %529 : vector<2x8x64xf32> to vector<16x64xf32>
    %531 = vector.extract_strided_slice %506 {offsets = [0, 0, 64], sizes = [2, 8, 64], strides = [1, 1, 1]} : vector<2x8x128xf32> to vector<2x8x64xf32>
    %532 = arith.truncf %531 : vector<2x8x64xf32> to vector<2x8x64xbf16>
    %533 = vector.extract_strided_slice %507 {offsets = [0, 0, 64], sizes = [2, 8, 64], strides = [1, 1, 1]} : vector<2x8x128xf32> to vector<2x8x64xf32>
    %534 = arith.truncf %533 : vector<2x8x64xf32> to vector<2x8x64xbf16>
    "tpu.trace_start"() <{level = 10 : i32, message = "bqd,bkd->bqk"}> : () -> ()
    %cst_211 = arith.constant dense<0.000000e+00> : vector<2x8x8xf32>
    %535 = tpu.matmul %532, %534, %cst_211 {dimension_numbers = #tpu.dot_dimension_numbers<[2], [2], [1], [1], [0, 0, 0, 1, 1, 1], [0], [0]>} : vector<2x8x64xbf16>, vector<2x8x64xbf16>, vector<2x8x8xf32> -> vector<2x8x8xf32>
    "tpu.trace_stop"() : () -> ()
    %536 = vector.broadcast %129 : vector<2x1x8xf32> to vector<2x8x8xf32>
    %537 = arith.addf %535, %536 : vector<2x8x8xf32>
    %cst_212 = arith.constant dense<0xFF800000> : vector<2x8xf32>
    %538 = vector.multi_reduction <maximumf>, %537, %cst_212 [2] : vector<2x8x8xf32> to vector<2x8xf32>
    %539 = vector.shape_cast %538 : vector<2x8xf32> to vector<2x8x1xf32>
    %540 = vector.broadcast %539 : vector<2x8x1xf32> to vector<2x8x8xf32>
    %541 = arith.subf %537, %540 : vector<2x8x8xf32>
    %542 = math.exp %541 : vector<2x8x8xf32>
    %cst_213 = arith.constant dense<0.000000e+00> : vector<2x8xf32>
    %543 = vector.multi_reduction <add>, %542, %cst_213 [2] : vector<2x8x8xf32> to vector<2x8xf32>
    %544 = vector.shape_cast %543 : vector<2x8xf32> to vector<2x8x1xf32>
    %545 = tpu.reciprocal %544 {approx = true} : vector<2x8x1xf32> -> vector<2x8x1xf32>
    %546 = vector.broadcast %545 : vector<2x8x1xf32> to vector<2x8x8xf32>
    %547 = arith.mulf %542, %546 : vector<2x8x8xf32>
    %548 = arith.truncf %547 : vector<2x8x8xf32> to vector<2x8x8xbf16>
    %549 = vector.extract_strided_slice %508 {offsets = [0, 0, 64], sizes = [2, 8, 64], strides = [1, 1, 1]} : vector<2x8x128xf32> to vector<2x8x64xf32>
    %550 = arith.truncf %549 : vector<2x8x64xf32> to vector<2x8x64xbf16>
    "tpu.trace_start"() <{level = 10 : i32, message = "bqk,bkd->bqd"}> : () -> ()
    %cst_214 = arith.constant dense<0.000000e+00> : vector<2x8x64xf32>
    %551 = tpu.matmul %548, %550, %cst_214 {dimension_numbers = #tpu.dot_dimension_numbers<[2], [1], [1], [2], [0, 0, 0, 1, 1, 2], [0], [0]>} : vector<2x8x8xbf16>, vector<2x8x64xbf16>, vector<2x8x64xf32> -> vector<2x8x64xf32>
    "tpu.trace_stop"() : () -> ()
    %552 = vector.shape_cast %551 : vector<2x8x64xf32> to vector<16x64xf32>
    %553 = tpu.concatenate %530, %552 in 1 : vector<16x64xf32>, vector<16x64xf32> -> vector<16x128xf32>
    %554 = arith.truncf %553 : vector<16x128xf32> to vector<16x128xbf16>
    %cst_215 = arith.constant dense<0.000000e+00> : vector<16x128xf32>
    %555 = tpu.matmul %554, %502, %cst_215 {dimension_numbers = #tpu.dot_dimension_numbers<[1], [0], [0], [1], [0, 0, 1, 1], [], []>} : vector<16x128xbf16>, vector<128x128xbf16>, vector<16x128xf32> -> vector<16x128xf32>
    %556 = vector.broadcast %503 : vector<1x128xf32> to vector<16x128xf32>
    %557 = arith.addf %555, %556 : vector<16x128xf32>
    %558 = arith.addf %557, %492 : vector<16x128xf32>
    %cst_216 = arith.constant dense<0.000000e+00> : vector<16xf32>
    %559 = vector.multi_reduction <add>, %558, %cst_216 [1] : vector<16x128xf32> to vector<16xf32>
    %560 = vector.shape_cast %559 : vector<16xf32> to vector<16x1xf32>
    %cst_217 = arith.constant 1.280000e+02 : f32
    %561 = vector.broadcast %cst_217 : f32 to vector<16x1xf32>
    %562 = arith.divf %560, %561 : vector<16x1xf32>
    %563 = vector.broadcast %562 : vector<16x1xf32> to vector<16x128xf32>
    %564 = arith.subf %558, %563 : vector<16x128xf32>
    %565 = arith.mulf %564, %564 : vector<16x128xf32>
    %cst_218 = arith.constant dense<0.000000e+00> : vector<16xf32>
    %566 = vector.multi_reduction <add>, %565, %cst_218 [1] : vector<16x128xf32> to vector<16xf32>
    %567 = vector.shape_cast %566 : vector<16xf32> to vector<16x1xf32>
    %cst_219 = arith.constant 1.280000e+02 : f32
    %568 = vector.broadcast %cst_219 : f32 to vector<16x1xf32>
    %569 = arith.divf %567, %568 : vector<16x1xf32>
    %570 = vector.broadcast %562 : vector<16x1xf32> to vector<16x128xf32>
    %571 = arith.subf %558, %570 : vector<16x128xf32>
    %cst_220 = arith.constant 9.99999996E-13 : f32
    %572 = vector.broadcast %cst_220 : f32 to vector<16x1xf32>
    %573 = arith.addf %569, %572 : vector<16x1xf32>
    %574 = math.rsqrt %573 : vector<16x1xf32>
    %575 = vector.broadcast %574 : vector<16x1xf32> to vector<16x128xf32>
    %576 = arith.mulf %571, %575 : vector<16x128xf32>
    %577 = vector.broadcast %504 : vector<1x128xf32> to vector<16x128xf32>
    %578 = arith.mulf %576, %577 : vector<16x128xf32>
    %579 = vector.broadcast %505 : vector<1x128xf32> to vector<16x128xf32>
    %580 = arith.addf %578, %579 : vector<16x128xf32>
    %c0_221 = arith.constant 0 : index
    %c0_222 = arith.constant 0 : index
    %581 = vector.load %arg63[%c0_221, %c0_222] : memref<128x256xbf16, #tpu.memory_space<vmem>>, vector<128x256xbf16>
    %582 = arith.truncf %580 : vector<16x128xf32> to vector<16x128xbf16>
    %cst_223 = arith.constant dense<0.000000e+00> : vector<16x256xf32>
    %583 = tpu.matmul %582, %581, %cst_223 {dimension_numbers = #tpu.dot_dimension_numbers<[1], [0], [0], [1], [0, 0, 1, 1], [], []>} : vector<16x128xbf16>, vector<128x256xbf16>, vector<16x256xf32> -> vector<16x256xf32>
    %c0_224 = arith.constant 0 : index
    %c0_225 = arith.constant 0 : index
    %584 = vector.load %arg59[%c0_224, %c0_225] : memref<1x256xf32, #tpu.memory_space<vmem>>, vector<1x256xf32>
    %585 = vector.broadcast %584 : vector<1x256xf32> to vector<16x256xf32>
    %586 = arith.addf %583, %585 : vector<16x256xf32>
    %cst_226 = arith.constant 5.000000e-01 : f32
    %587 = vector.broadcast %cst_226 : f32 to vector<16x256xf32>
    %588 = arith.mulf %587, %586 : vector<16x256xf32>
    %cst_227 = arith.constant 4.471500e-02 : f32
    %589 = vector.broadcast %cst_227 : f32 to vector<16x256xf32>
    %590 = arith.mulf %589, %586 : vector<16x256xf32>
    %591 = arith.mulf %590, %586 : vector<16x256xf32>
    %592 = arith.mulf %591, %586 : vector<16x256xf32>
    %593 = arith.addf %586, %592 : vector<16x256xf32>
    %cst_228 = arith.constant 0.797884583 : f32
    %594 = vector.broadcast %cst_228 : f32 to vector<16x256xf32>
    %595 = arith.mulf %594, %593 : vector<16x256xf32>
    %596 = math.tanh %595 : vector<16x256xf32>
    %cst_229 = arith.constant 1.000000e+00 : f32
    %597 = vector.broadcast %cst_229 : f32 to vector<16x256xf32>
    %598 = arith.addf %597, %596 : vector<16x256xf32>
    %599 = arith.mulf %588, %598 : vector<16x256xf32>
    %c0_230 = arith.constant 0 : index
    %c0_231 = arith.constant 0 : index
    %600 = vector.load %arg64[%c0_230, %c0_231] : memref<256x128xbf16, #tpu.memory_space<vmem>>, vector<256x128xbf16>
    %601 = arith.truncf %599 : vector<16x256xf32> to vector<16x256xbf16>
    %cst_232 = arith.constant dense<0.000000e+00> : vector<16x128xf32>
    %602 = tpu.matmul %601, %600, %cst_232 {dimension_numbers = #tpu.dot_dimension_numbers<[1], [0], [0], [1], [0, 0, 1, 1], [], []>} : vector<16x256xbf16>, vector<256x128xbf16>, vector<16x128xf32> -> vector<16x128xf32>
    %c0_233 = arith.constant 0 : index
    %c0_234 = arith.constant 0 : index
    %603 = vector.load %arg60[%c0_233, %c0_234] : memref<1x128xf32, #tpu.memory_space<vmem>>, vector<1x128xf32>
    %604 = vector.broadcast %603 : vector<1x128xf32> to vector<16x128xf32>
    %605 = arith.addf %602, %604 : vector<16x128xf32>
    %606 = arith.addf %605, %580 : vector<16x128xf32>
    %c0_235 = arith.constant 0 : index
    %c0_236 = arith.constant 0 : index
    %607 = vector.load %arg62[%c0_235, %c0_236] : memref<1x128xf32, #tpu.memory_space<vmem>>, vector<1x128xf32>
    %c0_237 = arith.constant 0 : index
    %c0_238 = arith.constant 0 : index
    %608 = vector.load %arg61[%c0_237, %c0_238] : memref<1x128xf32, #tpu.memory_space<vmem>>, vector<1x128xf32>
    %cst_239 = arith.constant dense<0.000000e+00> : vector<16xf32>
    %609 = vector.multi_reduction <add>, %606, %cst_239 [1] : vector<16x128xf32> to vector<16xf32>
    %610 = vector.shape_cast %609 : vector<16xf32> to vector<16x1xf32>
    %cst_240 = arith.constant 1.280000e+02 : f32
    %611 = vector.broadcast %cst_240 : f32 to vector<16x1xf32>
    %612 = arith.divf %610, %611 : vector<16x1xf32>
    %613 = vector.broadcast %612 : vector<16x1xf32> to vector<16x128xf32>
    %614 = arith.subf %606, %613 : vector<16x128xf32>
    %615 = arith.mulf %614, %614 : vector<16x128xf32>
    %cst_241 = arith.constant dense<0.000000e+00> : vector<16xf32>
    %616 = vector.multi_reduction <add>, %615, %cst_241 [1] : vector<16x128xf32> to vector<16xf32>
    %617 = vector.shape_cast %616 : vector<16xf32> to vector<16x1xf32>
    %cst_242 = arith.constant 1.280000e+02 : f32
    %618 = vector.broadcast %cst_242 : f32 to vector<16x1xf32>
    %619 = arith.divf %617, %618 : vector<16x1xf32>
    %620 = vector.broadcast %612 : vector<16x1xf32> to vector<16x128xf32>
    %621 = arith.subf %606, %620 : vector<16x128xf32>
    %cst_243 = arith.constant 9.99999996E-13 : f32
    %622 = vector.broadcast %cst_243 : f32 to vector<16x1xf32>
    %623 = arith.addf %619, %622 : vector<16x1xf32>
    %624 = math.rsqrt %623 : vector<16x1xf32>
    %625 = vector.broadcast %624 : vector<16x1xf32> to vector<16x128xf32>
    %626 = arith.mulf %621, %625 : vector<16x128xf32>
    %627 = vector.broadcast %607 : vector<1x128xf32> to vector<16x128xf32>
    %628 = arith.mulf %626, %627 : vector<16x128xf32>
    %629 = vector.broadcast %608 : vector<1x128xf32> to vector<16x128xf32>
    %630 = arith.addf %628, %629 : vector<16x128xf32>
    %631 = vector.shape_cast %630 : vector<16x128xf32> to vector<2x8x128xf32>
    %632 = vector.extract_strided_slice %631 {offsets = [0, 0, 0], sizes = [2, 1, 128], strides = [1, 1, 1]} : vector<2x8x128xf32> to vector<2x1x128xf32>
    %633 = vector.shape_cast %632 : vector<2x1x128xf32> to vector<2x128xf32>
    %c0_244 = arith.constant 0 : index
    %c0_245 = arith.constant 0 : index
    %634 = vector.load %arg24[%c0_244, %c0_245] : memref<128x128xbf16, #tpu.memory_space<vmem>>, vector<128x128xbf16>
    %635 = arith.truncf %633 : vector<2x128xf32> to vector<2x128xbf16>
    %cst_246 = arith.constant dense<0.000000e+00> : vector<2x128xf32>
    %636 = tpu.matmul %635, %634, %cst_246 {dimension_numbers = #tpu.dot_dimension_numbers<[1], [0], [0], [1], [0, 0, 1, 1], [], []>} : vector<2x128xbf16>, vector<128x128xbf16>, vector<2x128xf32> -> vector<2x128xf32>
    %c0_247 = arith.constant 0 : index
    %c0_248 = arith.constant 0 : index
    %637 = vector.load %arg23[%c0_247, %c0_248] : memref<1x128xf32, #tpu.memory_space<vmem>>, vector<1x128xf32>
    %638 = vector.broadcast %637 : vector<1x128xf32> to vector<2x128xf32>
    %639 = arith.addf %636, %638 : vector<2x128xf32>
    %640 = math.tanh %639 : vector<2x128xf32>
    %c0_249 = arith.constant 0 : index
    %c0_250 = arith.constant 0 : index
    %641 = vector.load %arg77[%c0_249, %c0_250] : memref<2x128xf32, #tpu.memory_space<vmem>>, vector<2x128xf32>
    tpu.vector_store %arg77[%c0_249, %c0_250], %640 {strides = array<i32>} : memref<2x128xf32, #tpu.memory_space<vmem>>, vector<2x128xf32>,
    return
  }
}

</mosaic_0001>

<bundles_post_ra>
// kernel: lxrt_forward.1
= control target key start
LH: loop header
LB: loop body
LE: loop exit
PB: predicated region body
PF: predicated region fallthrough
CT: control target
= control target key end

     0   :  { %s9164_s6 = smov 1   ;;  %s9165_s10 = smov 2   ;;  %s10378_s0 = inlined_call_operand.smem [shape: u32[78], index: -1, kind: input, shape index: {}] }
   0x1   :  { %s9311_s5 = sld [smem:[%s10378_s0]]   ;;  %s9166_s14 = smov 3  }
   0x2   :  { %s9316_s9 = sld [smem:[%s10378_s0 + %s9164_s6]]   ;;  %s9167_s18 = smov 4  }
   0x3   :  { %s9321_s13 = sld [smem:[%s10378_s0 + %s9165_s10]]   ;;  %s9168_s22 = smov 5  }
   0x4   :  { %s9326_s17 = sld [smem:[%s10378_s0 + %s9166_s14]]   ;;  %s9169_s26 = smov 6  }
   0x5   :  { %s9331_s21 = sld [smem:[%s10378_s0 + %s9167_s18]]   ;;  %s9170_s30 = smov 7  }
   0x6   :  { %s9336_s25 = sld [smem:[%s10378_s0 + %s9168_s22]]   ;;  %s9171_s4 = smov 8  }
   0x7   :  { %10383 = sst [smem:[#allocation124_spill]] %s9311_s5  ;;  %s9172_s10 = smov 9  }
   0x8   :  { %10384 = sst [smem:[#allocation125_spill]] %s9316_s9  ;;  %s9173_s15 = smov 10  }
   0x9   :  { %10385 = sst [smem:[#allocation126_spill]] %s9321_s13  ;;  %s9174_s20 = smov 11  }
   0xa   :  { %10386 = sst [smem:[#allocation127_spill]] %s9326_s17  ;;  %s9176_s1 = smov 13  }
   0xb   :  { %10387 = sst [smem:[#allocation128_spill]] %s9331_s21  ;;  %s9177_s7 = smov 14  }
   0xc   :  { %10388 = sst [smem:[#allocation129_spill]] %s9336_s25  ;;  %s9179_s22 = smov 16  }
   0xd   :  { %s9341_s29 = sld [smem:[%s10378_s0 + %s9169_s26]]   ;;  %s9175_s26 = smov 12  }
   0xe   :  { %s9346_s3 = sld [smem:[%s10378_s0 + %s9170_s30]]   ;;  %s9180_s28 = smov 17  }
   0xf   :  { %s9351_s8 = sld [smem:[%s10378_s0 + %s9171_s4]]  }
  0x10   :  { %s9356_s14 = sld [smem:[%s10378_s0 + %s9172_s10]]  }
  0x11   :  { %s9361_s19 = sld [smem:[%s10378_s0 + %s9173_s15]]   ;;  %s9178_s15 = smov 15  }
  0x12   :  { %s9366_s24 = sld [smem:[%s10378_s0 + %s9174_s20]]  }
  0x13   :  { %10389 = sst [smem:[#allocation130_spill]] %s9341_s29 }
  0x14   :  { %s9371_s30 = sld [smem:[%s10378_s0 + %s9175_s26]]  }
  0x15   :  { %10390 = sst [smem:[#allocation131_spill]] %s9351_s8 }
  0x16   :  { %s9376_s6 = sld [smem:[%s10378_s0 + %s9176_s1]]  }
  0x17   :  { %10391 = sst [smem:[#allocation132_spill]] %s9361_s19 }
  0x18   :  { %s9381_s12 = sld [smem:[%s10378_s0 + %s9177_s7]]   ;;  %s9181_s7 = smov 18  }
  0x19   :  { %s9386_s20 = sld [smem:[%s10378_s0 + %s9178_s15]]   ;;  %s9182_s15 = smov 19  }
  0x1a   :  { %10392 = sst [smem:[#allocation133_spill]] %s9371_s30 }
  0x1b   :  { %s9391_s27 = sld [smem:[%s10378_s0 + %s9179_s22]]   ;;  %s9183_s22 = smov 20  }
  0x1c   :  { %s9396_s4 = sld [smem:[%s10378_s0 + %s9180_s28]]   ;;  %s9184_s28 = smov 21  }
  0x1d   :  { %s9401_s17 = sld [smem:[%s10378_s0 + %s9181_s7]]   ;;  %s9185_s7 = smov 22  }
  0x1e   :  { %10393 = sst [smem:[#allocation134_spill]] %s9381_s12 }
  0x1f   :  { %s9406_s25 = sld [smem:[%s10378_s0 + %s9182_s15]]   ;;  %s9186_s15 = smov 23  }
  0x20   :  { %s9411_s21 = sld [smem:[%s10378_s0 + %s9183_s22]]   ;;  %s9187_s22 = smov 24  }
  0x21   :  { %10394 = sst [smem:[#allocation135_spill]] %s9391_s27 }
  0x22   :  { %s9416_s13 = sld [smem:[%s10378_s0 + %s9184_s28]]   ;;  %s9188_s28 = smov 25  }
  0x23   :  { %10395 = sst [smem:[#allocation136_spill]] %s9401_s17 }
  0x24   :  { %s9421_s5 = sld [smem:[%s10378_s0 + %s9185_s7]]   ;;  %s9189_s7 = smov 26  }
  0x25   :  { %s9426_s9 = sld [smem:[%s10378_s0 + %s9186_s15]]   ;;  %s9190_s15 = smov 27  }
  0x26   :  { %10396 = sst [smem:[#allocation137_spill]] %s9411_s21 }
  0x27   :  { %s9431_s21 = sld [smem:[%s10378_s0 + %s9187_s22]]   ;;  %s9191_s22 = smov 28  }
  0x28   :  { %s9436_s17 = sld [smem:[%s10378_s0 + %s9188_s28]]   ;;  %s9192_s28 = smov 29  }
  0x29   :  { %s9446_s27 = sld [smem:[%s10378_s0 + %s9190_s15]]   ;;  %s9194_s15 = smov 31  }
  0x2a   :  { %10397 = sst [smem:[#allocation138_spill]] %s9421_s5 }
  0x2b   :  { %s9441_s5 = sld [smem:[%s10378_s0 + %s9189_s7]]   ;;  %s9193_s7 = smov 30  }
  0x2c   :  { %s9456_s12 = sld [smem:[%s10378_s0 + %s9192_s28]]   ;;  %s9196_s28 = smov 33  }
  0x2d   :  { %10398 = sst [smem:[#allocation139_spill]] %s9431_s21 }
  0x2e   :  { %s9451_s21 = sld [smem:[%s10378_s0 + %s9191_s22]]   ;;  %s9195_s22 = smov 32  }
  0x2f   :  { %s9466_s30 = sld [smem:[%s10378_s0 + %s9194_s15]]   ;;  %s9198_s15 = smov 35  }
  0x30   :  { %s9476_s19 = sld [smem:[%s10378_s0 + %s9196_s28]]   ;;  %s9200_s28 = smov 37  }
  0x31   :  { %10399 = sst [smem:[#allocation140_spill]] %s9441_s5 }
  0x32   :  { %s9461_s5 = sld [smem:[%s10378_s0 + %s9193_s7]]   ;;  %s9197_s7 = smov 34  }
  0x33   :  { %s9486_s8 = sld [smem:[%s10378_s0 + %s9198_s15]]   ;;  %s9202_s15 = smov 39  }
  0x34   :  { %10400 = sst [smem:[#allocation141_spill]] %s9451_s21 }
  0x35   :  { %s9471_s21 = sld [smem:[%s10378_s0 + %s9195_s22]]   ;;  %s9199_s22 = smov 36  }
  0x36   :  { %s9496_s29 = sld [smem:[%s10378_s0 + %s9200_s28]]   ;;  %s9204_s28 = smov 41  }
  0x38   :  { %10401 = sst [smem:[#allocation142_spill]] %s9461_s5 }
  0x39   :  { %s9481_s5 = sld [smem:[%s10378_s0 + %s9197_s7]]   ;;  %s9201_s7 = smov 38  }
  0x3a   :  { %10404 = sst [smem:[#allocation145_spill]] %s9486_s8 }
  0x3b   :  { %10402 = sst [smem:[#allocation143_spill]] %s9471_s21 }
  0x3c   :  { %s9491_s21 = sld [smem:[%s10378_s0 + %s9199_s22]]   ;;  %s9203_s22 = smov 40  }
  0x3d   :  { %10406 = sst [smem:[#allocation147_spill]] %s9496_s29 }
  0x3e   :  { %s9506_s8 = sld [smem:[%s10378_s0 + %s9202_s15]]   ;;  %s9206_s15 = smov 43  }
  0x3f   :  { %10403 = sst [smem:[#allocation144_spill]] %s9481_s5 }
  0x40   :  { %s9501_s5 = sld [smem:[%s10378_s0 + %s9201_s7]]   ;;  %s9205_s7 = smov 42  }
  0x41   :  { %s9516_s29 = sld [smem:[%s10378_s0 + %s9204_s28]]   ;;  %s9208_s28 = smov 45  }
  0x42   :  { %10405 = sst [smem:[#allocation146_spill]] %s9491_s21 }
  0x43   :  { %s9511_s21 = sld [smem:[%s10378_s0 + %s9203_s22]]   ;;  %s9207_s22 = smov 44  }
  0x44   :  { %10408 = sst [smem:[#allocation149_spill]] %s9506_s8 }
  0x45   :  { %s9526_s8 = sld [smem:[%s10378_s0 + %s9206_s15]]   ;;  %s9210_s15 = smov 47  }
  0x46   :  { %10407 = sst [smem:[#allocation148_spill]] %s9501_s5 }
  0x47   :  { %10410 = sst [smem:[#allocation151_spill]] %s9516_s29 }
  0x48   :  { %s9521_s5 = sld [smem:[%s10378_s0 + %s9205_s7]]   ;;  %s9209_s7 = smov 46  }
  0x49   :  { %10409 = sst [smem:[#allocation150_spill]] %s9511_s21 }
  0x4a   :  { %s9531_s21 = sld [smem:[%s10378_s0 + %s9207_s22]]   ;;  %s9211_s22 = smov 48  }
  0x4b   :  { %10412 = sst [smem:[#allocation153_spill]] %s9526_s8 }
  0x4c   :  { %s9536_s29 = sld [smem:[%s10378_s0 + %s9208_s28]]   ;;  %s9212_s28 = smov 49  }
  0x4d   :  { %s9546_s8 = sld [smem:[%s10378_s0 + %s9210_s15]]   ;;  %s9214_s15 = smov 51  }
  0x4e   :  { %10411 = sst [smem:[#allocation152_spill]] %s9521_s5 }
  0x4f   :  { %s9541_s5 = sld [smem:[%s10378_s0 + %s9209_s7]]   ;;  %s9213_s7 = smov 50  }
  0x50   :  { %10413 = sst [smem:[#allocation154_spill]] %s9531_s21 }
  0x51   :  { %s9551_s21 = sld [smem:[%s10378_s0 + %s9211_s22]]   ;;  %s9215_s22 = smov 52  }
  0x52   :  { %10414 = sst [smem:[#allocation155_spill]] %s9536_s29 }
  0x53   :  { %10416 = sst [smem:[#allocation157_spill]] %s9546_s8 }
  0x54   :  { %s9556_s29 = sld [smem:[%s10378_s0 + %s9212_s28]]   ;;  %s9216_s28 = smov 53  }
  0x55   :  { %10415 = sst [smem:[#allocation156_spill]] %s9541_s5 }
  0x56   :  { %s9561_s5 = sld [smem:[%s10378_s0 + %s9213_s7]]   ;;  %s9217_s7 = smov 54  }
  0x57   :  { %10417 = sst [smem:[#allocation158_spill]] %s9551_s21 }
  0x58   :  { %s9566_s8 = sld [smem:[%s10378_s0 + %s9214_s15]]   ;;  %s9218_s15 = smov 55  }
  0x59   :  { %s9571_s21 = sld [smem:[%s10378_s0 + %s9215_s22]]   ;;  %s9219_s22 = smov 56  }
  0x5a   :  { %10418 = sst [smem:[#allocation159_spill]] %s9556_s29 }
  0x5b   :  { %s9576_s29 = sld [smem:[%s10378_s0 + %s9216_s28]]   ;;  %s9220_s28 = smov 57  }
  0x5c   :  { %10419 = sst [smem:[#allocation160_spill]] %s9561_s5 }
  0x5d   :  { %s9581_s5 = sld [smem:[%s10378_s0 + %s9217_s7]]   ;;  %s9221_s7 = smov 58  }
  0x5e   :  { %10420 = sst [smem:[#allocation161_spill]] %s9566_s8 }
  0x5f   :  { %10421 = sst [smem:[#allocation162_spill]] %s9571_s21 }
  0x60   :  { %s9586_s8 = sld [smem:[%s10378_s0 + %s9218_s15]]   ;;  %s9222_s15 = smov 59  }
  0x61   :  { %10422 = sst [smem:[#allocation163_spill]] %s9576_s29 }
  0x62   :  { %s9591_s21 = sld [smem:[%s10378_s0 + %s9219_s22]]   ;;  %s9223_s22 = smov 60  }
  0x63   :  { %10423 = sst [smem:[#allocation164_spill]] %s9581_s5 }
  0x64   :  { %s9596_s29 = sld [smem:[%s10378_s0 + %s9220_s28]]   ;;  %s9224_s28 = smov 61  }
  0x65   :  { %s9601_s5 = sld [smem:[%s10378_s0 + %s9221_s7]]   ;;  %s9225_s7 = smov 62  }
  0x66   :  { %10424 = sst [smem:[#allocation165_spill]] %s9586_s8 }
  0x67   :  { %s9606_s8 = sld [smem:[%s10378_s0 + %s9222_s15]]   ;;  %s9226_s15 = smov 63  }
  0x68   :  { %10425 = sst [smem:[#allocation166_spill]] %s9591_s21 }
  0x69   :  { %s9611_s21 = sld [smem:[%s10378_s0 + %s9223_s22]]   ;;  %s9227_s22 = smov 64  }
  0x6a   :  { %10426 = sst [smem:[#allocation167_spill]] %s9596_s29 }
  0x6b   :  { %10427 = sst [smem:[#allocation168_spill]] %s9601_s5 }
  0x6c   :  { %s9616_s29 = sld [smem:[%s10378_s0 + %s9224_s28]]   ;;  %s9228_s28 = smov 69  }
  0x6d   :  { %10428 = sst [smem:[#allocation169_spill]] %s9606_s8 }
  0x6e   :  { %s9621_s5 = sld [smem:[%s10378_s0 + %s9225_s7]]   ;;  %s9229_s7 = smov 70  }
  0x6f   :  { %10429 = sst [smem:[#allocation170_spill]] %s9611_s21 }
  0x70   :  { %s9626_s8 = sld [smem:[%s10378_s0 + %s9226_s15]]   ;;  %s9230_s15 = smov 75  }
  0x71   :  { %s9631_s21 = sld [smem:[%s10378_s0 + %s9227_s22]]   ;;  %s9231_s22 = smov 76  }
  0x72   :  { %10430 = sst [smem:[#allocation171_spill]] %s9616_s29 }
  0x73   :  { %s9636_s29 = sld [smem:[%s10378_s0 + %s9228_s28]]   ;;  %s9232_s28 = smov 77  }
  0x74   :  { %10431 = sst [smem:[#allocation172_spill]] %s9621_s5 }
  0x75   :  { %s9641_s5 = sld [smem:[%s10378_s0 + %s9229_s7]]  }
  0x76   :  { %10432 = sst [smem:[#allocation173_spill]] %s9626_s8 }
  0x77   :  { %10433 = sst [smem:[#allocation174_spill]] %s9631_s21 }
  0x78   :  { %s9646_s8 = sld [smem:[%s10378_s0 + %s9230_s15]]  }
  0x79   :  { %10434 = sst [smem:[#allocation175_spill]] %s9636_s29 }
  0x7a   :  { %s9651_s21 = sld [smem:[%s10378_s0 + %s9231_s22]]  }
  0x7b   :  { %s9656_s29 = sld [smem:[%s10378_s0 + %s9232_s28]]  }
  0x7c   :  { %160 = vsyncpa [#allocation3], 0 }
  0x7d   :  { %161 = vsyncpa [#allocation6], 0 }
  0x7e   :  { %162 = vsyncpa [#allocation9], 0 }
  0x7f   :  { %163 = vsyncpa [#allocation12], 0 }
  0x80   :  { %164 = vsyncpa [#allocation15], 0 }
  0x81   :  { %165 = vsyncpa [#allocation18], 0 }
  0x82   :  { %166 = vsyncpa [#allocation21], 0 }
  0x83   :  { %167 = vsyncpa [#allocation24], 0 }
  0x84   :  { %168 = vsyncpa [#allocation27], 0 }
  0x85   :  { %169 = vsyncpa [#allocation30], 0 }
  0x86   :  { %170 = vsyncpa [#allocation33], 0 }
  0x87   :  { %171 = vsyncpa [#allocation36], 0 }
  0x88   :  { %172 = vsyncpa [#allocation39], 0 }
  0x89   :  { %173 = vsyncpa [#allocation42], 0 }
  0x8a   :  { %174 = vsyncpa [#allocation45], 0 }
  0x8b   :  { %175 = vsyncpa [#allocation48], 0 }
  0x8c   :  { %176 = vsyncpa [#allocation51], 0 }
  0x8d   :  { %177 = vsyncpa [#allocation54], 0 }
  0x8e   :  { %178 = vsyncpa [#allocation57], 0 }
  0x8f   :  { %179 = vsyncpa [#allocation60], 0 }
  0x90   :  { %180 = vsyncpa [#allocation63], 0 }
  0x91   :  { %181 = vsyncpa [#allocation66], 0 }
  0x92   :  { %182 = vsyncpa [#allocation69], 0 }
  0x93   :  { %183 = vsyncpa [#allocation72], 0 }
  0x94   :  { %184 = vsyncpa [#allocation75], 0 }
  0x95   :  { %185 = vsyncpa [#allocation78], 0 }
  0x96   :  { %186 = vsyncpa [#allocation81], 0 }
  0x97   :  { %187 = vsyncpa [#allocation84], 0 }
  0x98   :  { %188 = vsyncpa [#allocation87], 0 }
  0x99   :  { %189 = vsyncpa [#allocation90], 0 }
  0x9a   :  { %190 = vsyncpa [#allocation4], 0  ;;  %s9233_s0 = smov [#allocation5]   ;;  %s9234_s10 = smov [#allocation8]  }
  0x9b   :  { %s219_s7 = sshll.u32 %s9233_s0, 4  ;;  %s241_s11 = sshll.u32 %s9234_s10, 4  ;;  %s220_s7 = int_to_ptr.vmem [resolvable:$true] %s219_s7  ;;  %s242_s11 = int_to_ptr.vmem [resolvable:$true] %s241_s11 }
  0x9c   :  { %s7910_s15 = scalar_lea.vmem %s220_s7, 16  ;;  %s7914_s16 = scalar_lea.vmem %s220_s7, 32 }
  0x9d   :  { %p7911_p0 = scmp.ne.s32.totalorder %s220_s7, %s7910_s15  ;;  %p7915_p1 = scmp.lt.s32.totalorder %s220_s7, %s220_s7 }
  0x9e   :  { %p7916_p2 = scmp.lt.s32.totalorder %s7914_s16, %s7910_s15 }
  0xa0   :  { %p7917_p3 = por %p7916_p2, %p7915_p1 }
  0xa2   :  { %p7918_p4 = pnand %p7917_p3, %p7911_p0 }
  0xa4   :  { %7921 = shalt.err (!%p7918_p4)
}
  0xa5   :  { %222 = dma.hbm_to_vmem [thread:$0]  %s9346_s3, 16, %s220_s7, [#allocation6]  }
  0xa6   :  { %s7930_s18 = scalar_lea.vmem %s242_s11, 16  ;;  %s7934_s22 = scalar_lea.vmem %s242_s11, 32 }
  0xa7   :  { %p7931_p5 = scmp.ne.s32.totalorder %s242_s11, %s7930_s18  ;;  %p7935_p6 = scmp.lt.s32.totalorder %s242_s11, %s242_s11 }
  0xa8   :  { %p7936_p7 = scmp.lt.s32.totalorder %s7934_s22, %s7930_s18 }
  0xaa   :  { %p7937_p8 = por %p7936_p7, %p7935_p6 }
  0xac   :  { %p7938_p9 = pnand %p7937_p8, %p7931_p5 }
  0xae   :  { %7941 = shalt.err (!%p7938_p9)
}
  0xaf   :  { %244 = dma.hbm_to_vmem [thread:$0]  %s9356_s14, 16, %s242_s11, [#allocation9]  }
  0xb0   :  { %s9235_s23 = smov [#allocation11]   ;;  %s9236_s28 = smov [#allocation14]  }
  0xb1   :  { %s263_s26 = sshll.u32 %s9235_s23, 4  ;;  %s283_s1 = sshll.u32 %s9236_s28, 4  ;;  %s264_s26 = int_to_ptr.vmem [resolvable:$true] %s263_s26  ;;  %s284_s1 = int_to_ptr.vmem [resolvable:$true] %s283_s1 }
  0xb2   :  { %s7950_s2 = scalar_lea.vmem %s264_s26, 16  ;;  %s7954_s0 = scalar_lea.vmem %s264_s26, 32 }
  0xb3   :  { %p7951_p10 = scmp.ne.s32.totalorder %s264_s26, %s7950_s2  ;;  %p7955_p11 = scmp.lt.s32.totalorder %s264_s26, %s264_s26 }
  0xb4   :  { %p7956_p12 = scmp.lt.s32.totalorder %s7954_s0, %s7950_s2 }
  0xb6   :  { %p7957_p13 = por %p7956_p12, %p7955_p11 }
  0xb8   :  { %p7958_p0 = pnand %p7957_p13, %p7951_p10 }
  0xba   :  { %7961 = shalt.err (!%p7958_p0)
}
  0xbb   :  { %266 = dma.hbm_to_vmem [thread:$0]  %s9366_s24, 16, %s264_s26, [#allocation12]  }
  0xbc   :  { %s7970_s3 = scalar_lea.vmem %s284_s1, 16  ;;  %s7974_s7 = scalar_lea.vmem %s284_s1, 32 }
  0xbd   :  { %p7971_p1 = scmp.ne.s32.totalorder %s284_s1, %s7970_s3  ;;  %p7975_p2 = scmp.lt.s32.totalorder %s284_s1, %s284_s1 }
  0xbe   :  { %p7976_p3 = scmp.lt.s32.totalorder %s7974_s7, %s7970_s3 }
  0xc0   :  { %p7977_p4 = por %p7976_p3, %p7975_p2 }
  0xc2   :  { %p7978_p5 = pnand %p7977_p4, %p7971_p1 }
  0xc4   :  { %7981 = shalt.err (!%p7978_p5)
}
  0xc5   :  { %286 = dma.hbm_to_vmem [thread:$0]  %s9376_s6, 16, %s284_s1, [#allocation15]  }
  0xc6   :  { %s9237_s14 = smov [#allocation17]   ;;  %s9238_s11 = smov [#allocation20]  }
  0xc7   :  { %s302_s10 = sshll.u32 %s9237_s14, 4  ;;  %s327_s15 = sshll.u32 %s9238_s11, 4  ;;  %s303_s10 = int_to_ptr.vmem [resolvable:$true] %s302_s10  ;;  %s328_s15 = int_to_ptr.vmem [resolvable:$true] %s327_s15 }
  0xc8   :  { %s7990_s16 = scalar_lea.vmem %s303_s10, 1024  ;;  %p7995_p7 = scmp.lt.s32.totalorder %s303_s10, %s303_s10 }
  0xc9   :  { %p7991_p6 = scmp.ne.s32.totalorder %s303_s10, %s7990_s16  ;;  %p7996_p8 = scmp.lt.s32.totalorder %s7990_s16, %s7990_s16 }
  0xcb   :  { %p7997_p9 = por %p7996_p8, %p7995_p7 }
  0xcd   :  { %p7998_p10 = pnand %p7997_p9, %p7991_p6 }
  0xcf   :  { %8001 = shalt.err (!%p7998_p10)
}
  0xd0   :  { %s9239_s24 = smov 64   ;;  %s9240_s18 = smov 4  }
  0xd1   :  { %308 = dma.hbm_to_vmem [thread:$0]  %s9386_s20, 1024, %s303_s10, [#allocation18], %s9239_s24, %s9239_s24, %s9240_s18  }
  0xd2   :  { %s8010_s6 = scalar_lea.vmem %s328_s15, 32  ;;  %p8015_p12 = scmp.lt.s32.totalorder %s328_s15, %s328_s15 }
  0xd3   :  { %p8011_p11 = scmp.ne.s32.totalorder %s328_s15, %s8010_s6  ;;  %p8016_p13 = scmp.lt.s32.totalorder %s8010_s6, %s8010_s6 }
  0xd5   :  { %p8017_p0 = por %p8016_p13, %p8015_p12 }
  0xd7   :  { %p8018_p1 = pnand %p8017_p0, %p8011_p11 }
  0xd9   :  { %8021 = shalt.err (!%p8018_p1)
}
  0xda   :  { %330 = dma.hbm_to_vmem [thread:$0]  %s9396_s4, 32, %s328_s15, [#allocation21]  }
  0xdb   :  { %s9241_s22 = smov [#allocation23]   ;;  %s9242_s26 = smov [#allocation26]  }
  0xdc   :  { %s347_s23 = sshll.u32 %s9241_s22, 4  ;;  %s366_s28 = sshll.u32 %s9242_s26, 4  ;;  %s348_s23 = int_to_ptr.vmem [resolvable:$true] %s347_s23  ;;  %s367_s28 = int_to_ptr.vmem [resolvable:$true] %s366_s28 }
  0xdd   :  { %s8030_s1 = scalar_lea.vmem %s348_s23, 16  ;;  %s8034_s2 = scalar_lea.vmem %s348_s23, 32 }
  0xde   :  { %p8031_p2 = scmp.ne.s32.totalorder %s348_s23, %s8030_s1  ;;  %p8035_p3 = scmp.lt.s32.totalorder %s348_s23, %s348_s23 }
  0xdf   :  { %p8036_p4 = scmp.lt.s32.totalorder %s8034_s2, %s8030_s1 }
  0xe1   :  { %p8037_p5 = por %p8036_p4, %p8035_p3 }
  0xe3   :  { %p8038_p6 = pnand %p8037_p5, %p8031_p2 }
  0xe5   :  { %8041 = shalt.err (!%p8038_p6)
}
  0xe6   :  { %350 = dma.hbm_to_vmem [thread:$0]  %s9406_s25, 16, %s348_s23, [#allocation24]  }
  0xe7   :  { %s8050_s20 = scalar_lea.vmem %s367_s28, 2048  ;;  %p8055_p8 = scmp.lt.s32.totalorder %s367_s28, %s367_s28 }
  0xe8   :  { %p8051_p7 = scmp.ne.s32.totalorder %s367_s28, %s8050_s20  ;;  %p8056_p9 = scmp.lt.s32.totalorder %s8050_s20, %s8050_s20 }
  0xea   :  { %p8057_p10 = por %p8056_p9, %p8055_p8 }
  0xec   :  { %p8058_p11 = pnand %p8057_p10, %p8051_p7 }
  0xee   :  { %8061 = shalt.err (!%p8058_p11)
}
  0xef   :  { %s9243_s4 = smov 128   ;;  %s9244_s0 = smov 8  }
  0xf0   :  { %372 = dma.hbm_to_vmem [thread:$0]  %s9416_s13, 2048, %s367_s28, [#allocation27], %s9243_s4, %s9243_s4, %s9244_s0  }
  0xf1   :  { %s9245_s3 = smov [#allocation29]   ;;  %s9246_s14 = smov [#allocation32]  }
  0xf2   :  { %s391_s7 = sshll.u32 %s9245_s3, 4  ;;  %s413_s10 = sshll.u32 %s9246_s14, 4  ;;  %s392_s7 = int_to_ptr.vmem [resolvable:$true] %s391_s7  ;;  %s414_s10 = int_to_ptr.vmem [resolvable:$true] %s413_s10 }
  0xf3   :  { %s8070_s25 = scalar_lea.vmem %s392_s7, 16  ;;  %s8074_s11 = scalar_lea.vmem %s392_s7, 32 }
  0xf4   :  { %p8071_p12 = scmp.ne.s32.totalorder %s392_s7, %s8070_s25  ;;  %p8075_p13 = scmp.lt.s32.totalorder %s392_s7, %s392_s7 }
  0xf5   :  { %p8076_p0 = scmp.lt.s32.totalorder %s8074_s11, %s8070_s25 }
  0xf7   :  { %p8077_p1 = por %p8076_p0, %p8075_p13 }
  0xf9   :  { %p8078_p2 = pnand %p8077_p1, %p8071_p12 }
  0xfb   :  { %8081 = shalt.err (!%p8078_p2)
}
  0xfc   :  { %394 = dma.hbm_to_vmem [thread:$0]  %s9426_s9, 16, %s392_s7, [#allocation30]  }
  0xfd   :  { %s8090_s15 = scalar_lea.vmem %s414_s10, 16  ;;  %s8094_s16 = scalar_lea.vmem %s414_s10, 32 }
  0xfe   :  { %p8091_p3 = scmp.ne.s32.totalorder %s414_s10, %s8090_s15  ;;  %p8095_p4 = scmp.lt.s32.totalorder %s414_s10, %s414_s10 }
  0xff   :  { %p8096_p5 = scmp.lt.s32.totalorder %s8094_s16, %s8090_s15 }
 0x101   :  { %p8097_p6 = por %p8096_p5, %p8095_p4 }
 0x103   :  { %p8098_p7 = pnand %p8097_p6, %p8091_p3 }
 0x105   :  { %8101 = shalt.err (!%p8098_p7)
}
 0x106   :  { %416 = dma.hbm_to_vmem [thread:$0]  %s9436_s17, 16, %s414_s10, [#allocation33]  }
 0x107   :  { %s9247_s13 = smov [#allocation35]   ;;  %s9248_s22 = smov [#allocation38]  }
 0x108   :  { %s433_s6 = sshll.u32 %s9247_s13, 4  ;;  %s452_s23 = sshll.u32 %s9248_s22, 4  ;;  %s434_s6 = int_to_ptr.vmem [resolvable:$true] %s433_s6  ;;  %s453_s23 = int_to_ptr.vmem [resolvable:$true] %s452_s23 }
 0x109   :  { %s8110_s26 = scalar_lea.vmem %s434_s6, 16  ;;  %s8114_s28 = scalar_lea.vmem %s434_s6, 32 }
 0x10a   :  { %p8111_p8 = scmp.ne.s32.totalorder %s434_s6, %s8110_s26  ;;  %p8115_p9 = scmp.lt.s32.totalorder %s434_s6, %s434_s6 }
 0x10b   :  { %p8116_p10 = scmp.lt.s32.totalorder %s8114_s28, %s8110_s26 }
 0x10d   :  { %p8117_p11 = por %p8116_p10, %p8115_p9 }
 0x10f   :  { %p8118_p12 = pnand %p8117_p11, %p8111_p8 }
 0x111   :  { %8121 = shalt.err (!%p8118_p12)
}
 0x112   :  { %436 = dma.hbm_to_vmem [thread:$0]  %s9446_s27, 16, %s434_s6, [#allocation36]  }
 0x113   :  { %s8130_s9 = scalar_lea.vmem %s453_s23, 1024  ;;  %p8135_p0 = scmp.lt.s32.totalorder %s453_s23, %s453_s23 }
 0x114   :  { %p8131_p13 = scmp.ne.s32.totalorder %s453_s23, %s8130_s9  ;;  %p8136_p1 = scmp.lt.s32.totalorder %s8130_s9, %s8130_s9 }
 0x116   :  { %p8137_p2 = por %p8136_p1, %p8135_p0 }
 0x118   :  { %p8138_p3 = pnand %p8137_p2, %p8131_p13 }
 0x11a   :  { %8141 = shalt.err (!%p8138_p3)
}
 0x11b   :  { %458 = dma.hbm_to_vmem [thread:$0]  %s9456_s12, 1024, %s453_s23, [#allocation39], %s9239_s24, %s9239_s24, %s9240_s18  }
 0x11c   :  { %s9249_s17 = smov [#allocation41]   ;;  %s9250_s2 = smov [#allocation44]  }
 0x11d   :  { %s477_s1 = sshll.u32 %s9249_s17, 4  ;;  %s497_s20 = sshll.u32 %s9250_s2, 4  ;;  %s478_s1 = int_to_ptr.vmem [resolvable:$true] %s477_s1  ;;  %s498_s20 = int_to_ptr.vmem [resolvable:$true] %s497_s20 }
 0x11e   :  { %s8150_s3 = scalar_lea.vmem %s478_s1, 32  ;;  %p8155_p5 = scmp.lt.s32.totalorder %s478_s1, %s478_s1 }
 0x11f   :  { %p8151_p4 = scmp.ne.s32.totalorder %s478_s1, %s8150_s3  ;;  %p8156_p6 = scmp.lt.s32.totalorder %s8150_s3, %s8150_s3 }
 0x121   :  { %p8157_p7 = por %p8156_p6, %p8155_p5 }
 0x123   :  { %p8158_p8 = pnand %p8157_p7, %p8151_p4 }
 0x125   :  { %8161 = shalt.err (!%p8158_p8)
}
 0x126   :  { %480 = dma.hbm_to_vmem [thread:$0]  %s9466_s30, 32, %s478_s1, [#allocation42]  }
 0x127   :  { %s8170_s27 = scalar_lea.vmem %s498_s20, 16  ;;  %s8174_s7 = scalar_lea.vmem %s498_s20, 32 }
 0x128   :  { %p8171_p9 = scmp.ne.s32.totalorder %s498_s20, %s8170_s27  ;;  %p8175_p10 = scmp.lt.s32.totalorder %s498_s20, %s498_s20 }
 0x129   :  { %p8176_p11 = scmp.lt.s32.totalorder %s8174_s7, %s8170_s27 }
 0x12b   :  { %p8177_p12 = por %p8176_p11, %p8175_p10 }
 0x12d   :  { %p8178_p13 = pnand %p8177_p12, %p8171_p9 }
 0x12f   :  { %8181 = shalt.err (!%p8178_p13)
}
 0x130   :  { %500 = dma.hbm_to_vmem [thread:$0]  %s9476_s19, 16, %s498_s20, [#allocation45]  }
 0x131   :  { %s9251_s12 = smov [#allocation47]   ;;  %s9252_s10 = smov [#allocation50]  }
 0x132   :  { %s516_s14 = sshll.u32 %s9251_s12, 4  ;;  %s541_s25 = sshll.u32 %s9252_s10, 4  ;;  %s517_s14 = int_to_ptr.vmem [resolvable:$true] %s516_s14  ;;  %s542_s25 = int_to_ptr.vmem [resolvable:$true] %s541_s25 }
 0x133   :  { %s8190_s11 = scalar_lea.vmem %s517_s14, 2048  ;;  %p8195_p1 = scmp.lt.s32.totalorder %s517_s14, %s517_s14 }
 0x134   :  { %p8191_p0 = scmp.ne.s32.totalorder %s517_s14, %s8190_s11  ;;  %p8196_p2 = scmp.lt.s32.totalorder %s8190_s11, %s8190_s11 }
 0x136   :  { %p8197_p3 = por %p8196_p2, %p8195_p1 }
 0x138   :  { %p8198_p4 = pnand %p8197_p3, %p8191_p0 }
 0x13a   :  { %8201 = shalt.err (!%p8198_p4)
}
 0x13b   :  { %s10435_s30 = sld [smem:[#allocation145_spill]]  ;;  %s8210_s15 = scalar_lea.vmem %s542_s25, 16 }
 0x13c   :  { %p8211_p5 = scmp.ne.s32.totalorder %s542_s25, %s8210_s15  ;;  %s8214_s19 = scalar_lea.vmem %s542_s25, 32 }
 0x13d   :  { %p8215_p6 = scmp.lt.s32.totalorder %s542_s25, %s542_s25  ;;  %p8216_p7 = scmp.lt.s32.totalorder %s8214_s19, %s8210_s15 }
 0x13f   :  { %p8217_p8 = por %p8216_p7, %p8215_p6 }
 0x141   :  { %522 = dma.hbm_to_vmem [thread:$0]  %s10435_s30, 2048, %s517_s14, [#allocation48], %s9243_s4, %s9243_s4, %s9244_s0  }
 0x142   :  { %p8218_p9 = pnand %p8217_p8, %p8211_p5 }
 0x144   :  { %8221 = shalt.err (!%p8218_p9)
}
 0x145   :  { %s10436_s16 = sld [smem:[#allocation147_spill]]  ;;  %s9253_s13 = smov [#allocation53]  }
 0x146   :  { %s561_s6 = sshll.u32 %s9253_s13, 4  ;;  %s9254_s22 = smov [#allocation56]   ;;  %s562_s6 = int_to_ptr.vmem [resolvable:$true] %s561_s6 }
 0x147   :  { %s581_s23 = sshll.u32 %s9254_s22, 4  ;;  %s8230_s26 = scalar_lea.vmem %s562_s6, 16  ;;  %s582_s23 = int_to_ptr.vmem [resolvable:$true] %s581_s23 }
 0x148   :  { %p8231_p10 = scmp.ne.s32.totalorder %s562_s6, %s8230_s26  ;;  %s8234_s28 = scalar_lea.vmem %s562_s6, 32 }
 0x149   :  { %p8235_p11 = scmp.lt.s32.totalorder %s562_s6, %s562_s6  ;;  %p8236_p12 = scmp.lt.s32.totalorder %s8234_s28, %s8230_s26 }
 0x14b   :  { %544 = dma.hbm_to_vmem [thread:$0]  %s10436_s16, 16, %s542_s25, [#allocation51]  }
 0x14c   :  { %p8237_p13 = por %p8236_p12, %p8235_p11 }
 0x14e   :  { %p8238_p0 = pnand %p8237_p13, %p8231_p10 }
 0x150   :  { %8241 = shalt.err (!%p8238_p0)
}
 0x151   :  { %s10437_s9 = sld [smem:[#allocation149_spill]]  ;;  %s8250_s17 = scalar_lea.vmem %s582_s23, 16 }
 0x152   :  { %p8251_p1 = scmp.ne.s32.totalorder %s582_s23, %s8250_s17  ;;  %s8254_s1 = scalar_lea.vmem %s582_s23, 32 }
 0x153   :  { %p8255_p2 = scmp.lt.s32.totalorder %s582_s23, %s582_s23  ;;  %p8256_p3 = scmp.lt.s32.totalorder %s8254_s1, %s8250_s17 }
 0x155   :  { %p8257_p4 = por %p8256_p3, %p8255_p2 }
 0x157   :  { %564 = dma.hbm_to_vmem [thread:$0]  %s10437_s9, 16, %s562_s6, [#allocation54]  }
 0x158   :  { %p8258_p5 = pnand %p8257_p4, %p8251_p1 }
 0x15a   :  { %8261 = shalt.err (!%p8258_p5)
}
 0x15b   :  { %s10438_s2 = sld [smem:[#allocation151_spill]]  ;;  %s9255_s20 = smov [#allocation59]  }
 0x15c   :  { %s601_s3 = sshll.u32 %s9255_s20, 4  ;;  %s9256_s27 = smov [#allocation62]   ;;  %s602_s3 = int_to_ptr.vmem [resolvable:$true] %s601_s3 }
 0x15d   :  { %s623_s7 = sshll.u32 %s9256_s27, 4  ;;  %s8270_s12 = scalar_lea.vmem %s602_s3, 32  ;;  %s624_s7 = int_to_ptr.vmem [resolvable:$true] %s623_s7 }
 0x15e   :  { %p8271_p6 = scmp.ne.s32.totalorder %s602_s3, %s8270_s12  ;;  %p8275_p7 = scmp.lt.s32.totalorder %s602_s3, %s602_s3 }
 0x15f   :  { %p8276_p8 = scmp.lt.s32.totalorder %s8270_s12, %s8270_s12 }
 0x161   :  { %584 = dma.hbm_to_vmem [thread:$0]  %s10438_s2, 16, %s582_s23, [#allocation57]  }
 0x162   :  { %p8277_p9 = por %p8276_p8, %p8275_p7 }
 0x164   :  { %p8278_p10 = pnand %p8277_p9, %p8271_p6 }
 0x166   :  { %8281 = shalt.err (!%p8278_p10)
}
 0x167   :  { %s10439_s14 = sld [smem:[#allocation153_spill]]  ;;  %s8290_s10 = scalar_lea.vmem %s624_s7, 32 }
 0x168   :  { %p8291_p11 = scmp.ne.s32.totalorder %s624_s7, %s8290_s10  ;;  %p8295_p12 = scmp.lt.s32.totalorder %s624_s7, %s624_s7 }
 0x169   :  { %p8296_p13 = scmp.lt.s32.totalorder %s8290_s10, %s8290_s10 }
 0x16b   :  { %p8297_p0 = por %p8296_p13, %p8295_p12 }
 0x16d   :  { %604 = dma.hbm_to_vmem [thread:$0]  %s10439_s14, 32, %s602_s3, [#allocation60]  }
 0x16e   :  { %p8298_p1 = pnand %p8297_p0, %p8291_p11 }
 0x170   :  { %8301 = shalt.err (!%p8298_p1)
}
 0x171   :  { %s10440_s25 = sld [smem:[#allocation155_spill]]  ;;  %s9257_s11 = smov [#allocation65]  }
 0x172   :  { %s643_s30 = sshll.u32 %s9257_s11, 4  ;;  %s9258_s15 = smov [#allocation68]   ;;  %s644_s30 = int_to_ptr.vmem [resolvable:$true] %s643_s30 }
 0x173   :  { %s663_s19 = sshll.u32 %s9258_s15, 4  ;;  %s8310_s16 = scalar_lea.vmem %s644_s30, 16  ;;  %s664_s19 = int_to_ptr.vmem [resolvable:$true] %s663_s19 }
 0x174   :  { %p8311_p2 = scmp.ne.s32.totalorder %s644_s30, %s8310_s16  ;;  %s8314_s13 = scalar_lea.vmem %s644_s30, 32 }
 0x175   :  { %p8315_p3 = scmp.lt.s32.totalorder %s644_s30, %s644_s30  ;;  %p8316_p4 = scmp.lt.s32.totalorder %s8314_s13, %s8310_s16 }
 0x177   :  { %626 = dma.hbm_to_vmem [thread:$0]  %s10440_s25, 32, %s624_s7, [#allocation63]  }
 0x178   :  { %p8317_p5 = por %p8316_p4, %p8315_p3 }
 0x17a   :  { %p8318_p6 = pnand %p8317_p5, %p8311_p2 }
 0x17c   :  { %8321 = shalt.err (!%p8318_p6)
}
 0x17d   :  { %s10441_s6 = sld [smem:[#allocation157_spill]]  ;;  %s8330_s22 = scalar_lea.vmem %s664_s19, 16 }
 0x17e   :  { %p8331_p7 = scmp.ne.s32.totalorder %s664_s19, %s8330_s22  ;;  %s8334_s23 = scalar_lea.vmem %s664_s19, 32 }
 0x17f   :  { %p8335_p8 = scmp.lt.s32.totalorder %s664_s19, %s664_s19  ;;  %p8336_p9 = scmp.lt.s32.totalorder %s8334_s23, %s8330_s22 }
 0x181   :  { %p8337_p10 = por %p8336_p9, %p8335_p8 }
 0x183   :  { %646 = dma.hbm_to_vmem [thread:$0]  %s10441_s6, 16, %s644_s30, [#allocation66]  }
 0x184   :  { %p8338_p11 = pnand %p8337_p10, %p8331_p7 }
 0x186   :  { %8341 = shalt.err (!%p8338_p11)
}
 0x187   :  { %s10442_s26 = sld [smem:[#allocation159_spill]]  ;;  %s9259_s28 = smov [#allocation71]  }
 0x188   :  { %s686_s9 = sshll.u32 %s9259_s28, 4  ;;  %s9260_s17 = smov [#allocation74]   ;;  %s687_s9 = int_to_ptr.vmem [resolvable:$true] %s686_s9 }
 0x189   :  { %s711_s1 = sshll.u32 %s9260_s17, 4  ;;  %s8350_s2 = scalar_lea.vmem %s687_s9, 1024  ;;  %s712_s1 = int_to_ptr.vmem [resolvable:$true] %s711_s1 }
 0x18a   :  { %p8351_p12 = scmp.ne.s32.totalorder %s687_s9, %s8350_s2  ;;  %p8355_p13 = scmp.lt.s32.totalorder %s687_s9, %s687_s9 }
 0x18b   :  { %p8356_p0 = scmp.lt.s32.totalorder %s8350_s2, %s8350_s2 }
 0x18d   :  { %666 = dma.hbm_to_vmem [thread:$0]  %s10442_s26, 16, %s664_s19, [#allocation69]  }
 0x18e   :  { %p8357_p1 = por %p8356_p0, %p8355_p13 }
 0x190   :  { %p8358_p2 = pnand %p8357_p1, %p8351_p12 }
 0x192   :  { %8361 = shalt.err (!%p8358_p2)
}
 0x193   :  { %s10443_s20 = sld [smem:[#allocation162_spill]]  ;;  %s8370_s3 = scalar_lea.vmem %s712_s1, 16 }
 0x194   :  { %p8371_p3 = scmp.ne.s32.totalorder %s712_s1, %s8370_s3  ;;  %s8374_s27 = scalar_lea.vmem %s712_s1, 32 }
 0x195   :  { %p8375_p4 = scmp.lt.s32.totalorder %s712_s1, %s712_s1  ;;  %p8376_p5 = scmp.lt.s32.totalorder %s8374_s27, %s8370_s3 }
 0x197   :  { %p8377_p6 = por %p8376_p5, %p8375_p4 }
 0x199   :  { %692 = dma.hbm_to_vmem [thread:$0]  %s10443_s20, 1024, %s687_s9, [#allocation72], %s9239_s24, %s9239_s24, %s9240_s18  }
 0x19a   :  { %p8378_p7 = pnand %p8377_p6, %p8371_p3 }
 0x19c   :  { %8381 = shalt.err (!%p8378_p7)
}
 0x19d   :  { %s10444_s7 = sld [smem:[#allocation165_spill]]  ;;  %s9261_s12 = smov [#allocation77]  }
 0x19e   :  { %s730_s14 = sshll.u32 %s9261_s12, 4  ;;  %s9262_s10 = smov [#allocation80]   ;;  %s731_s14 = int_to_ptr.vmem [resolvable:$true] %s730_s14 }
 0x19f   :  { %s757_s25 = sshll.u32 %s9262_s10, 4  ;;  %s8390_s11 = scalar_lea.vmem %s731_s14, 1024  ;;  %s758_s25 = int_to_ptr.vmem [resolvable:$true] %s757_s25 }
 0x1a0   :  { %p8391_p8 = scmp.ne.s32.totalorder %s731_s14, %s8390_s11  ;;  %p8395_p9 = scmp.lt.s32.totalorder %s731_s14, %s731_s14 }
 0x1a1   :  { %p8396_p10 = scmp.lt.s32.totalorder %s8390_s11, %s8390_s11 }
 0x1a3   :  { %714 = dma.hbm_to_vmem [thread:$0]  %s10444_s7, 16, %s712_s1, [#allocation75]  }
 0x1a4   :  { %p8397_p11 = por %p8396_p10, %p8395_p9 }
 0x1a6   :  { %p8398_p12 = pnand %p8397_p11, %p8391_p8 }
 0x1a8   :  { %8401 = shalt.err (!%p8398_p12)
}
 0x1a9   :  { %s10445_s30 = sld [smem:[#allocation167_spill]]  ;;  %s8410_s15 = scalar_lea.vmem %s758_s25, 16 }
 0x1aa   :  { %p8411_p13 = scmp.ne.s32.totalorder %s758_s25, %s8410_s15  ;;  %s8414_s19 = scalar_lea.vmem %s758_s25, 32 }
 0x1ab   :  { %p8415_p0 = scmp.lt.s32.totalorder %s758_s25, %s758_s25  ;;  %p8416_p1 = scmp.lt.s32.totalorder %s8414_s19, %s8410_s15 }
 0x1ad   :  { %p8417_p2 = por %p8416_p1, %p8415_p0 }
 0x1af   :  { %736 = dma.hbm_to_vmem [thread:$0]  %s10445_s30, 1024, %s731_s14, [#allocation78], %s9239_s24, %s9239_s24, %s9240_s18  }
 0x1b0   :  { %p8418_p3 = pnand %p8417_p2, %p8411_p13 }
 0x1b2   :  { %8421 = shalt.err (!%p8418_p3)
}
 0x1b3   :  { %s10446_s16 = sld [smem:[#allocation170_spill]]  ;;  %s9263_s13 = smov [#allocation83]  }
 0x1b4   :  { %s778_s6 = sshll.u32 %s9263_s13, 4  ;;  %s9264_s22 = smov [#allocation86]   ;;  %s779_s6 = int_to_ptr.vmem [resolvable:$true] %s778_s6 }
 0x1b5   :  { %s810_s23 = sshll.u32 %s9264_s22, 4  ;;  %s8430_s26 = scalar_lea.vmem %s779_s6, 2048  ;;  %s811_s23 = int_to_ptr.vmem [resolvable:$true] %s810_s23 }
 0x1b6   :  { %p8431_p4 = scmp.ne.s32.totalorder %s779_s6, %s8430_s26  ;;  %p8435_p5 = scmp.lt.s32.totalorder %s779_s6, %s779_s6 }
 0x1b7   :  { %p8436_p6 = scmp.lt.s32.totalorder %s8430_s26, %s8430_s26 }
 0x1b9   :  { %760 = dma.hbm_to_vmem [thread:$0]  %s10446_s16, 16, %s758_s25, [#allocation81]  }
 0x1ba   :  { %p8437_p7 = por %p8436_p6, %p8435_p5 }
 0x1bc   :  { %p8438_p8 = pnand %p8437_p7, %p8431_p4 }
 0x1be   :  { %8441 = shalt.err (!%p8438_p8)
}
 0x1bf   :  { %s10447_s28 = sld [smem:[#allocation173_spill]]  ;;  %s8450_s9 = scalar_lea.vmem %s811_s23, 1024 }
 0x1c0   :  { %p8451_p9 = scmp.ne.s32.totalorder %s811_s23, %s8450_s9  ;;  %p8455_p10 = scmp.lt.s32.totalorder %s811_s23, %s811_s23 }
 0x1c1   :  { %p8456_p11 = scmp.lt.s32.totalorder %s8450_s9, %s8450_s9 }
 0x1c3   :  { %p8457_p12 = por %p8456_p11, %p8455_p10 }
 0x1c5   :  { %784 = dma.hbm_to_vmem [thread:$0]  %s10447_s28, 2048, %s779_s6, [#allocation84], %s9243_s4, %s9243_s4, %s9244_s0  }
 0x1c6   :  { %p8458_p13 = pnand %p8457_p12, %p8451_p9 }
 0x1c8   :  { %8461 = shalt.err (!%p8458_p13)
}
 0x1c9   :  { %s10448_s17 = sld [smem:[#allocation175_spill]]  ;;  %s9265_s1 = smov [#allocation89]  }
 0x1ca   :  { %s842_s2 = sshll.u32 %s9265_s1, 4  ;;  %s9266_s20 = smov [#allocation2]   ;;  %s843_s2 = int_to_ptr.vmem [resolvable:$true] %s842_s2 }
 0x1cb   :  { %s209_s3 = sshll.u32 %s9266_s20, 4  ;;  %s8470_s27 = scalar_lea.vmem %s843_s2, 2048  ;;  %s210_s3 = int_to_ptr.vmem [resolvable:$true] %s209_s3 }
 0x1cc   :  { %p8471_p0 = scmp.ne.s32.totalorder %s843_s2, %s8470_s27  ;;  %p8475_p1 = scmp.lt.s32.totalorder %s843_s2, %s843_s2 }
 0x1cd   :  { %p8476_p2 = scmp.lt.s32.totalorder %s8470_s27, %s8470_s27 }
 0x1cf   :  { %816 = dma.hbm_to_vmem [thread:$0]  %s10448_s17, 1024, %s811_s23, [#allocation87], %s9239_s24, %s9239_s24, %s9240_s18  }
 0x1d0   :  { %p8477_p3 = por %p8476_p2, %p8475_p1 }
 0x1d2   :  { %p8478_p4 = pnand %p8477_p3, %p8471_p0 }
 0x1d4   :  { %8481 = shalt.err (!%p8478_p4)
}
 0x1d5   :  { %848 = dma.hbm_to_vmem [thread:$0]  %s9646_s8, 2048, %s843_s2, [#allocation90], %s9243_s4, %s9243_s4, %s9244_s0  }
 0x1d6   :  { %s8490_s7 = scalar_lea.vmem %s210_s3, 16  ;;  %s8494_s12 = scalar_lea.vmem %s210_s3, 32 }
 0x1d7   :  { %p8491_p5 = scmp.ne.s32.totalorder %s210_s3, %s8490_s7  ;;  %p8495_p6 = scmp.lt.s32.totalorder %s210_s3, %s210_s3 }
 0x1d8   :  { %p8496_p7 = scmp.lt.s32.totalorder %s8494_s12, %s8490_s7 }
 0x1da   :  { %p8497_p8 = por %p8496_p7, %p8495_p6 }
 0x1dc   :  { %p8498_p9 = pnand %p8497_p8, %p8491_p5 }
 0x1de   :  { %8501 = shalt.err (!%p8498_p9)
}
 0x1df   :  { %s10449_s14 = sld [smem:[#allocation130_spill]]  ;;  %s9267_s10 = smov [#allocation7]  }
 0x1e0   :  { %s228_s25 = sshll.u32 %s9267_s10, 4  ;;  %s9268_s11 = smov [#allocation10]   ;;  %s229_s25 = int_to_ptr.vmem [resolvable:$true] %s228_s25 }
 0x1e1   :  { %s250_s30 = sshll.u32 %s9268_s11, 4  ;;  %s8510_s15 = scalar_lea.vmem %s229_s25, 256  ;;  %s251_s30 = int_to_ptr.vmem [resolvable:$true] %s250_s30 }
 0x1e2   :  { %p8511_p10 = scmp.ne.s32.totalorder %s229_s25, %s8510_s15  ;;  %p8515_p11 = scmp.lt.s32.totalorder %s229_s25, %s229_s25 }
 0x1e3   :  { %p8516_p12 = scmp.lt.s32.totalorder %s8510_s15, %s8510_s15 }
 0x1e5   :  { %212 = dma.hbm_to_vmem [thread:$0]  %s10449_s14, 16, %s210_s3, [#allocation3]  }
 0x1e6   :  { %p8517_p13 = por %p8516_p12, %p8515_p11 }
 0x1e8   :  { %p8518_p0 = pnand %p8517_p13, %p8511_p10 }
 0x1ea   :  { %8521 = shalt.err (!%p8518_p0)
}
 0x1eb   :  { %s10450_s8 = sld [smem:[#allocation131_spill]]  ;;  %s8530_s4 = scalar_lea.vmem %s251_s30, 512 }
 0x1ec   :  { %p8531_p1 = scmp.ne.s32.totalorder %s251_s30, %s8530_s4  ;;  %p8535_p2 = scmp.lt.s32.totalorder %s251_s30, %s251_s30 }
 0x1ed   :  { %p8536_p3 = scmp.lt.s32.totalorder %s8530_s4, %s8530_s4 }
 0x1ef   :  { %p8537_p4 = por %p8536_p3, %p8535_p2 }
 0x1f1   :  { %234 = dma.hbm_to_vmem [thread:$0]  %s10450_s8, 256, %s229_s25, [#allocation6], %s9239_s24, %s9239_s24, %s9240_s18  }
 0x1f2   :  { %p8538_p5 = pnand %p8537_p4, %p8531_p1 }
 0x1f4   :  { %8541 = shalt.err (!%p8538_p5)
}
 0x1f5   :  { %s10451_s0 = sld [smem:[#allocation132_spill]]  ;;  %s9269_s19 = smov [#allocation13]  }
 0x1f6   :  { %s273_s16 = sshll.u32 %s9269_s19, 4  ;;  %s9270_s13 = smov [#allocation16]   ;;  %s274_s16 = int_to_ptr.vmem [resolvable:$true] %s273_s16 }
 0x1f7   :  { %s293_s6 = sshll.u32 %s9270_s13, 4  ;;  %s8550_s22 = scalar_lea.vmem %s274_s16, 48  ;;  %s294_s6 = int_to_ptr.vmem [resolvable:$true] %s293_s6 }
 0x1f8   :  { %p8551_p6 = scmp.ne.s32.totalorder %s274_s16, %s8550_s22  ;;  %s8554_s23 = scalar_lea.vmem %s274_s16, 64 }
 0x1f9   :  { %p8555_p7 = scmp.lt.s32.totalorder %s274_s16, %s274_s16  ;;  %p8556_p8 = scmp.lt.s32.totalorder %s8554_s23, %s8550_s22 }
 0x1fb   :  { %256 = dma.hbm_to_vmem [thread:$0]  %s10451_s0, 512, %s251_s30, [#allocation9], %s9239_s24, %s9239_s24, %s9240_s18  }
 0x1fc   :  { %p8557_p9 = por %p8556_p8, %p8555_p7 }
 0x1fe   :  { %p8558_p10 = pnand %p8557_p9, %p8551_p6 }
 0x200   :  { %8561 = shalt.err (!%p8558_p10)
}
 0x201   :  { %s10452_s26 = sld [smem:[#allocation133_spill]]  ;;  %s8570_s28 = scalar_lea.vmem %s294_s6, 16 }
 0x202   :  { %p8571_p11 = scmp.ne.s32.totalorder %s294_s6, %s8570_s28  ;;  %s8574_s9 = scalar_lea.vmem %s294_s6, 32 }
 0x203   :  { %p8575_p12 = scmp.lt.s32.totalorder %s294_s6, %s294_s6  ;;  %p8576_p13 = scmp.lt.s32.totalorder %s8574_s9, %s8570_s28 }
 0x205   :  { %p8577_p0 = por %p8576_p13, %p8575_p12 }
 0x207   :  { %276 = dma.hbm_to_vmem [thread:$0]  %s10452_s26, 48, %s274_s16, [#allocation12]  }
 0x208   :  { %p8578_p1 = pnand %p8577_p0, %p8571_p11 }
 0x20a   :  { %8581 = shalt.err (!%p8578_p1)
}
 0x20b   :  { %s10453_s17 = sld [smem:[#allocation134_spill]]  ;;  %s9271_s1 = smov [#allocation19]  }
 0x20c   :  { %s314_s2 = sshll.u32 %s9271_s1, 4  ;;  %s315_s2 = int_to_ptr.vmem [resolvable:$true] %s314_s2 }
 0x20d   :  { %s8590_s20 = scalar_lea.vmem %s315_s2, 3072  ;;  %p8595_p3 = scmp.lt.s32.totalorder %s315_s2, %s315_s2 }
 0x20e   :  { %p8591_p2 = scmp.ne.s32.totalorder %s315_s2, %s8590_s20  ;;  %p8596_p4 = scmp.lt.s32.totalorder %s8590_s20, %s8590_s20 }
 0x210   :  { %p8597_p5 = por %p8596_p4, %p8595_p3 }
 0x211   :  { %296 = dma.hbm_to_vmem [thread:$0]  %s10453_s17, 16, %s294_s6, [#allocation15]  }
 0x212   :  { %p8598_p6 = pnand %p8597_p5, %p8591_p2 }
 0x214   :  { %8601 = shalt.err (!%p8598_p6)
}
 0x215   :  { %s9272_s3 = smov 192   ;;  %s10454_s27 = sld [smem:[#allocation135_spill]] }
 0x216   :  { %s9273_s7 = smov 12   ;;  %s9274_s12 = smov [#allocation22]  }
 0x217   :  { %s337_s14 = sshll.u32 %s9274_s12, 4  ;;  %s9275_s10 = smov [#allocation25]   ;;  %s338_s14 = int_to_ptr.vmem [resolvable:$true] %s337_s14 }
 0x218   :  { %s357_s25 = sshll.u32 %s9275_s10, 4  ;;  %s8610_s11 = scalar_lea.vmem %s338_s14, 16  ;;  %s358_s25 = int_to_ptr.vmem [resolvable:$true] %s357_s25 }
 0x219   :  { %p8611_p7 = scmp.ne.s32.totalorder %s338_s14, %s8610_s11  ;;  %s8614_s30 = scalar_lea.vmem %s338_s14, 32 }
 0x21a   :  { %p8615_p8 = scmp.lt.s32.totalorder %s338_s14, %s338_s14  ;;  %p8616_p9 = scmp.lt.s32.totalorder %s8614_s30, %s8610_s11 }
 0x21b   :  { %320 = dma.hbm_to_vmem [thread:$0]  %s10454_s27, 3072, %s315_s2, [#allocation18], %s9272_s3, %s9272_s3, %s9273_s7  }
 0x21c   :  { %p8617_p10 = por %p8616_p9, %p8615_p8 }
 0x21e   :  { %p8618_p11 = pnand %p8617_p10, %p8611_p7 }
 0x220   :  { %8621 = shalt.err (!%p8618_p11)
}
 0x221   :  { %s10455_s15 = sld [smem:[#allocation136_spill]]  ;;  %s8630_s8 = scalar_lea.vmem %s358_s25, 16 }
 0x222   :  { %p8631_p12 = scmp.ne.s32.totalorder %s358_s25, %s8630_s8  ;;  %s8634_s4 = scalar_lea.vmem %s358_s25, 32 }
 0x223   :  { %p8635_p13 = scmp.lt.s32.totalorder %s358_s25, %s358_s25  ;;  %p8636_p0 = scmp.lt.s32.totalorder %s8634_s4, %s8630_s8 }
 0x225   :  { %p8637_p1 = por %p8636_p0, %p8635_p13 }
 0x227   :  { %340 = dma.hbm_to_vmem [thread:$0]  %s10455_s15, 16, %s338_s14, [#allocation21]  }
 0x228   :  { %p8638_p2 = pnand %p8637_p1, %p8631_p12 }
 0x22a   :  { %8641 = shalt.err (!%p8638_p2)
}
 0x22b   :  { %s10456_s0 = sld [smem:[#allocation137_spill]]  ;;  %s9276_s19 = smov [#allocation28]  }
 0x22c   :  { %s378_s16 = sshll.u32 %s9276_s19, 4  ;;  %s9277_s13 = smov [#allocation31]   ;;  %s379_s16 = int_to_ptr.vmem [resolvable:$true] %s378_s16 }
 0x22d   :  { %s400_s6 = sshll.u32 %s9277_s13, 4  ;;  %s8650_s22 = scalar_lea.vmem %s379_s16, 2048  ;;  %s401_s6 = int_to_ptr.vmem [resolvable:$true] %s400_s6 }
 0x22e   :  { %p8651_p3 = scmp.ne.s32.totalorder %s379_s16, %s8650_s22  ;;  %p8655_p4 = scmp.lt.s32.totalorder %s379_s16, %s379_s16 }
 0x22f   :  { %p8656_p5 = scmp.lt.s32.totalorder %s8650_s22, %s8650_s22 }
 0x231   :  { %360 = dma.hbm_to_vmem [thread:$0]  %s10456_s0, 16, %s358_s25, [#allocation24]  }
 0x232   :  { %p8657_p6 = por %p8656_p5, %p8655_p4 }
 0x234   :  { %p8658_p7 = pnand %p8657_p6, %p8651_p3 }
 0x236   :  { %8661 = shalt.err (!%p8658_p7)
}
 0x237   :  { %s10457_s23 = sld [smem:[#allocation138_spill]]  ;;  %s8670_s26 = scalar_lea.vmem %s401_s6, 1024 }
 0x238   :  { %p8671_p8 = scmp.ne.s32.totalorder %s401_s6, %s8670_s26  ;;  %p8675_p9 = scmp.lt.s32.totalorder %s401_s6, %s401_s6 }
 0x239   :  { %p8676_p10 = scmp.lt.s32.totalorder %s8670_s26, %s8670_s26 }
 0x23b   :  { %p8677_p11 = por %p8676_p10, %p8675_p9 }
 0x23d   :  { %384 = dma.hbm_to_vmem [thread:$0]  %s10457_s23, 2048, %s379_s16, [#allocation27], %s9239_s24, %s9239_s24, %s9240_s18  }
 0x23e   :  { %p8678_p12 = pnand %p8677_p11, %p8671_p8 }
 0x240   :  { %8681 = shalt.err (!%p8678_p12)
}
 0x241   :  { %s10458_s28 = sld [smem:[#allocation139_spill]]  ;;  %s9278_s9 = smov [#allocation34]  }
 0x242   :  { %s423_s17 = sshll.u32 %s9278_s9, 4  ;;  %s9279_s1 = smov [#allocation37]   ;;  %s424_s17 = int_to_ptr.vmem [resolvable:$true] %s423_s17 }
 0x243   :  { %s443_s2 = sshll.u32 %s9279_s1, 4  ;;  %s8690_s20 = scalar_lea.vmem %s424_s17, 48  ;;  %s444_s2 = int_to_ptr.vmem [resolvable:$true] %s443_s2 }
 0x244   :  { %p8691_p13 = scmp.ne.s32.totalorder %s424_s17, %s8690_s20  ;;  %s8694_s27 = scalar_lea.vmem %s424_s17, 64 }
 0x245   :  { %p8695_p0 = scmp.lt.s32.totalorder %s424_s17, %s424_s17  ;;  %p8696_p1 = scmp.lt.s32.totalorder %s8694_s27, %s8690_s20 }
 0x247   :  { %406 = dma.hbm_to_vmem [thread:$0]  %s10458_s28, 1024, %s401_s6, [#allocation30], %s9239_s24, %s9239_s24, %s9240_s18  }
 0x248   :  { %p8697_p2 = por %p8696_p1, %p8695_p0 }
 0x24a   :  { %p8698_p3 = pnand %p8697_p2, %p8691_p13 }
 0x24c   :  { %8701 = shalt.err (!%p8698_p3)
}
 0x24d   :  { %s10459_s12 = sld [smem:[#allocation140_spill]]  ;;  %s8710_s14 = scalar_lea.vmem %s444_s2, 16 }
 0x24e   :  { %p8711_p4 = scmp.ne.s32.totalorder %s444_s2, %s8710_s14  ;;  %s8714_s10 = scalar_lea.vmem %s444_s2, 32 }
 0x24f   :  { %p8715_p5 = scmp.lt.s32.totalorder %s444_s2, %s444_s2  ;;  %p8716_p6 = scmp.lt.s32.totalorder %s8714_s10, %s8710_s14 }
 0x251   :  { %p8717_p7 = por %p8716_p6, %p8715_p5 }
 0x253   :  { %426 = dma.hbm_to_vmem [thread:$0]  %s10459_s12, 48, %s424_s17, [#allocation33]  }
 0x254   :  { %p8718_p8 = pnand %p8717_p7, %p8711_p4 }
 0x256   :  { %8721 = shalt.err (!%p8718_p8)
}
 0x257   :  { %s10460_s25 = sld [smem:[#allocation141_spill]]  ;;  %s9280_s11 = smov [#allocation40]  }
 0x258   :  { %s464_s30 = sshll.u32 %s9280_s11, 4  ;;  %s9281_s15 = smov [#allocation43]   ;;  %s465_s30 = int_to_ptr.vmem [resolvable:$true] %s464_s30 }
 0x259   :  { %s487_s8 = sshll.u32 %s9281_s15, 4  ;;  %s8730_s4 = scalar_lea.vmem %s465_s30, 3072  ;;  %s488_s8 = int_to_ptr.vmem [resolvable:$true] %s487_s8 }
 0x25a   :  { %p8731_p9 = scmp.ne.s32.totalorder %s465_s30, %s8730_s4  ;;  %p8735_p10 = scmp.lt.s32.totalorder %s465_s30, %s465_s30 }
 0x25b   :  { %p8736_p11 = scmp.lt.s32.totalorder %s8730_s4, %s8730_s4 }
 0x25d   :  { %446 = dma.hbm_to_vmem [thread:$0]  %s10460_s25, 16, %s444_s2, [#allocation36]  }
 0x25e   :  { %p8737_p12 = por %p8736_p11, %p8735_p10 }
 0x260   :  { %p8738_p13 = pnand %p8737_p12, %p8731_p9 }
 0x262   :  { %8741 = shalt.err (!%p8738_p13)
}
 0x263   :  { %s10461_s0 = sld [smem:[#allocation142_spill]]  ;;  %s8750_s19 = scalar_lea.vmem %s488_s8, 16 }
 0x264   :  { %p8751_p0 = scmp.ne.s32.totalorder %s488_s8, %s8750_s19  ;;  %s8754_s16 = scalar_lea.vmem %s488_s8, 32 }
 0x265   :  { %p8755_p1 = scmp.lt.s32.totalorder %s488_s8, %s488_s8  ;;  %p8756_p2 = scmp.lt.s32.totalorder %s8754_s16, %s8750_s19 }
 0x267   :  { %p8757_p3 = por %p8756_p2, %p8755_p1 }
 0x269   :  { %470 = dma.hbm_to_vmem [thread:$0]  %s10461_s0, 3072, %s465_s30, [#allocation39], %s9272_s3, %s9272_s3, %s9273_s7  }
 0x26a   :  { %p8758_p4 = pnand %p8757_p3, %p8751_p0 }
 0x26c   :  { %8761 = shalt.err (!%p8758_p4)
}
 0x26d   :  { %s10462_s13 = sld [smem:[#allocation143_spill]]  ;;  %s9282_s6 = smov [#allocation46]  }
 0x26e   :  { %s507_s22 = sshll.u32 %s9282_s6, 4  ;;  %s9283_s23 = smov [#allocation49]   ;;  %s508_s22 = int_to_ptr.vmem [resolvable:$true] %s507_s22 }
 0x26f   :  { %s528_s26 = sshll.u32 %s9283_s23, 4  ;;  %s8770_s28 = scalar_lea.vmem %s508_s22, 16  ;;  %s529_s26 = int_to_ptr.vmem [resolvable:$true] %s528_s26 }
 0x270   :  { %p8771_p5 = scmp.ne.s32.totalorder %s508_s22, %s8770_s28  ;;  %s8774_s9 = scalar_lea.vmem %s508_s22, 32 }
 0x271   :  { %p8775_p6 = scmp.lt.s32.totalorder %s508_s22, %s508_s22  ;;  %p8776_p7 = scmp.lt.s32.totalorder %s8774_s9, %s8770_s28 }
 0x273   :  { %490 = dma.hbm_to_vmem [thread:$0]  %s10462_s13, 16, %s488_s8, [#allocation42]  }
 0x274   :  { %p8777_p8 = por %p8776_p7, %p8775_p6 }
 0x276   :  { %p8778_p9 = pnand %p8777_p8, %p8771_p5 }
 0x278   :  { %8781 = shalt.err (!%p8778_p9)
}
 0x279   :  { %s10463_s17 = sld [smem:[#allocation144_spill]]  ;;  %s8790_s1 = scalar_lea.vmem %s529_s26, 2048 }
 0x27a   :  { %p8791_p10 = scmp.ne.s32.totalorder %s529_s26, %s8790_s1  ;;  %p8795_p11 = scmp.lt.s32.totalorder %s529_s26, %s529_s26 }
 0x27b   :  { %p8796_p12 = scmp.lt.s32.totalorder %s8790_s1, %s8790_s1 }
 0x27d   :  { %p8797_p13 = por %p8796_p12, %p8795_p11 }
 0x27f   :  { %510 = dma.hbm_to_vmem [thread:$0]  %s10463_s17, 16, %s508_s22, [#allocation45]  }
 0x280   :  { %p8798_p0 = pnand %p8797_p13, %p8791_p10 }
 0x282   :  { %8801 = shalt.err (!%p8798_p0)
}
 0x283   :  { %s10464_s2 = sld [smem:[#allocation146_spill]]  ;;  %s9284_s20 = smov [#allocation52]  }
 0x284   :  { %s551_s27 = sshll.u32 %s9284_s20, 4  ;;  %s9285_s12 = smov [#allocation55]   ;;  %s552_s27 = int_to_ptr.vmem [resolvable:$true] %s551_s27 }
 0x285   :  { %s571_s14 = sshll.u32 %s9285_s12, 4  ;;  %s8810_s10 = scalar_lea.vmem %s552_s27, 16  ;;  %s572_s14 = int_to_ptr.vmem [resolvable:$true] %s571_s14 }
 0x286   :  { %p8811_p1 = scmp.ne.s32.totalorder %s552_s27, %s8810_s10  ;;  %s8814_s25 = scalar_lea.vmem %s552_s27, 32 }
 0x287   :  { %p8815_p2 = scmp.lt.s32.totalorder %s552_s27, %s552_s27  ;;  %p8816_p3 = scmp.lt.s32.totalorder %s8814_s25, %s8810_s10 }
 0x289   :  { %534 = dma.hbm_to_vmem [thread:$0]  %s10464_s2, 2048, %s529_s26, [#allocation48], %s9239_s24, %s9239_s24, %s9240_s18  }
 0x28a   :  { %p8817_p4 = por %p8816_p3, %p8815_p2 }
 0x28c   :  { %p8818_p5 = pnand %p8817_p4, %p8811_p1 }
 0x28e   :  { %8821 = shalt.err (!%p8818_p5)
}
 0x28f   :  { %s10465_s11 = sld [smem:[#allocation148_spill]]  ;;  %s8830_s30 = scalar_lea.vmem %s572_s14, 16 }
 0x290   :  { %p8831_p6 = scmp.ne.s32.totalorder %s572_s14, %s8830_s30  ;;  %s8834_s15 = scalar_lea.vmem %s572_s14, 32 }
 0x291   :  { %p8835_p7 = scmp.lt.s32.totalorder %s572_s14, %s572_s14  ;;  %p8836_p8 = scmp.lt.s32.totalorder %s8834_s15, %s8830_s30 }
 0x293   :  { %p8837_p9 = por %p8836_p8, %p8835_p7 }
 0x295   :  { %554 = dma.hbm_to_vmem [thread:$0]  %s10465_s11, 16, %s552_s27, [#allocation51]  }
 0x296   :  { %p8838_p10 = pnand %p8837_p9, %p8831_p6 }
 0x298   :  { %8841 = shalt.err (!%p8838_p10)
}
 0x299   :  { %s10466_s8 = sld [smem:[#allocation150_spill]]  ;;  %s9286_s4 = smov [#allocation58]  }
 0x29a   :  { %s591_s0 = sshll.u32 %s9286_s4, 4  ;;  %s9287_s19 = smov [#allocation61]   ;;  %s592_s0 = int_to_ptr.vmem [resolvable:$true] %s591_s0 }
 0x29b   :  { %s610_s16 = sshll.u32 %s9287_s19, 4  ;;  %s8850_s13 = scalar_lea.vmem %s592_s0, 16  ;;  %s611_s16 = int_to_ptr.vmem [resolvable:$true] %s610_s16 }
 0x29c   :  { %p8851_p11 = scmp.ne.s32.totalorder %s592_s0, %s8850_s13  ;;  %s8854_s6 = scalar_lea.vmem %s592_s0, 32 }
 0x29d   :  { %p8855_p12 = scmp.lt.s32.totalorder %s592_s0, %s592_s0  ;;  %p8856_p13 = scmp.lt.s32.totalorder %s8854_s6, %s8850_s13 }
 0x29f   :  { %574 = dma.hbm_to_vmem [thread:$0]  %s10466_s8, 16, %s572_s14, [#allocation54]  }
 0x2a0   :  { %p8857_p0 = por %p8856_p13, %p8855_p12 }
 0x2a2   :  { %p8858_p1 = pnand %p8857_p0, %p8851_p11 }
 0x2a4   :  { %8861 = shalt.err (!%p8858_p1)
}
 0x2a5   :  { %s10467_s22 = sld [smem:[#allocation152_spill]]  ;;  %s8870_s23 = scalar_lea.vmem %s611_s16, 128 }
 0x2a6   :  { %p8871_p2 = scmp.ne.s32.totalorder %s611_s16, %s8870_s23  ;;  %p8875_p3 = scmp.lt.s32.totalorder %s611_s16, %s611_s16 }
 0x2a7   :  { %p8876_p4 = scmp.lt.s32.totalorder %s8870_s23, %s8870_s23 }
 0x2a9   :  { %p8877_p5 = por %p8876_p4, %p8875_p3 }
 0x2ab   :  { %594 = dma.hbm_to_vmem [thread:$0]  %s10467_s22, 16, %s592_s0, [#allocation57]  }
 0x2ac   :  { %p8878_p6 = pnand %p8877_p5, %p8871_p2 }
 0x2ae   :  { %8881 = shalt.err (!%p8878_p6)
}
 0x2af   :  { %s10468_s26 = sld [smem:[#allocation154_spill]]  ;;  %s9288_s28 = smov [#allocation64]  }
 0x2b0   :  { %s633_s9 = sshll.u32 %s9288_s28, 4  ;;  %s9289_s17 = smov [#allocation67]   ;;  %s634_s9 = int_to_ptr.vmem [resolvable:$true] %s633_s9 }
 0x2b1   :  { %s653_s1 = sshll.u32 %s9289_s17, 4  ;;  %s8890_s2 = scalar_lea.vmem %s634_s9, 16  ;;  %s654_s1 = int_to_ptr.vmem [resolvable:$true] %s653_s1 }
 0x2b2   :  { %p8891_p7 = scmp.ne.s32.totalorder %s634_s9, %s8890_s2  ;;  %s8894_s20 = scalar_lea.vmem %s634_s9, 32 }
 0x2b3   :  { %p8895_p8 = scmp.lt.s32.totalorder %s634_s9, %s634_s9  ;;  %p8896_p9 = scmp.lt.s32.totalorder %s8894_s20, %s8890_s2 }
 0x2b5   :  { %616 = dma.hbm_to_vmem [thread:$0]  %s10468_s26, 128, %s611_s16, [#allocation60], %s9239_s24, %s9239_s24, %s9240_s18  }
 0x2b6   :  { %p8897_p10 = por %p8896_p9, %p8895_p8 }
 0x2b8   :  { %p8898_p11 = pnand %p8897_p10, %p8891_p7 }
 0x2ba   :  { %8901 = shalt.err (!%p8898_p11)
}
 0x2bb   :  { %s10469_s27 = sld [smem:[#allocation156_spill]]  ;;  %s8910_s12 = scalar_lea.vmem %s654_s1, 16 }
 0x2bc   :  { %p8911_p12 = scmp.ne.s32.totalorder %s654_s1, %s8910_s12  ;;  %s8914_s14 = scalar_lea.vmem %s654_s1, 32 }
 0x2bd   :  { %p8915_p13 = scmp.lt.s32.totalorder %s654_s1, %s654_s1  ;;  %p8916_p0 = scmp.lt.s32.totalorder %s8914_s14, %s8910_s12 }
 0x2bf   :  { %p8917_p1 = por %p8916_p0, %p8915_p13 }
 0x2c1   :  { %636 = dma.hbm_to_vmem [thread:$0]  %s10469_s27, 16, %s634_s9, [#allocation63]  }
 0x2c2   :  { %p8918_p2 = pnand %p8917_p1, %p8911_p12 }
 0x2c4   :  { %8921 = shalt.err (!%p8918_p2)
}
 0x2c5   :  { %s10470_s10 = sld [smem:[#allocation158_spill]]  ;;  %s9290_s25 = smov [#allocation70]  }
 0x2c6   :  { %s674_s11 = sshll.u32 %s9290_s25, 4  ;;  %s9291_s30 = smov [#allocation73]   ;;  %s675_s11 = int_to_ptr.vmem [resolvable:$true] %s674_s11 }
 0x2c7   :  { %s699_s15 = sshll.u32 %s9291_s30, 4  ;;  %s8930_s8 = scalar_lea.vmem %s675_s11, 1024  ;;  %s700_s15 = int_to_ptr.vmem [resolvable:$true] %s699_s15 }
 0x2c8   :  { %p8931_p3 = scmp.ne.s32.totalorder %s675_s11, %s8930_s8  ;;  %p8935_p4 = scmp.lt.s32.totalorder %s675_s11, %s675_s11 }
 0x2c9   :  { %p8936_p5 = scmp.lt.s32.totalorder %s8930_s8, %s8930_s8 }
 0x2cb   :  { %656 = dma.hbm_to_vmem [thread:$0]  %s10470_s10, 16, %s654_s1, [#allocation66]  }
 0x2cc   :  { %p8937_p6 = por %p8936_p5, %p8935_p4 }
 0x2ce   :  { %p8938_p7 = pnand %p8937_p6, %p8931_p3 }
 0x2d0   :  { %8941 = shalt.err (!%p8938_p7)
}
 0x2d1   :  { %s10471_s4 = sld [smem:[#allocation161_spill]]  ;;  %s8950_s0 = scalar_lea.vmem %s700_s15, 16 }
 0x2d2   :  { %p8951_p8 = scmp.ne.s32.totalorder %s700_s15, %s8950_s0  ;;  %s8954_s19 = scalar_lea.vmem %s700_s15, 32 }
 0x2d3   :  { %p8955_p9 = scmp.lt.s32.totalorder %s700_s15, %s700_s15  ;;  %p8956_p10 = scmp.lt.s32.totalorder %s8954_s19, %s8950_s0 }
 0x2d5   :  { %p8957_p11 = por %p8956_p10, %p8955_p9 }
 0x2d7   :  { %680 = dma.hbm_to_vmem [thread:$0]  %s10471_s4, 1024, %s675_s11, [#allocation69], %s9239_s24, %s9239_s24, %s9240_s18  }
 0x2d8   :  { %p8958_p12 = pnand %p8957_p11, %p8951_p8 }
 0x2da   :  { %8961 = shalt.err (!%p8958_p12)
}
 0x2db   :  { %s10472_s16 = sld [smem:[#allocation163_spill]]  ;;  %s9292_s13 = smov [#allocation76]  }
 0x2dc   :  { %s721_s6 = sshll.u32 %s9292_s13, 4  ;;  %s9293_s22 = smov [#allocation79]   ;;  %s722_s6 = int_to_ptr.vmem [resolvable:$true] %s721_s6 }
 0x2dd   :  { %s742_s23 = sshll.u32 %s9293_s22, 4  ;;  %s8970_s26 = scalar_lea.vmem %s722_s6, 16  ;;  %s743_s23 = int_to_ptr.vmem [resolvable:$true] %s742_s23 }
 0x2de   :  { %p8971_p13 = scmp.ne.s32.totalorder %s722_s6, %s8970_s26  ;;  %s8974_s28 = scalar_lea.vmem %s722_s6, 32 }
 0x2df   :  { %p8975_p0 = scmp.lt.s32.totalorder %s722_s6, %s722_s6  ;;  %p8976_p1 = scmp.lt.s32.totalorder %s8974_s28, %s8970_s26 }
 0x2e1   :  { %702 = dma.hbm_to_vmem [thread:$0]  %s10472_s16, 16, %s700_s15, [#allocation72]  }
 0x2e2   :  { %p8977_p2 = por %p8976_p1, %p8975_p0 }
 0x2e4   :  { %p8978_p3 = pnand %p8977_p2, %p8971_p13 }
 0x2e6   :  { %8981 = shalt.err (!%p8978_p3)
}
 0x2e7   :  { %s10473_s9 = sld [smem:[#allocation166_spill]]  ;;  %s8990_s17 = scalar_lea.vmem %s743_s23, 3072 }
 0x2e8   :  { %p8991_p4 = scmp.ne.s32.totalorder %s743_s23, %s8990_s17  ;;  %p8995_p5 = scmp.lt.s32.totalorder %s743_s23, %s743_s23 }
 0x2e9   :  { %p8996_p6 = scmp.lt.s32.totalorder %s8990_s17, %s8990_s17 }
 0x2eb   :  { %p8997_p7 = por %p8996_p6, %p8995_p5 }
 0x2ed   :  { %724 = dma.hbm_to_vmem [thread:$0]  %s10473_s9, 16, %s722_s6, [#allocation75]  }
 0x2ee   :  { %p8998_p8 = pnand %p8997_p7, %p8991_p4 }
 0x2f0   :  { %9001 = shalt.err (!%p8998_p8)
}
 0x2f1   :  { %s10474_s1 = sld [smem:[#allocation168_spill]]  ;;  %s9294_s2 = smov [#allocation82]  }
 0x2f2   :  { %s767_s20 = sshll.u32 %s9294_s2, 4  ;;  %s9295_s27 = smov [#allocation85]   ;;  %s768_s20 = int_to_ptr.vmem [resolvable:$true] %s767_s20 }
 0x2f3   :  { %s790_s12 = sshll.u32 %s9295_s27, 4  ;;  %s9010_s14 = scalar_lea.vmem %s768_s20, 16  ;;  %s791_s12 = int_to_ptr.vmem [resolvable:$true] %s790_s12 }
 0x2f4   :  { %p9011_p9 = scmp.ne.s32.totalorder %s768_s20, %s9010_s14  ;;  %s9014_s10 = scalar_lea.vmem %s768_s20, 32 }
 0x2f5   :  { %p9015_p10 = scmp.lt.s32.totalorder %s768_s20, %s768_s20  ;;  %p9016_p11 = scmp.lt.s32.totalorder %s9014_s10, %s9010_s14 }
 0x2f7   :  { %748 = dma.hbm_to_vmem [thread:$0]  %s10474_s1, 3072, %s743_s23, [#allocation78], %s9272_s3, %s9272_s3, %s9273_s7  }
 0x2f8   :  { %p9017_p12 = por %p9016_p11, %p9015_p10 }
 0x2fa   :  { %p9018_p13 = pnand %p9017_p12, %p9011_p9 }
 0x2fc   :  { %9021 = shalt.err (!%p9018_p13)
}
 0x2fd   :  { %s10475_s25 = sld [smem:[#allocation171_spill]]  ;;  %s9030_s11 = scalar_lea.vmem %s791_s12, 2048 }
 0x2fe   :  { %p9031_p0 = scmp.ne.s32.totalorder %s791_s12, %s9030_s11  ;;  %p9035_p1 = scmp.lt.s32.totalorder %s791_s12, %s791_s12 }
 0x2ff   :  { %p9036_p2 = scmp.lt.s32.totalorder %s9030_s11, %s9030_s11 }
 0x301   :  { %p9037_p3 = por %p9036_p2, %p9035_p1 }
 0x303   :  { %770 = dma.hbm_to_vmem [thread:$0]  %s10475_s25, 16, %s768_s20, [#allocation81]  }
 0x304   :  { %p9038_p4 = pnand %p9037_p3, %p9031_p0 }
 0x306   :  { %9041 = shalt.err (!%p9038_p4)
}
 0x307   :  { %s10476_s30 = sld [smem:[#allocation174_spill]]  ;;  %s9296_s15 = smov [#allocation88]  }
 0x308   :  { %s822_s8 = sshll.u32 %s9296_s15, 4  ;;  %s9297_s4 = smov [#allocation91]   ;;  %s823_s8 = int_to_ptr.vmem [resolvable:$true] %s822_s8 }
 0x309   :  { %s854_s0 = sshll.u32 %s9297_s4, 4  ;;  %s9050_s19 = scalar_lea.vmem %s823_s8, 3072  ;;  %s855_s0 = int_to_ptr.vmem [resolvable:$true] %s854_s0 }
 0x30a   :  { %p9051_p5 = scmp.ne.s32.totalorder %s823_s8, %s9050_s19  ;;  %p9055_p6 = scmp.lt.s32.totalorder %s823_s8, %s823_s8 }
 0x30b   :  { %p9056_p7 = scmp.lt.s32.totalorder %s9050_s19, %s9050_s19 }
 0x30d   :  { %796 = dma.hbm_to_vmem [thread:$0]  %s10476_s30, 2048, %s791_s12, [#allocation84], %s9239_s24, %s9239_s24, %s9240_s18  }
 0x30e   :  { %p9057_p8 = por %p9056_p7, %p9055_p6 }
 0x310   :  { %p9058_p9 = pnand %p9057_p8, %p9051_p5 }
 0x312   :  { %9061 = shalt.err (!%p9058_p9)
}
 0x313   :  { %828 = dma.hbm_to_vmem [thread:$0]  %s9641_s5, 3072, %s823_s8, [#allocation87], %s9272_s3, %s9272_s3, %s9273_s7  }
 0x314   :  { %s9070_s16 = scalar_lea.vmem %s855_s0, 2048  ;;  %p9075_p11 = scmp.lt.s32.totalorder %s855_s0, %s855_s0 }
 0x315   :  { %p9071_p10 = scmp.ne.s32.totalorder %s855_s0, %s9070_s16  ;;  %p9076_p12 = scmp.lt.s32.totalorder %s9070_s16, %s9070_s16 }
 0x317   :  { %p9077_p13 = por %p9076_p12, %p9075_p11 }
 0x319   :  { %p9078_p0 = pnand %p9077_p13, %p9071_p10 }
 0x31b   :  { %9081 = shalt.err (!%p9078_p0)
}
 0x31c   :  { %860 = dma.hbm_to_vmem [thread:$0]  %s9651_s21, 2048, %s855_s0, [#allocation90], %s9239_s24, %s9239_s24, %s9240_s18  }
 0x31d   :  { %9102 = dma.done.wait [#allocation3], 16  }
 0x31e   :  { %9103 = vsyncadd [#allocation3], 4294967280 }
 0x31f   :  { %9104 = dma.done.wait [#allocation6], 272  }
 0x320   :  { %9105 = vsyncadd [#allocation6], 4294967024 }
 0x321   :  { %9106 = dma.done.wait [#allocation9], 528  }
 0x322   :  { %9107 = vsyncadd [#allocation9], 4294966768 }
 0x323   :  { %9108 = dma.done.wait [#allocation12], 64  }
 0x324   :  { %9109 = vsyncadd [#allocation12], 4294967232 }
 0x325   :  { %9110 = dma.done.wait [#allocation15], 32  }
 0x326   :  { %9111 = vsyncadd [#allocation15], 4294967264 }
 0x327   :  { %9112 = dma.done.wait [#allocation18], 4096  }
 0x328   :  { %9113 = vsyncadd [#allocation18], 4294963200 }
 0x329   :  { %9114 = dma.done.wait [#allocation21], 48  }
 0x32a   :  { %9115 = vsyncadd [#allocation21], 4294967248 }
 0x32b   :  { %9116 = dma.done.wait [#allocation24], 32  }
 0x32c   :  { %9117 = vsyncadd [#allocation24], 4294967264 }
 0x32d   :  { %9118 = dma.done.wait [#allocation27], 4096  }
 0x32e   :  { %9119 = vsyncadd [#allocation27], 4294963200 }
 0x32f   :  { %9120 = dma.done.wait [#allocation30], 1040  }
 0x330   :  { %9121 = vsyncadd [#allocation30], 4294966256 }
 0x331   :  { %9122 = dma.done.wait [#allocation33], 64  }
 0x332   :  { %9123 = vsyncadd [#allocation33], 4294967232 }
 0x333   :  { %9124 = dma.done.wait [#allocation36], 32  }
 0x334   :  { %9125 = vsyncadd [#allocation36], 4294967264 }
 0x335   :  { %9126 = dma.done.wait [#allocation39], 4096  }
 0x336   :  { %9127 = vsyncadd [#allocation39], 4294963200 }
 0x337   :  { %9128 = dma.done.wait [#allocation42], 48  }
 0x338   :  { %9129 = vsyncadd [#allocation42], 4294967248 }
 0x339   :  { %9130 = dma.done.wait [#allocation45], 32  }
 0x33a   :  { %9131 = vsyncadd [#allocation45], 4294967264 }
 0x33b   :  { %9132 = dma.done.wait [#allocation48], 4096  }
 0x33c   :  { %9133 = vsyncadd [#allocation48], 4294963200 }
 0x33d   :  { %9134 = dma.done.wait [#allocation51], 32  }
 0x33e   :  { %9135 = vsyncadd [#allocation51], 4294967264 }
 0x33f   :  { %9136 = dma.done.wait [#allocation54], 32  }
 0x340   :  { %9137 = vsyncadd [#allocation54], 4294967264 }
 0x341   :  { %9138 = dma.done.wait [#allocation57], 32  }
 0x342   :  { %9139 = vsyncadd [#allocation57], 4294967264 }
 0x343   :  { %9140 = dma.done.wait [#allocation60], 160  }
 0x344   :  { %9141 = vsyncadd [#allocation60], 4294967136 }
 0x345   :  { %9142 = dma.done.wait [#allocation63], 48  }
 0x346   :  { %9143 = vsyncadd [#allocation63], 4294967248 }
 0x347   :  { %9144 = dma.done.wait [#allocation66], 32  }
 0x348   :  { %9145 = vsyncadd [#allocation66], 4294967264 }
 0x349   :  { %9146 = dma.done.wait [#allocation69], 1040  }
 0x34a   :  { %9147 = vsyncadd [#allocation69], 4294966256 }
 0x34b   :  { %9148 = dma.done.wait [#allocation72], 1040  }
 0x34c   :  { %9149 = vsyncadd [#allocation72], 4294966256 }
 0x34d   :  { %9150 = dma.done.wait [#allocation75], 32  }
 0x34e   :  { %9151 = vsyncadd [#allocation75], 4294967264 }
 0x34f   :  { %9152 = dma.done.wait [#allocation78], 4096  }
 0x350   :  { %9153 = vsyncadd [#allocation78], 4294963200 }
 0x351   :  { %9154 = dma.done.wait [#allocation81], 32  }
 0x352   :  { %9155 = vsyncadd [#allocation81], 4294967264 }
 0x353   :  { %9156 = dma.done.wait [#allocation84], 4096  }
 0x354   :  { %9157 = vsyncadd [#allocation84], 4294963200 }
 0x355   :  { %9158 = dma.done.wait [#allocation87], 4096  }
 0x356   :  { %9159 = vsyncadd [#allocation87], 4294963200 }
 0x357   :  { %9160 = dma.done.wait [#allocation90], 4096  }
 0x358   :  { %9161 = vsyncadd [#allocation90], 4294963200  ;;  %s10477_s5 = sld [smem:[#allocation125_spill]]  ;;  %v9298_v0 = vmov 0   ;;  %v9299_v1 = vmov 0.0   ;;  %v7489_v8 = vld [vmem:[#allocation10 + $0x18] sm:$0xff]   ;;  %v1045_v16 = vlaneseq }
 0x359   :  { %s10478_s21 = sld [smem:[#allocation124_spill]]  ;;  %7473 = vset.pattern.permute.xlu1 %v9298_v0  ;;  %7472 = vset.pattern.permute.xlu0 %v9298_v0  ;;  %v7490_v9 = vld [vmem:[#allocation10 + $0x10] sm:$0xff]   ;;  %vm9300_vm0 = vmmov 0   ;;  %v7492_v14 = vld [vmem:[#allocation10 + $0x8] sm:$0xff]   ;;  %v7494_v15 = vld [vmem:[#allocation10] sm:$0xff]   ;;  %vm1093_vm5 = vcmask 261120  }
 0x35a   :  { %s10479_s18 = sld [smem:[#allocation126_spill]]  ;;  %6937 = vmatprep.subr.bf16.mxu1 %v9299_v1  ;;  %6929 = vmatprep.subr.bf16.mxu0 %v9299_v1  ;;  %v7491_v10 = vld [vmem:[#allocation7 + $0x8] sm:$0xff]   ;;  %v7493_v13 = vld [vmem:[#allocation7] sm:$0xff]   ;;  %v1046_v17 = vand.u32 127, %v1045_v16  ;;  %vm1162_vm6 = vcmask 523264   ;;  %v9810_v30 = vshrl.u32 %v1045_v16, 7 }
 0x35b   :  { %6938 = vmatpush3.bf16.msra.mxu1 %v7489_v8  ;;  %6933 = vmatprep.mubr.msk.bf16.mxu0 %vm9300_vm0, %v9299_v1  ;;  %v1207_v28 = vld [vmem:[#allocation8] sm:$0x1]  ;;  %s10480_s3 = sld [smem:[#allocation128_spill]]  ;;  %v7495_v55 = vld [vmem:[#allocation61] sm:$0xff]   ;;  %v1369_v57 = vld [vmem:[#allocation59] sm:$0x3] }
 0x35c   :  { %6939 = vmatprep.subr.bf16.mxu1 %v9299_v1  ;;  %6930 = vmatpush3.bf16.msra.mxu0 %v7491_v10  ;;  %v1208_v29 = vunpack.c.l.bf16 %v1207_v28  ;;  %v9813_v32 = vsub.s32 0, %v9810_v30  ;;  %v9816_v33 = vsub.s32 1, %v9810_v30  ;;  %s10481_s7 = sld [smem:[#allocation129_spill]]  ;;  %vm1382_vm7 = vcmask 1041408   ;;  %v7496_v59 = vld [vmem:[#allocation19 + $0xa8] ss:$12 sps:$4 sm:$0xff]  }
 0x35d   :  { %6931 = vmatprep.subr.bf16.mxu0 %v9299_v1  ;;  %6945 = vmatprep.mubr.msk.bf16.mxu1 %vm9300_vm0, %v9299_v1  ;;  %v7498_v60 = vld [vmem:[#allocation19 + $0xac] ss:$12 sps:$4 sm:$0xff]   ;;  %vm1297_vm8 = vcmask 130048   ;;  %v1384_v61 = vsel %vm1382_vm7, %v1369_v57, 0  ;;  %vm1378_vm9 = vcmask 31744   ;;  %vm1898_vm10 = vcmask 1043456  }
 0x35e   :  { %v1041_v2 = vld [vmem:[%s10477_s5] sm:$0xff]  ;;  %v1042_v4 = vld [vmem:[%s10477_s5 + $0x8] sm:$0xff]  ;;  %v1218_v31 = vrot.slane %v1208_v29, 7  ;;  %v1212_v37 = vrot.slane %v1208_v29, %v9813_v32  ;;  %s10482_s13 = sld [smem:[#allocation127_spill]]  ;;  %vm1868_vm11 = vcmask 64512   ;;  %vm3151_vm12 = vcmask 27648  }
 0x35f   :  { %v1039_v3 = vld [vmem:[%s10478_s21] sm:$0xff]  ;;  %1058 = vperm.xlu1 %7473, %v1041_v2   ;;  %v1040_v5 = vld [vmem:[%s10478_s21 + $0x8] sm:$0xff]  ;;  %6940 = vmatpush3.bf16.msra.mxu1 %v7490_v9  ;;  %v7499_v2 = vld [vmem:[#allocation19 + $0xb0] ss:$12 sps:$4 sm:$0xff]   ;;  %s10483_s6 = sld [smem:[#allocation160_spill]]  ;;  %vm6192_vm13 = vcmask 1041409  }
 0x360   :  { %1048 = vperm.xlu0 %7472, %v1039_v3   ;;  %v1044_v6 = vld [vmem:[%s10479_s18 + $0x8] sm:$0xff]  ;;  %v1043_v7 = vld [vmem:[%s10479_s18] sm:$0xff]  ;;  %6941 = vmatprep.subr.bf16.mxu1 %v9299_v1  ;;  %v1220_v34 = vsub.f32 %v1208_v29, %v1218_v31  ;;  %s10484_s22 = sld [smem:[#allocation164_spill]]  ;;  %s9302_s26 = smov [#allocation92]  }
 0x361   :  { %v1216_v11 = vcvt.s32.f32 %v1044_v6  ;;  %v1215_v12 = vcvt.s32.f32 %v1043_v7  ;;  %6932 = vmatpush3.bf16.msra.mxu0 %v7493_v13  ;;  %v1280_v56 = vld [vmem:[%s10480_s3] sm:$0xff]  ;;  %s10486_s23 = sld [smem:[#allocation172_spill]]  ;;  %s6292_s28 = sshll.u32 %s9302_s26, 4  ;;  %s6293_s28 = int_to_ptr.vmem [resolvable:$true] %s6292_s28 }
 0x362   :  { %6949 = vmatprep.subr.bf16.mxu0 %v9299_v1  ;;  %v1234_v35 = vrot.slane %v1220_v34, %v9816_v33  ;;  %v1283_v58 = vpack.c.bf16 %v1280_v56, %v1280_v56  ;;  %v1368_v62 = vld [vmem:[%s10481_s7] sm:$0xff]  ;;  %v7527_v34 = vld [vmem:[#allocation19 + $0x8] ss:$12 sps:$4 sm:$0xff]   ;;  %s9082_s9 = scalar_lea.vmem %s6293_s28, 32  ;;  %p9087_p2 = scmp.lt.s32.totalorder %s6293_s28, %s6293_s28 }
 0x363   :  { %1061 = vperm.xlu1 %7473, %v1042_v4   ;;  %6942 = vmatpush3.bf16.msra.mxu1 %v7492_v14  ;;  %v1370_v63 = vpack.c.bf16 %v1368_v62, %v1368_v62  ;;  %v7503_v13 = vld [vmem:[#allocation19 + $0x98] ss:$12 sps:$4 sm:$0xff]   ;;  %v7506_v14 = vld [vmem:[#allocation19 + $0x7c] ss:$12 sps:$4 sm:$0xff]   ;;  %v7507_v16 = vld [vmem:[#allocation19 + $0x80] ss:$12 sps:$4 sm:$0xff]   ;;  %p9083_p1 = scmp.ne.s32.totalorder %s6293_s28, %s9082_s9  ;;  %p9088_p3 = scmp.lt.s32.totalorder %s9082_s9, %s9082_s9 }
 0x364   :  { %1051 = vperm.xlu0 %7472, %v1040_v5   ;;  %6943 = vmatprep.subr.bf16.mxu1 %v9299_v1  ;;  %v7523_v28 = vld [vmem:[#allocation19 + $0x20] ss:$12 sps:$4 sm:$0xff]   ;;  %v7526_v29 = vld [vmem:[#allocation19 + $0x4] ss:$12 sps:$4 sm:$0xff]  }
 0x365   :  { %v7524_v31 = vld [vmem:[#allocation19] ss:$12 sps:$4 sm:$0xff]   ;;  %p9089_p4 = por %p9088_p3, %p9087_p2 }
 0x367   :  { %1228 = vperm.xlu1 %7473, %v1216_v11   ;;  %6944 = vmatpush3.bf16.msra.mxu1 %v7494_v15  ;;  %v7502_v11 = vld [vmem:[#allocation19 + $0x94] ss:$12 sps:$4 sm:$0xff]   ;;  %v7504_v15 = vld [vmem:[#allocation19 + $0x78] ss:$12 sps:$4 sm:$0xff]   ;;  %p9090_p5 = pnand %p9089_p4, %p9083_p1 }
 0x368   :  { %1223 = vperm.xlu0 %7472, %v1215_v12   ;;  %1659 = vmatprep.subr.bf16.mxu1 %v7498_v60  ;;  %v7500_v12 = vld [vmem:[#allocation19 + $0x90] ss:$12 sps:$4 sm:$0xff]   ;;  %v1514_v60 = vld [vmem:[#allocation13] sm:$0x7] }
 0x369   :  { %v1523_v62 = vrot.slane %v1514_v60, %v9816_v33 }
 0x3da   :  { %v1059_v18 = vpop.permute.xlu1 %1058 }
 0x3db   :  { %v1049_v19 = vpop.permute.xlu0 %1048  ;;  %vm1063_vm1 = vcmp.eq.s32.totalorder %v1046_v17, %v1059_v18  ;;  %v7510_v18 = vld [vmem:[#allocation19 + $0x64] ss:$12 sps:$4 sm:$0xff]  }
 0x3dc   :  { %vm1053_vm2 = vcmp.eq.s32.totalorder %v1046_v17, %v1049_v19  ;;  %v1065_v22 = vsel %vm1063_vm1, 1.0, %v9299_v1  ;;  %v7511_v19 = vld [vmem:[#allocation19 + $0x68] ss:$12 sps:$4 sm:$0xff]  }
 0x3dd   :  { %v1055_v23 = vsel %vm1053_vm2, 1.0, %v9299_v1 }
 0x3de   :  { %v1062_v20 = vpop.permute.xlu1 %1061 }
 0x3df   :  { %v1052_v21 = vpop.permute.xlu0 %1051  ;;  %vm1064_vm3 = vcmp.eq.s32.totalorder %v1046_v17, %v1062_v20  ;;  %v7514_v20 = vld [vmem:[#allocation19 + $0x4c] ss:$12 sps:$4 sm:$0xff]  }
 0x3e0   :  { %vm1054_vm4 = vcmp.eq.s32.totalorder %v1046_v17, %v1052_v21  ;;  %v1066_v24 = vsel %vm1064_vm3, 1.0, %v9299_v1  ;;  %v7508_v17 = vld [vmem:[#allocation19 + $0x60] ss:$12 sps:$4 sm:$0xff]   ;;  %v7512_v21 = vld [vmem:[#allocation19 + $0x48] ss:$12 sps:$4 sm:$0xff]  }
 0x3e1   :  { %v1056_v25 = vsel %vm1054_vm4, 1.0, %v9299_v1  ;;  %v1080_v26 = vpack.c.bf16 %v1066_v24, %v1065_v22  ;;  %v7515_v22 = vld [vmem:[#allocation19 + $0x50] ss:$12 sps:$4 sm:$0xff]  }
 0x3e2   :  { %v1075_v27 = vpack.c.bf16 %v1056_v25, %v1055_v23  ;;  %v1229_v43 = vpop.permute.xlu1 %1228  ;;  %v7518_v23 = vld [vmem:[#allocation19 + $0x34] ss:$12 sps:$4 sm:$0xff]   ;;  %v7516_v24 = vld [vmem:[#allocation19 + $0x30] ss:$12 sps:$4 sm:$0xff]   ;;  %v7519_v25 = vld [vmem:[#allocation19 + $0x38] ss:$12 sps:$4 sm:$0xff]  }
 0x3e3   :  { %6934 = vmatmul.mubr.msk.bf16.vlgmr.msra.gmra.mxu0 %vm1093_vm5, %v1080_v26  ;;  %v1224_v36 = vpop.permute.xlu0 %1223  ;;  %v1236_v52 = vmul.f32 %v1234_v35, %v1229_v43  ;;  %v7522_v26 = vld [vmem:[#allocation19 + $0x1c] ss:$12 sps:$4 sm:$0xff]  }
 0x3e4   :  { %6946 = vmatmul.mubr.msk.bf16.vlgmr.msra.gmra.mxu1 %vm1162_vm6, %v1075_v27  ;;  %6951 = vmatprep.mubr.msk.bf16.mxu0 %vm9300_vm0, %v9299_v1  ;;  %v1235_v44 = vmul.f32 %v1234_v35, %v1224_v36  ;;  %v7520_v27 = vld [vmem:[#allocation19 + $0x18] ss:$12 sps:$4 sm:$0xff]  }
 0x3e5   :  { %1691 = vmatprep.mubr.bf16.mxu1 %v9298_v0  ;;  %6950 = vmatpush3.bf16.msra.mxu0 %v7495_v55  ;;  %v6408_v55 = vld [vmem:[#allocation2] ss:$0 sm:$0xff] }
 0x3e6   :  { %6955 = vmatprep.subr.bf16.mxu0 %v9299_v1  ;;  %1660 = vmatpush1.bf16.msra.mxu1 %v7496_v59 }
 0x3e7   :  { %1661 = vmatprep.subr.bf16.mxu1 %v7502_v11 }
 0x3ea   :  { %1662 = vmatpush1.bf16.msra.mxu1 %v7500_v12 }
 0x3eb   :  { %6952 = vmatmul.mubr.msk.bf16.vlgmr.msra.gmra.mxu0 %vm1297_vm8, %v1283_v58  ;;  %1663 = vmatprep.subr.bf16.mxu1 %v7506_v14 }
 0x3ec   :  { %6956 = vmatpush3.bf16.msra.mxu0 %v1384_v61  ;;  %6957 = vmatprep.mubr.msk.bf16.mxu0 %vm9300_vm0, %v9299_v1  ;;  %v9864_v61 = vsub.s32 2, %v9810_v30 }
 0x3ed   :  { %6961 = vmatprep.subr.bf16.mxu0 %v9299_v1 }
 0x3ee   :  { %1664 = vmatpush1.bf16.msra.mxu1 %v7504_v15 }
 0x3ef   :  { %1665 = vmatprep.subr.bf16.mxu1 %v7510_v18 }
 0x3f2   :  { %1666 = vmatpush1.bf16.msra.mxu1 %v7508_v17 }
 0x3f3   :  { %6958 = vmatmul.mubr.msk.bf16.vlgmr.msra.gmra.mxu0 %vm1378_vm9, %v1370_v63  ;;  %1667 = vmatprep.subr.bf16.mxu1 %v7514_v20 }
 0x3f4   :  { %6962 = vmatpush3.bf16.msra.mxu0 %v7499_v2  ;;  %6977 = vmatprep.mubr.msk.bf16.mxu0 %vm9300_vm0, %v9299_v1 }
 0x3f5   :  { %6963 = vmatprep.subr.bf16.mxu0 %v9299_v1 }
 0x3f6   :  { %1668 = vmatpush1.bf16.msra.mxu1 %v7512_v21 }
 0x3f7   :  { %1669 = vmatprep.subr.bf16.mxu1 %v7518_v23 }
 0x3f8   :  { %6964 = vmatpush3.bf16.msra.mxu0 %v7503_v13 }
 0x3f9   :  { %6965 = vmatprep.subr.bf16.mxu0 %v9299_v1 }
 0x3fa   :  { %1670 = vmatpush1.bf16.msra.mxu1 %v7516_v24 }
 0x3fb   :  { %1671 = vmatprep.subr.bf16.mxu1 %v7522_v26 }
 0x3fc   :  { %6966 = vmatpush3.bf16.msra.mxu0 %v7507_v16 }
 0x3fd   :  { %6967 = vmatprep.subr.bf16.mxu0 %v9299_v1 }
 0x3fe   :  { %1672 = vmatpush1.bf16.msra.mxu1 %v7520_v27  ;;  %v9301_v27 = vmov 1966171168  }
 0x3ff   :  { %1673 = vmatprep.subr.bf16.mxu1 %v7526_v29  ;;  %v1455_v29 = vld [vmem:[%s10482_s13] sm:$0x3] }
 0x400   :  { %6968 = vmatpush3.bf16.msra.mxu0 %v7511_v19 }
 0x401   :  { %6969 = vmatprep.subr.bf16.mxu0 %v9299_v1 }
 0x402   :  { %1674 = vmatpush1.bf16.msra.mxu1 %v7524_v31  ;;  %v1456_v31 = vsub.f32 1.0, %v1455_v29 }
 0x403   :  { %6981 = vmatprep.subr.bf16.mxu1 %v9299_v1 }
 0x404   :  { %6970 = vmatpush3.bf16.msra.mxu0 %v7515_v22 }
 0x405   :  { %6971 = vmatprep.subr.bf16.mxu0 %v9299_v1 }
 0x408   :  { %6972 = vmatpush3.bf16.msra.mxu0 %v7519_v25 }
 0x409   :  { %6973 = vmatprep.subr.bf16.mxu0 %v9299_v1 }
 0x40c   :  { %6974 = vmatpush3.bf16.msra.mxu0 %v7523_v28  ;;  %v1460_v28 = vunpack.c.l.s4 %v9301_v27 }
 0x40d   :  { %6975 = vmatprep.subr.bf16.mxu0 %v9299_v1 }
 0x410   :  { %6976 = vmatpush3.bf16.msra.mxu0 %v7527_v34  ;;  %v1461_v34 = vunpack.c.0.s8 %v1460_v28 }
 0x411   :  { %6987 = vmatprep.subr.bf16.mxu0 %v9299_v1 }
 0x4a3   :  { %v1131_v38 = vpop.f32.mrf.mxu0 }
 0x4a4   :  { %v1200_v39 = vpop.f32.mrf.mxu1 }
 0x4a5   :  { %v1201_v40 = vadd.f32 %v1200_v39, %v1131_v38  ;;  %v6935_v41 = vpop.f32.mrf.mxu0 }
 0x4a6   :  { %v6947_v42 = vpop.f32.mrf.mxu1 }
 0x4a7   :  { %v1213_v45 = vadd.f32 %v1212_v37, %v1201_v40  ;;  %v1134_v46 = vpop.f32.mrf.mxu0 }
 0x4a8   :  { %v1203_v47 = vpop.f32.mrf.mxu1 }
 0x4a9   :  { %v1204_v48 = vadd.f32 %v1203_v47, %v1134_v46  ;;  %v1237_v49 = vadd.f32 %v1235_v44, %v1213_v45  ;;  %v6936_v50 = vpop.f32.mrf.mxu0 }
 0x4aa   :  { %v6948_v51 = vpop.f32.mrf.mxu1 }
 0x4ab   :  { %v1214_v53 = vadd.f32 %v1212_v37, %v1204_v48  ;;  %1241 = vadd.xlane.f32.xlu0 %v1237_v49  ;;  %v9847_v35 = vpop.f32.mrf.mxu0  ;;  %v6407_v51 = vld [vmem:[#allocation5] ss:$0 sm:$0xff] }
 0x4ad   :  { %v1238_v54 = vadd.f32 %v1236_v52, %v1214_v53  ;;  %v6953_v36 = vpop.f32.mrf.mxu0 }
 0x4ae   :  { %v1457_v36 = vmul.f32 -10000.0, %v1456_v31 }
 0x4af   :  { %1243 = vadd.xlane.f32.xlu1 %v1238_v54  ;;  %v1338_v37 = vpop.f32.mrf.mxu0 }
 0x4b0   :  { %v1464_v37 = vsub.s32 %v1461_v34, %v9810_v30 }
 0x4b1   :  { %v6954_v38 = vpop.f32.mrf.mxu0 }
 0x4b2   :  { %v1465_v38 = vrot.slane %v1457_v36, %v1464_v37 }
 0x4b3   :  { %v9849_v39 = vpop.f32.mrf.mxu0 }
 0x4b5   :  { %v6959_v40 = vpop.f32.mrf.mxu0 }
 0x4b6   :  { %v1473_v40 = vrot.slane %v1465_v38, %v1464_v37 }
 0x4b7   :  { %v1423_v41 = vpop.f32.mrf.mxu0 }
 0x4b8   :  { %v1466_v41 = vcombine.high %v1465_v38, %v1465_v38 }
 0x4b9   :  { %v6960_v42 = vpop.f32.mrf.mxu0 }
 0x4ba   :  { %v9895_v42 = vrot.slane %v1473_v40, %v9813_v32 }
 0x534   :  { %v1242_v3 = vpop.xlane.xlu0 %1241 }
 0x535   :  { %v1246_v4 = vmul.f32 0.0078125, %v1242_v3 }
 0x537   :  { %v9831_v5 = vsub.f32 %v1237_v49, %v1246_v4 }
 0x538   :  { %v1244_v6 = vpop.xlane.xlu1 %1243 }
 0x539   :  { %v1247_v7 = vmul.f32 0.0078125, %v1244_v6  ;;  %v1250_v8 = vmul.f32 %v9831_v5, %v9831_v5 }
 0x53b   :  { %v9835_v9 = vsub.f32 %v1238_v54, %v1247_v7  ;;  %1252 = vadd.xlane.f32.xlu0 %v1250_v8 }
 0x53d   :  { %v1251_v10 = vmul.f32 %v9835_v9, %v9835_v9 }
 0x53f   :  { %1254 = vadd.xlane.f32.xlu0 %v1251_v10 }
 0x5c4   :  { %v1253_v43 = vpop.xlane.xlu0 %1252 }
 0x5c5   :  { %v1256_v44 = vmul.f32 0.0078125, %v1253_v43  ;;  %v1480_v43 = vrot.slane %v1466_v41, %v1464_v37 }
 0x5c7   :  { %v1258_v45 = vadd.f32 1e-12, %v1256_v44 }
 0x5c8   :  { %v1255_v46 = vpop.xlane.xlu0 %1254 }
 0x5c9   :  { %7784 = vrsqrt.f32 %v1258_v45  ;;  %v1257_v47 = vmul.f32 0.0078125, %v1255_v46  ;;  %v9899_v46 = vrot.slane %v1480_v43, %v9813_v32 }
 0x5cb   :  { %v1259_v48 = vadd.f32 1e-12, %v1257_v47 }
 0x5cd   :  { %7786 = vrsqrt.f32 %v1259_v48 }
 0x5d6   :  { %v7785_v49 = vpop.eup %7784 }
 0x5d7   :  { %v1262_v50 = vmul.f32 %v7785_v49, %v9831_v5  ;;  %v1527_v5 = vrot.slane %v1514_v60, %v9864_v61 }
 0x5d9   :  { %v1270_v54 = vmul.f32 %v6407_v51, %v1262_v50 }
 0x5da   :  { %v7787_v52 = vpop.eup %7786 }
 0x5db   :  { %v1263_v53 = vmul.f32 %v7787_v52, %v9835_v9  ;;  %v9853_v57 = vadd.f32 %v6408_v55, %v1270_v54  ;;  %v1519_v9 = vrot.slane %v1514_v60, %v9813_v32 }
 0x5dd   :  { %v1271_v56 = vmul.f32 %v6407_v51, %v1263_v53 }
 0x5df   :  { %v9855_v58 = vadd.f32 %v6408_v55, %v1271_v56 }
 0x5e1   :  { %v1513_v59 = vpack.c.bf16 %v9855_v58, %v9853_v57 }
 0x5e3   :  { %1692 = vmatmul.mubr.bf16.vlgmr.msra.gmra.mxu1 %v1513_v59  ;;  %6978 = vmatmul.mubr.bf16.vlgmr.msra.gmra.mxu0 %v1513_v59 }
 0x5e4   :  { %6983 = vmatprep.mubr.msk.bf16.mxu1 %vm9300_vm0, %v9299_v1  ;;  %6989 = vmatprep.mubr.msk.bf16.mxu0 %vm9300_vm0, %v9299_v1 }
 0x6a3   :  { %v1693_v63 = vpop.f32.mrf.mxu1  ;;  %v1736_v2 = vpop.f32.mrf.mxu0 }
 0x6a4   :  { %v1737_v13 = vadd.f32 %v1736_v2, %v1527_v5  ;;  %v1694_v16 = vadd.f32 %v1693_v63, %v1519_v9 }
 0x6a5   :  { %v1695_v3 = vpop.f32.mrf.mxu1  ;;  %v6979_v4 = vpop.f32.mrf.mxu0 }
 0x6a6   :  { %v1696_v6 = vadd.f32 %v1695_v3, %v1523_v62  ;;  %v9873_v18 = vpack.c.bf16 %v1737_v13, %v1737_v13  ;;  %v1762_v21 = vpack.c.bf16 %v1694_v16, %v1694_v16 }
 0x6a7   :  { %v1697_v7 = vpop.f32.mrf.mxu1  ;;  %v1739_v8 = vpop.f32.mrf.mxu0 }
 0x6a8   :  { %v1764_v10 = vpack.c.bf16 %v1696_v6, %v1696_v6  ;;  %v1740_v19 = vadd.f32 %v1739_v8, %v1527_v5  ;;  %v1698_v22 = vadd.f32 %v1697_v7, %v1519_v9  ;;  %v1900_v23 = vsel %vm1898_vm10, %v9873_v18, 0 }
 0x6a9   :  { %v1699_v11 = vpop.f32.mrf.mxu1  ;;  %v6980_v12 = vpop.f32.mrf.mxu0 }
 0x6aa   :  { %v1780_v14 = vsel %vm1162_vm6, %v1764_v10, 0  ;;  %v1700_v15 = vadd.f32 %v1699_v11, %v1523_v62  ;;  %v9880_v24 = vpack.c.bf16 %v1740_v19, %v1740_v19  ;;  %v1763_v25 = vpack.c.bf16 %v1698_v22, %v1698_v22 }
 0x6ab   :  { %6982 = vmatpush3.bf16.xpose.msra.mxu1 %v1780_v14 }
 0x6ac   :  { %v9870_v17 = vpack.c.bf16 %v1700_v15, %v1700_v15  ;;  %6993 = vmatprep.subr.bf16.mxu1 %v9299_v1  ;;  %v1946_v26 = vsel %vm1898_vm10, %v9880_v24, 0 }
 0x6ae   :  { %v1826_v20 = vsel %vm1162_vm6, %v9870_v17, 0 }
 0x6af   :  { %6988 = vmatpush3.bf16.xpose.msra.mxu0 %v1826_v20 }
 0x6b0   :  { %6999 = vmatprep.subr.bf16.mxu0 %v9299_v1 }
 0x6b2   :  { %6984 = vmatmul.mubr.msk.bf16.vlgmr.msra.gmra.mxu1 %vm1162_vm6, %v1762_v21 }
 0x6b3   :  { %6994 = vmatpush3.bf16.msra.mxu1 %v1900_v23  ;;  %6995 = vmatprep.mubr.msk.bf16.mxu1 %vm9300_vm0, %v9299_v1 }
 0x6b4   :  { %7005 = vmatprep.subr.bf16.mxu1 %v9299_v1 }
 0x6b6   :  { %6990 = vmatmul.mubr.msk.bf16.vlgmr.msra.gmra.mxu0 %vm1162_vm6, %v1763_v25 }
 0x6b7   :  { %7000 = vmatpush3.bf16.msra.mxu0 %v1946_v26  ;;  %7001 = vmatprep.mubr.msk.bf16.mxu0 %vm9300_vm0, %v9299_v1 }
 0x6b8   :  { %7011 = vmatprep.subr.bf16.mxu0 %v9299_v1 }
 0x772   :  { %v1816_v44 = vpop.f32.mrf.mxu1 }
 0x773   :  { %v1817_v45 = vadd.f32 %v1816_v44, %v9895_v42 }
 0x774   :  { %v6985_v47 = vpop.f32.mrf.mxu1 }
 0x775   :  { %v1869_v48 = vsel %vm1868_vm11, %v1817_v45, -inf }
 0x776   :  { %v1862_v49 = vpop.f32.mrf.mxu0  ;;  %1870 = vmax.xlane.f32.xlu1 %v1869_v48  ;;  %v1819_v30 = vpop.f32.mrf.mxu1 }
 0x777   :  { %v1863_v50 = vadd.f32 %v1862_v49, %v9899_v46 }
 0x778   :  { %v6986_v51 = vpop.f32.mrf.mxu1  ;;  %v6991_v52 = vpop.f32.mrf.mxu0 }
 0x779   :  { %v1872_v53 = vsel %vm1868_vm11, %v1863_v50, -inf }
 0x77a   :  { %1873 = vmax.xlane.f32.xlu0 %v1872_v53  ;;  %v1865_v54 = vpop.f32.mrf.mxu0 }
 0x77c   :  { %v6992_v55 = vpop.f32.mrf.mxu0 }
 0x787   :  { %1992 = vrot.lane.b32.xlu1 %v1764_v10, %s9239_s24 }
 0x7ff   :  { %v1871_v56 = vpop.xlane.xlu1 %1870 }
 0x800   :  { %v1875_v59 = vsub.f32 %v1817_v45, %v1871_v56 }
 0x802   :  { %v1877_v60 = vmul.f32 1.442695, %v1875_v59 }
 0x803   :  { %v1874_v62 = vpop.xlane.xlu0 %1873  ;;  %v1993_v7 = vpop.permute.xlu1 %1992 }
 0x804   :  { %7788 = vpow2.f32 %v1877_v60  ;;  %v1876_v63 = vsub.f32 %v1863_v50, %v1874_v62  ;;  %v1998_v14 = vsel %vm1162_vm6, %v1993_v7, 0 }
 0x806   :  { %v1879_v2 = vmul.f32 1.442695, %v1876_v63 }
 0x808   :  { %7790 = vpow2.f32 %v1879_v2 }
 0x811   :  { %v7789_v3 = vpop.eup %7788 }
 0x812   :  { %v1881_v4 = vsel %vm1868_vm11, %v7789_v3, 0.0 }
 0x813   :  { %1882 = vadd.xlane.f32.xlu1 %v1881_v4 }
 0x815   :  { %v7791_v5 = vpop.eup %7790 }
 0x816   :  { %v1884_v6 = vsel %vm1868_vm11, %v7791_v5, 0.0 }
 0x817   :  { %1885 = vadd.xlane.f32.xlu0 %v1884_v6 }
 0x824   :  { %1989 = vrot.lane.b32.xlu1 %v1762_v21, %s9239_s24 }
 0x828   :  { %2041 = vrot.lane.b32.xlu1 %v1763_v25, %s9239_s24 }
 0x82d   :  { %2044 = vrot.lane.b32.xlu0 %v9870_v17, %s9239_s24 }
 0x89c   :  { %v1883_v8 = vpop.xlane.xlu1 %1882 }
 0x89d   :  { %7792 = vrcp.f32 %v1883_v8 }
 0x8a0   :  { %v1886_v9 = vpop.xlane.xlu0 %1885  ;;  %v1990_v20 = vpop.permute.xlu1 %1989 }
 0x8a1   :  { %7794 = vrcp.f32 %v1886_v9 }
 0x8a4   :  { %v2045_v16 = vpop.permute.xlu0 %2044  ;;  %v2042_v21 = vpop.permute.xlu1 %2041 }
 0x8a5   :  { %v2050_v19 = vsel %vm1162_vm6, %v2045_v16, 0  ;;  %v7534_v16 = vld [vmem:[#allocation17 + $0x8] sm:$0xff]  }
 0x8aa   :  { %v7793_v10 = vpop.eup %7792 }
 0x8ab   :  { %v1889_v11 = vmul.f32 %v7793_v10, %v7789_v3 }
 0x8ad   :  { %v1891_v12 = vpack.c.bf16 %v1889_v11, %v1889_v11  ;;  %v7529_v11 = vld [vmem:[#allocation17 + $0x30] sm:$0xff]  }
 0x8ae   :  { %v7795_v13 = vpop.eup %7794 }
 0x8af   :  { %6996 = vmatmul.mubr.msk.bf16.vlgmr.msra.gmra.mxu1 %vm1868_vm11, %v1891_v12  ;;  %v1890_v15 = vmul.f32 %v7795_v13, %v7791_v5  ;;  %v7530_v12 = vld [vmem:[#allocation17 + $0x28] sm:$0xff]   ;;  %v7531_v13 = vld [vmem:[#allocation17 + $0x20] sm:$0xff]  }
 0x8b0   :  { %7006 = vmatpush3.bf16.xpose.msra.mxu1 %v1998_v14  ;;  %7007 = vmatprep.mubr.msk.bf16.mxu1 %vm9300_vm0, %v9299_v1  ;;  %v7532_v14 = vld [vmem:[#allocation17 + $0x18] sm:$0xff]  }
 0x8b1   :  { %v1892_v17 = vpack.c.bf16 %v1890_v15, %v1890_v15  ;;  %7017 = vmatprep.subr.bf16.mxu1 %v9299_v1  ;;  %v7533_v15 = vld [vmem:[#allocation17 + $0x10] sm:$0xff]  }
 0x8b3   :  { %7002 = vmatmul.mubr.msk.bf16.vlgmr.msra.gmra.mxu0 %vm1868_vm11, %v1892_v17  ;;  %v7535_v17 = vld [vmem:[#allocation17] sm:$0xff]  }
 0x8b4   :  { %7012 = vmatpush3.bf16.xpose.msra.mxu0 %v2050_v19  ;;  %7013 = vmatprep.mubr.msk.bf16.mxu0 %vm9300_vm0, %v9299_v1 }
 0x8b5   :  { %7023 = vmatprep.subr.bf16.mxu0 %v9299_v1 }
 0x8b7   :  { %7008 = vmatmul.mubr.msk.bf16.vlgmr.msra.gmra.mxu1 %vm1162_vm6, %v1990_v20 }
 0x8b8   :  { %7019 = vmatprep.mubr.msk.bf16.mxu1 %vm9300_vm0, %v9299_v1 }
 0x8bb   :  { %7014 = vmatmul.mubr.msk.bf16.vlgmr.msra.gmra.mxu0 %vm1162_vm6, %v2042_v21 }
 0x8bc   :  { %7025 = vmatprep.mubr.msk.bf16.mxu0 %vm9300_vm0, %v9299_v1 }
 0x96f   :  { %v9927_v22 = vpop.f32.mrf.mxu1 }
 0x971   :  { %v6997_v23 = vpop.f32.mrf.mxu1 }
 0x973   :  { %v1939_v25 = vpop.f32.mrf.mxu1  ;;  %v9929_v26 = vpop.f32.mrf.mxu0 }
 0x975   :  { %v6998_v27 = vpop.f32.mrf.mxu1  ;;  %v7003_v28 = vpop.f32.mrf.mxu0 }
 0x977   :  { %v1985_v29 = vpop.f32.mrf.mxu0  ;;  %v2034_v31 = vpop.f32.mrf.mxu1 }
 0x978   :  { %v2035_v34 = vadd.f32 %v2034_v31, %v9895_v42 }
 0x979   :  { %v7004_v36 = vpop.f32.mrf.mxu0  ;;  %v7009_v37 = vpop.f32.mrf.mxu1 }
 0x97a   :  { %v2092_v38 = vsel %vm1868_vm11, %v2035_v34, -inf }
 0x97b   :  { %v2086_v40 = vpop.f32.mrf.mxu0  ;;  %2093 = vmax.xlane.f32.xlu0 %v2092_v38  ;;  %v2037_v41 = vpop.f32.mrf.mxu1 }
 0x97c   :  { %v2087_v43 = vadd.f32 %v2086_v40, %v9899_v46 }
 0x97d   :  { %v7010_v44 = vpop.f32.mrf.mxu1  ;;  %v7015_v45 = vpop.f32.mrf.mxu0 }
 0x97e   :  { %v2095_v47 = vsel %vm1868_vm11, %v2087_v43, -inf }
 0x97f   :  { %2096 = vmax.xlane.f32.xlu1 %v2095_v47  ;;  %v2089_v48 = vpop.f32.mrf.mxu0 }
 0x981   :  { %v7016_v49 = vpop.f32.mrf.mxu0 }
 0x982   :  { %v6414_v49 = vld [vmem:[#allocation50] ss:$0 sm:$0xff] }
 0x990   :  { %2117 = vrot.lane.b32.xlu1 %v9873_v18, %s9239_s24 }
 0xa04   :  { %v2094_v30 = vpop.xlane.xlu0 %2093 }
 0xa05   :  { %v2098_v50 = vsub.f32 %v2035_v34, %v2094_v30 }
 0xa07   :  { %v2100_v51 = vmul.f32 1.442695, %v2098_v50 }
 0xa08   :  { %v2097_v52 = vpop.xlane.xlu1 %2096 }
 0xa09   :  { %7796 = vpow2.f32 %v2100_v51  ;;  %v2099_v53 = vsub.f32 %v2087_v43, %v2097_v52  ;;  %v6450_v43 = vld [vmem:[#allocation11] ss:$0 sm:$0xff]  ;;  %v1421_v52 = vadd.f32 %v6414_v49, %v9849_v39 }
 0xa0b   :  { %v2102_v54 = vmul.f32 1.442695, %v2099_v53  ;;  %v6409_v53 = vld [vmem:[#allocation52] ss:$0 sm:$0xff] }
 0xa0c   :  { %v2118_v55 = vpop.permute.xlu1 %2117 }
 0xa0d   :  { %7798 = vpow2.f32 %v2102_v54  ;;  %v2123_v56 = vsel %vm1898_vm10, %v2118_v55, 0  ;;  %v7536_v54 = vld [vmem:[#allocation26 + $0x70] ss:$8 sps:$4 sm:$0xff]   ;;  %v7538_v55 = vld [vmem:[#allocation26 + $0x74] ss:$8 sps:$4 sm:$0xff]  }
 0xa0e   :  { %7018 = vmatpush3.bf16.msra.mxu1 %v2123_v56 }
 0xa0f   :  { %7029 = vmatprep.subr.bf16.mxu1 %v9299_v1 }
 0xa16   :  { %v7797_v59 = vpop.eup %7796 }
 0xa17   :  { %v2104_v60 = vsel %vm1868_vm11, %v7797_v59, 0.0 }
 0xa18   :  { %2105 = vadd.xlane.f32.xlu0 %v2104_v60 }
 0xa1a   :  { %v7799_v62 = vpop.eup %7798 }
 0xa1b   :  { %v2107_v18 = vsel %vm1868_vm11, %v7799_v62, 0.0 }
 0xa1c   :  { %2108 = vadd.xlane.f32.xlu0 %v2107_v18 }
 0xa32   :  { %2166 = vrot.lane.b32.xlu0 %v9880_v24, %s9239_s24  ;;  %v7528_v24 = vld [vmem:[#allocation17 + $0x38] sm:$0xff]  }
 0xaa1   :  { %v2106_v63 = vpop.xlane.xlu0 %2105 }
 0xaa2   :  { %7800 = vrcp.f32 %v2106_v63 }
 0xaa5   :  { %v2109_v2 = vpop.xlane.xlu0 %2108 }
 0xaa6   :  { %7802 = vrcp.f32 %v2109_v2 }
 0xaa9   :  { %v2167_v3 = vpop.permute.xlu0 %2166 }
 0xaaa   :  { %v2172_v4 = vsel %vm1898_vm10, %v2167_v3, 0 }
 0xaab   :  { %7024 = vmatpush3.bf16.msra.mxu0 %v2172_v4 }
 0xaac   :  { %2469 = vmatprep.subr.bf16.mxu0 %v7538_v55  ;;  %v7563_v55 = vld [vmem:[#allocation40 + $0x90] ss:$12 sps:$4 sm:$0xff]  }
 0xaaf   :  { %v7801_v5 = vpop.eup %7800 }
 0xab0   :  { %v2112_v6 = vmul.f32 %v7801_v5, %v7797_v59 }
 0xab2   :  { %v2114_v7 = vpack.c.bf16 %v2112_v6, %v2112_v6 }
 0xab3   :  { %v7803_v8 = vpop.eup %7802 }
 0xab4   :  { %7020 = vmatmul.mubr.msk.bf16.vlgmr.msra.gmra.mxu1 %vm1868_vm11, %v2114_v7  ;;  %v2113_v9 = vmul.f32 %v7803_v8, %v7799_v62  ;;  %v7541_v8 = vld [vmem:[#allocation26 + $0x64] ss:$8 sps:$4 sm:$0xff]  }
 0xab5   :  { %7045 = vmatprep.mubr.msk.bf16.mxu1 %vm9300_vm0, %v9299_v1  ;;  %7030 = vmatpush3.bf16.msra.mxu1 %v7528_v24  ;;  %v7542_v24 = vld [vmem:[#allocation26 + $0x50] ss:$8 sps:$4 sm:$0xff]  }
 0xab6   :  { %v2115_v10 = vpack.c.bf16 %v2113_v9, %v2113_v9  ;;  %7031 = vmatprep.subr.bf16.mxu1 %v9299_v1  ;;  %v7539_v9 = vld [vmem:[#allocation26 + $0x60] ss:$8 sps:$4 sm:$0xff]  }
 0xab8   :  { %7026 = vmatmul.mubr.msk.bf16.vlgmr.msra.gmra.mxu0 %vm1868_vm11, %v2115_v10  ;;  %v7544_v10 = vld [vmem:[#allocation26 + $0x54] ss:$8 sps:$4 sm:$0xff]  }
 0xab9   :  { %2501 = vmatprep.mubr.bf16.mxu0 %v9298_v0  ;;  %7032 = vmatpush3.bf16.msra.mxu1 %v7529_v11  ;;  %v7547_v11 = vld [vmem:[#allocation26 + $0x44] ss:$8 sps:$4 sm:$0xff]  }
 0xaba   :  { %7033 = vmatprep.subr.bf16.mxu1 %v9299_v1  ;;  %2470 = vmatpush1.bf16.msra.mxu0 %v7536_v54  ;;  %v7565_v54 = vld [vmem:[#allocation40 + $0x94] ss:$12 sps:$4 sm:$0xff]  }
 0xabb   :  { %2471 = vmatprep.subr.bf16.mxu0 %v7541_v8 }
 0xabd   :  { %7034 = vmatpush3.bf16.msra.mxu1 %v7530_v12  ;;  %v7545_v12 = vld [vmem:[#allocation26 + $0x40] ss:$8 sps:$4 sm:$0xff]  }
 0xabe   :  { %7035 = vmatprep.subr.bf16.mxu1 %v9299_v1  ;;  %2472 = vmatpush1.bf16.msra.mxu0 %v7539_v9  ;;  %v6413_v9 = vld [vmem:[#allocation55] ss:$0 sm:$0xff] }
 0xabf   :  { %2473 = vmatprep.subr.bf16.mxu0 %v7544_v10  ;;  %v6417_v10 = vld [vmem:[#allocation53] ss:$0 sm:$0xff] }
 0xac1   :  { %7036 = vmatpush3.bf16.msra.mxu1 %v7531_v13  ;;  %v7550_v13 = vld [vmem:[#allocation26 + $0x34] ss:$8 sps:$4 sm:$0xff]  }
 0xac2   :  { %7037 = vmatprep.subr.bf16.mxu1 %v9299_v1  ;;  %2474 = vmatpush1.bf16.msra.mxu0 %v7542_v24  ;;  %v7575_v24 = vld [vmem:[#allocation40 + $0x30] ss:$12 sps:$4 sm:$0xff]  }
 0xac3   :  { %2475 = vmatprep.subr.bf16.mxu0 %v7547_v11  ;;  %v7580_v11 = vld [vmem:[#allocation40 + $0x1c] ss:$12 sps:$4 sm:$0xff]  }
 0xac5   :  { %7038 = vmatpush3.bf16.msra.mxu1 %v7532_v14  ;;  %v7548_v14 = vld [vmem:[#allocation26 + $0x30] ss:$8 sps:$4 sm:$0xff]  }
 0xac6   :  { %7039 = vmatprep.subr.bf16.mxu1 %v9299_v1  ;;  %2476 = vmatpush1.bf16.msra.mxu0 %v7545_v12 }
 0xac7   :  { %2477 = vmatprep.subr.bf16.mxu0 %v7550_v13  ;;  %v7583_v13 = vld [vmem:[#allocation40 + $0x4] ss:$12 sps:$4 sm:$0xff]  }
 0xac9   :  { %7040 = vmatpush3.bf16.msra.mxu1 %v7533_v15  ;;  %v7553_v15 = vld [vmem:[#allocation26 + $0x24] ss:$8 sps:$4 sm:$0xff]  }
 0xaca   :  { %7041 = vmatprep.subr.bf16.mxu1 %v9299_v1  ;;  %2478 = vmatpush1.bf16.msra.mxu0 %v7548_v14 }
 0xacb   :  { %2479 = vmatprep.subr.bf16.mxu0 %v7553_v15  ;;  %v7581_v15 = vld [vmem:[#allocation40] ss:$12 sps:$4 sm:$0xff]  }
 0xacd   :  { %7042 = vmatpush3.bf16.msra.mxu1 %v7534_v16  ;;  %v7551_v16 = vld [vmem:[#allocation26 + $0x20] ss:$8 sps:$4 sm:$0xff]  }
 0xace   :  { %7043 = vmatprep.subr.bf16.mxu1 %v9299_v1  ;;  %2480 = vmatpush1.bf16.msra.mxu0 %v7551_v16 }
 0xad1   :  { %7044 = vmatpush3.bf16.msra.mxu1 %v7535_v17  ;;  %v7556_v17 = vld [vmem:[#allocation26 + $0x14] ss:$8 sps:$4 sm:$0xff]  }
 0xad2   :  { %2481 = vmatprep.subr.bf16.mxu0 %v7556_v17 }
 0xb74   :  { %v2159_v19 = vpop.f32.mrf.mxu1 }
 0xb76   :  { %v7021_v20 = vpop.f32.mrf.mxu1 }
 0xb77   :  { %v7559_v20 = vld [vmem:[#allocation26 + $0x4] ss:$8 sps:$4 sm:$0xff]  }
 0xb78   :  { %v2162_v21 = vpop.f32.mrf.mxu1  ;;  %v2208_v23 = vpop.f32.mrf.mxu0 }
 0xb79   :  { %v7474_v25 = vpack.i.bf16 %v2208_v23, %v2159_v19  ;;  %v7554_v19 = vld [vmem:[#allocation26 + $0x10] ss:$8 sps:$4 sm:$0xff]   ;;  %v7557_v21 = vld [vmem:[#allocation26] ss:$8 sps:$4 sm:$0xff]  }
 0xb7a   :  { %v7022_v27 = vpop.f32.mrf.mxu1  ;;  %v7027_v28 = vpop.f32.mrf.mxu0  ;;  %2482 = vmatpush1.bf16.msra.mxu0 %v7554_v19  ;;  %v7562_v23 = vld [vmem:[#allocation40 + $0xac] ss:$12 sps:$4 sm:$0xff]  }
 0xb7b   :  { %7475 = vrot.lane.b32.xlu1 %v7474_v25, %s9239_s24  ;;  %2483 = vmatprep.subr.bf16.mxu0 %v7559_v20  ;;  %v7584_v19 = vld [vmem:[#allocation28 + $0x78] sm:$0xff]  }
 0xb7c   :  { %v2211_v29 = vpop.f32.mrf.mxu0  ;;  %v7585_v20 = vld [vmem:[#allocation28 + $0x38] sm:$0xff]   ;;  %6751 = vmatprep.subr.bf16.mxu1 %v7584_v19 }
 0xb7e   :  { %v7028_v31 = vpop.f32.mrf.mxu0  ;;  %2484 = vmatpush1.bf16.msra.mxu0 %v7557_v21  ;;  %v7586_v21 = vld [vmem:[#allocation28 + $0x70] sm:$0xff]  }
 0xb7f   :  { %2946 = vmatprep.subr.bf16.mxu0 %v7562_v23  ;;  %v7587_v23 = vld [vmem:[#allocation28 + $0x30] sm:$0xff]  }
 0xbed   :  { %v7476_v34 = vpop.permute.xlu1 %7475 }
 0xbee   :  { %v7478_v36 = vunpack.i.h.bf16 %v7476_v34  ;;  %v7477_v37 = vunpack.i.l.bf16 %v7476_v34 }
 0xbf0   :  { %v2223_v38 = vsel %vm1162_vm6, %v9929_v26, %v7478_v36  ;;  %v2222_v40 = vsel %vm1162_vm6, %v9927_v22, %v7477_v37  ;;  %v1336_v22 = vadd.f32 %v6409_v53, %v9847_v35  ;;  %v7560_v53 = vld [vmem:[#allocation40 + $0xa8] ss:$12 sps:$4 sm:$0xff]  }
 0xbf1   :  { %v2224_v41 = vpack.c.bf16 %v2223_v38, %v2222_v40 }
 0xbf3   :  { %7046 = vmatmul.mubr.bf16.vlgmr.msra.gmra.mxu1 %v2224_v41 }
 0xbf4   :  { %6752 = vmatpush3.bf16.msra.mxu1 %v7585_v20 }
 0xbf5   :  { %6753 = vmatprep.subr.bf16.mxu1 %v7586_v21 }
 0xbf8   :  { %6754 = vmatpush3.bf16.msra.mxu1 %v7587_v23 }
 0xcb3   :  { %v2313_v44 = vpop.f32.mrf.mxu1 }
 0xcb4   :  { %v2314_v45 = vadd.f32 %v6450_v43, %v2313_v44 }
 0xcb5   :  { %v7047_v47 = vpop.f32.mrf.mxu1 }
 0xcb6   :  { %v2320_v48 = vadd.f32 %v2314_v45, %v9853_v57  ;;  %v6459_v45 = vld [vmem:[#allocation16] ss:$0 sm:$0xff] }
 0xcb7   :  { %v2316_v30 = vpop.f32.mrf.mxu1 }
 0xcb8   :  { %v2317_v50 = vadd.f32 %v6450_v43, %v2316_v30  ;;  %2322 = vadd.xlane.f32.xlu1 %v2320_v48 }
 0xcb9   :  { %v7048_v51 = vpop.f32.mrf.mxu1 }
 0xcba   :  { %v2321_v26 = vadd.f32 %v2317_v50, %v9855_v58  ;;  %v6460_v50 = vld [vmem:[#allocation14] ss:$0 sm:$0xff] }
 0xcbc   :  { %1428 = vadd.xlane.f32.xlu1 %v1421_v52  ;;  %2324 = vadd.xlane.f32.xlu0 %v2321_v26 }
 0xcc0   :  { %1343 = vadd.xlane.f32.xlu0 %v1336_v22 }
 0xd41   :  { %v2323_v57 = vpop.xlane.xlu1 %2322 }
 0xd42   :  { %v2326_v56 = vmul.f32 0.0078125, %v2323_v57  ;;  %v7568_v57 = vld [vmem:[#allocation40 + $0x7c] ss:$12 sps:$4 sm:$0xff]  }
 0xd44   :  { %v2328_v59 = vsub.f32 %v2320_v48, %v2326_v56  ;;  %v7566_v56 = vld [vmem:[#allocation40 + $0x78] ss:$12 sps:$4 sm:$0xff]  }
 0xd45   :  { %v1429_v60 = vpop.xlane.xlu1 %1428  ;;  %v2325_v62 = vpop.xlane.xlu0 %2324 }
 0xd46   :  { %v1430_v18 = vmul.f32 0.0078125, %v1429_v60  ;;  %v2327_v63 = vmul.f32 0.0078125, %v2325_v62  ;;  %v2330_v39 = vmul.f32 %v2328_v59, %v2328_v59  ;;  %v7571_v60 = vld [vmem:[#allocation40 + $0x64] ss:$12 sps:$4 sm:$0xff]  }
 0xd48   :  { %v2329_v2 = vsub.f32 %v2321_v26, %v2327_v63  ;;  %2332 = vadd.xlane.f32.xlu0 %v2330_v39  ;;  %v9965_v3 = vsub.f32 %v1421_v52, %v1430_v18  ;;  %v7569_v18 = vld [vmem:[#allocation40 + $0x60] ss:$12 sps:$4 sm:$0xff]  }
 0xd49   :  { %v1344_v58 = vpop.xlane.xlu0 %1343 }
 0xd4a   :  { %v1345_v4 = vmul.f32 0.0078125, %v1344_v58  ;;  %v2331_v35 = vmul.f32 %v2329_v2, %v2329_v2  ;;  %v1432_v6 = vmul.f32 %v9965_v3, %v9965_v3  ;;  %v6412_v58 = vld [vmem:[#allocation58] ss:$0 sm:$0xff] }
 0xd4c   :  { %v9967_v5 = vsub.f32 %v1336_v22, %v1345_v4  ;;  %2334 = vadd.xlane.f32.xlu1 %v2331_v35  ;;  %v6416_v4 = vld [vmem:[#allocation56] ss:$0 sm:$0xff]  ;;  %v7572_v35 = vld [vmem:[#allocation40 + $0x48] ss:$12 sps:$4 sm:$0xff]  }
 0xd4e   :  { %v1347_v7 = vmul.f32 %v9967_v5, %v9967_v5 }
 0xd50   :  { %1433 = vadd.xlane.f32.xlu1 %v1432_v6  ;;  %1348 = vadd.xlane.f32.xlu0 %v1347_v7  ;;  %v7577_v6 = vld [vmem:[#allocation40 + $0x34] ss:$12 sps:$4 sm:$0xff]  }
 0xdd1   :  { %v2333_v25 = vpop.xlane.xlu0 %2332 }
 0xdd2   :  { %v2336_v27 = vmul.f32 0.0078125, %v2333_v25  ;;  %v7588_v25 = vld [vmem:[#allocation28 + $0x68] sm:$0xff]  }
 0xdd3   :  { %6755 = vmatprep.subr.bf16.mxu1 %v7588_v25 }
 0xdd4   :  { %v2338_v28 = vadd.f32 1e-12, %v2336_v27  ;;  %v7589_v27 = vld [vmem:[#allocation28 + $0x28] sm:$0xff]  }
 0xdd5   :  { %v2335_v29 = vpop.xlane.xlu1 %2334  ;;  %6756 = vmatpush3.bf16.msra.mxu1 %v7589_v27 }
 0xdd6   :  { %7804 = vrsqrt.f32 %v2338_v28  ;;  %v2337_v31 = vmul.f32 0.0078125, %v2335_v29  ;;  %v7590_v28 = vld [vmem:[#allocation28 + $0x60] sm:$0xff]  }
 0xdd7   :  { %v7591_v29 = vld [vmem:[#allocation28 + $0x20] sm:$0xff]   ;;  %6757 = vmatprep.subr.bf16.mxu1 %v7590_v28 }
 0xdd8   :  { %v2339_v34 = vadd.f32 1e-12, %v2337_v31  ;;  %v7592_v31 = vld [vmem:[#allocation28 + $0x58] sm:$0xff]  }
 0xdd9   :  { %v1434_v36 = vpop.xlane.xlu1 %1433  ;;  %v1349_v37 = vpop.xlane.xlu0 %1348  ;;  %6758 = vmatpush3.bf16.msra.mxu1 %v7591_v29 }
 0xdda   :  { %7806 = vrsqrt.f32 %v2339_v34  ;;  %v1435_v38 = vmul.f32 0.0078125, %v1434_v36  ;;  %v1350_v40 = vmul.f32 0.0078125, %v1349_v37  ;;  %v7593_v34 = vld [vmem:[#allocation28 + $0x18] sm:$0xff]   ;;  %6759 = vmatprep.subr.bf16.mxu1 %v7592_v31  ;;  %v7594_v36 = vld [vmem:[#allocation28 + $0x50] sm:$0xff]  }
 0xddb   :  { %v7595_v37 = vld [vmem:[#allocation28 + $0x10] sm:$0xff]  }
 0xddc   :  { %v1436_v44 = vadd.f32 1e-12, %v1435_v38  ;;  %v1351_v47 = vadd.f32 1e-12, %v1350_v40  ;;  %v7596_v38 = vld [vmem:[#allocation28 + $0x48] sm:$0xff]  }
 0xddd   :  { %6760 = vmatpush3.bf16.msra.mxu1 %v7593_v34  ;;  %v7597_v40 = vld [vmem:[#allocation28 + $0x8] sm:$0xff]  }
 0xdde   :  { %7808 = vrsqrt.f32 %v1436_v44  ;;  %6761 = vmatprep.subr.bf16.mxu1 %v7594_v36  ;;  %v2377_v44 = vld [vmem:[#allocation20] sm:$0x3] }
 0xddf   :  { %7810 = vrsqrt.f32 %v1351_v47  ;;  %v2386_v47 = vrot.slane %v2377_v44, %v9816_v33 }
 0xde1   :  { %6762 = vmatpush3.bf16.msra.mxu1 %v7595_v37 }
 0xde2   :  { %6763 = vmatprep.subr.bf16.mxu1 %v7596_v38 }
 0xde3   :  { %v7805_v41 = vpop.eup %7804 }
 0xde4   :  { %v2342_v43 = vmul.f32 %v7805_v41, %v2328_v59  ;;  %v7598_v41 = vld [vmem:[#allocation28 + $0x40] sm:$0xff]  }
 0xde5   :  { %6764 = vmatpush3.bf16.msra.mxu1 %v7597_v40 }
 0xde6   :  { %v2350_v30 = vmul.f32 %v6459_v45, %v2342_v43  ;;  %v7599_v43 = vld [vmem:[#allocation28] sm:$0xff]   ;;  %6765 = vmatprep.subr.bf16.mxu1 %v7598_v41 }
 0xde7   :  { %v7807_v48 = vpop.eup %7806 }
 0xde8   :  { %v2343_v49 = vmul.f32 %v7807_v48, %v2329_v2  ;;  %v9973_v52 = vadd.f32 %v6460_v50, %v2350_v30  ;;  %v7574_v2 = vld [vmem:[#allocation40 + $0x4c] ss:$12 sps:$4 sm:$0xff]  }
 0xde9   :  { %6766 = vmatpush3.bf16.msra.mxu1 %v7599_v43 }
 0xdea   :  { %v2351_v51 = vmul.f32 %v6459_v45, %v2343_v49  ;;  %7049 = vmatprep.subr.bf16.mxu1 %v9299_v1  ;;  %v2382_v45 = vrot.slane %v2377_v44, %v9813_v32 }
 0xdeb   :  { %v7809_v59 = vpop.eup %7808 }
 0xdec   :  { %v9975_v26 = vadd.f32 %v6460_v50, %v2351_v51  ;;  %v7811_v62 = vpop.eup %7810  ;;  %v1438_v63 = vmul.f32 %v7809_v59, %v9965_v3 }
 0xded   :  { %v1353_v39 = vmul.f32 %v7811_v62, %v9967_v5  ;;  %v7578_v5 = vld [vmem:[#allocation40 + $0x18] ss:$12 sps:$4 sm:$0xff]  }
 0xdee   :  { %v2376_v22 = vpack.c.bf16 %v9975_v26, %v9973_v52  ;;  %v1445_v8 = vmul.f32 %v6416_v4, %v1438_v63 }
 0xdef   :  { %v1360_v7 = vmul.f32 %v6412_v58, %v1353_v39 }
 0xdf0   :  { %2502 = vmatmul.mubr.bf16.vlgmr.msra.gmra.mxu0 %v2376_v22  ;;  %v1452_v3 = vadd.f32 %v6417_v10, %v1445_v8 }
 0xdf1   :  { %2947 = vmatpush1.bf16.msra.mxu0 %v7560_v53  ;;  %2978 = vmatprep.mubr.bf16.mxu0 %v9298_v0  ;;  %v1367_v12 = vadd.f32 %v6413_v9, %v1360_v7 }
 0xdf2   :  { %2948 = vmatprep.subr.bf16.mxu0 %v7565_v54 }
 0xdf3   :  { %v1453_v14 = vadd.f32 %v1452_v3, %v1367_v12 }
 0xdf5   :  { %2949 = vmatpush1.bf16.msra.mxu0 %v7563_v55  ;;  %v9982_v16 = vmul.f32 0.5, %v1453_v14 }
 0xdf6   :  { %2950 = vmatprep.subr.bf16.mxu0 %v7568_v57 }
 0xdf7   :  { %v9986_v17 = vpack.c.bf16 %v9982_v16, %v9982_v16 }
 0xdf9   :  { %2951 = vmatpush1.bf16.msra.mxu0 %v7566_v56 }
 0xdfa   :  { %2952 = vmatprep.subr.bf16.mxu0 %v7571_v60 }
 0xdfd   :  { %2953 = vmatpush1.bf16.msra.mxu0 %v7569_v18 }
 0xdfe   :  { %2954 = vmatprep.subr.bf16.mxu0 %v7574_v2 }
 0xe01   :  { %2955 = vmatpush1.bf16.msra.mxu0 %v7572_v35 }
 0xe02   :  { %2956 = vmatprep.subr.bf16.mxu0 %v7577_v6 }
 0xe05   :  { %2957 = vmatpush1.bf16.msra.mxu0 %v7575_v24 }
 0xe06   :  { %2958 = vmatprep.subr.bf16.mxu0 %v7580_v11 }
 0xe09   :  { %2959 = vmatpush1.bf16.msra.mxu0 %v7578_v5 }
 0xe0a   :  { %2960 = vmatprep.subr.bf16.mxu0 %v7583_v13  ;;  %v9995_v13 = vld [vmem:[#allocation34] sm:$0x7] }
 0xe0b   :  { %v2810_v14 = vrot.slane %v9995_v13, %v9816_v33  ;;  %v2806_v44 = vrot.slane %v9995_v13, %v9813_v32 }
 0xe0d   :  { %2961 = vmatpush1.bf16.msra.mxu0 %v7581_v15 }
 0xe0e   :  { %7069 = vmatprep.subr.bf16.mxu0 %v9299_v1 }
 0xe10   :  { %2979 = vmatmul.mubr.bf16.vlgmr.msra.gmra.mxu0 %v9986_v17 }
 0xe11   :  { %7071 = vmatprep.mubr.msk.bf16.mxu0 %vm9300_vm0, %v9299_v1 }
 0xeb0   :  { %v2503_v48 = vpop.f32.mrf.mxu0 }
 0xeb1   :  { %v2504_v49 = vadd.f32 %v2503_v48, %v2382_v45  ;;  %v7600_v48 = vld [vmem:[#allocation40 + $0xb0] ss:$12 sps:$4 sm:$0xff]  }
 0xeb2   :  { %v2505_v30 = vpop.f32.mrf.mxu0 }
 0xeb3   :  { %v2516_v50 = vmul.f32 0.044715, %v2504_v49  ;;  %v2506_v51 = vadd.f32 %v2505_v30, %v2386_v47  ;;  %v2512_v34 = vmul.f32 0.5, %v2504_v49 }
 0xeb4   :  { %v2507_v53 = vpop.f32.mrf.mxu0 }
 0xeb5   :  { %v2520_v22 = vmul.f32 %v2516_v50, %v2504_v49  ;;  %v2517_v54 = vmul.f32 0.044715, %v2506_v51  ;;  %v2508_v55 = vadd.f32 %v2507_v53, %v2382_v45  ;;  %v2513_v27 = vmul.f32 0.5, %v2506_v51 }
 0xeb6   :  { %v2509_v57 = vpop.f32.mrf.mxu0 }
 0xeb7   :  { %v2524_v56 = vmul.f32 %v2520_v22, %v2504_v49  ;;  %v2521_v59 = vmul.f32 %v2517_v54, %v2506_v51  ;;  %v2518_v60 = vmul.f32 0.044715, %v2508_v55  ;;  %v2510_v62 = vadd.f32 %v2509_v57, %v2386_v47  ;;  %v7601_v22 = vld [vmem:[#allocation40 + $0x98] ss:$12 sps:$4 sm:$0xff]   ;;  %v7602_v57 = vld [vmem:[#allocation40 + $0x80] ss:$12 sps:$4 sm:$0xff]  }
 0xeb8   :  { %v2514_v23 = vmul.f32 0.5, %v2508_v55 }
 0xeb9   :  { %v2528_v18 = vadd.f32 %v2524_v56, %v2504_v49  ;;  %v2525_v63 = vmul.f32 %v2521_v59, %v2506_v51  ;;  %v2522_v39 = vmul.f32 %v2518_v60, %v2508_v55  ;;  %v2519_v2 = vmul.f32 0.044715, %v2510_v62  ;;  %v7603_v60 = vld [vmem:[#allocation40 + $0x68] ss:$12 sps:$4 sm:$0xff]  }
 0xeba   :  { %v2515_v28 = vmul.f32 0.5, %v2510_v62 }
 0xebb   :  { %v2526_v58 = vmul.f32 %v2522_v39, %v2508_v55  ;;  %v2523_v4 = vmul.f32 %v2519_v2, %v2510_v62  ;;  %v2529_v35 = vadd.f32 %v2525_v63, %v2506_v51  ;;  %v2532_v6 = vmul.f32 0.7978846, %v2528_v18  ;;  %v7604_v18 = vld [vmem:[#allocation40 + $0x50] ss:$12 sps:$4 sm:$0xff]   ;;  %v7605_v63 = vld [vmem:[#allocation40 + $0x38] ss:$12 sps:$4 sm:$0xff]  }
 0xebc   :  { %v7606_v39 = vld [vmem:[#allocation40 + $0x20] ss:$12 sps:$4 sm:$0xff]   ;;  %v7607_v2 = vld [vmem:[#allocation40 + $0x8] ss:$12 sps:$4 sm:$0xff]  }
 0xebd   :  { %v2530_v7 = vadd.f32 %v2526_v58, %v2508_v55  ;;  %v2527_v8 = vmul.f32 %v2523_v4, %v2510_v62  ;;  %v2533_v9 = vmul.f32 0.7978846, %v2529_v35 }
 0xebf   :  { %v2534_v10 = vmul.f32 0.7978846, %v2530_v7  ;;  %v2531_v24 = vadd.f32 %v2527_v8, %v2510_v62  ;;  %7812 = vtanh.f32 %v2533_v9 }
 0xec0   :  { %7814 = vtanh.f32 %v2532_v6 }
 0xec1   :  { %7816 = vtanh.f32 %v2534_v10  ;;  %v2535_v11 = vmul.f32 0.7978846, %v2531_v24 }
 0xec3   :  { %7818 = vtanh.f32 %v2535_v11 }
 0xecc   :  { %v7813_v12 = vpop.eup %7812 }
 0xecd   :  { %v7815_v3 = vpop.eup %7814  ;;  %v2541_v15 = vadd.f32 1.0, %v7813_v12 }
 0xece   :  { %v7817_v5 = vpop.eup %7816  ;;  %v2540_v25 = vadd.f32 1.0, %v7815_v3 }
 0xecf   :  { %v2542_v19 = vadd.f32 1.0, %v7817_v5  ;;  %v2545_v38 = vmul.f32 %v2541_v15, %v2513_v27 }
 0xed0   :  { %v7819_v20 = vpop.eup %7818  ;;  %v2980_v21 = vpop.f32.mrf.mxu0  ;;  %v2544_v43 = vmul.f32 %v2540_v25, %v2512_v34 }
 0xed1   :  { %v2543_v29 = vadd.f32 1.0, %v7819_v20  ;;  %v2546_v36 = vmul.f32 %v2542_v19, %v2514_v23  ;;  %v2981_v53 = vadd.f32 %v2980_v21, %v2806_v44  ;;  %v2814_v19 = vrot.slane %v9995_v13, %v9864_v61 }
 0xed2   :  { %v2982_v31 = vpop.f32.mrf.mxu0 }
 0xed3   :  { %v2983_v37 = vadd.f32 %v2982_v31, %v2810_v14  ;;  %v2547_v40 = vmul.f32 %v2543_v29, %v2515_v28  ;;  %v2580_v50 = vpack.c.bf16 %v2546_v36, %v2544_v43  ;;  %v10011_v55 = vpack.c.bf16 %v2981_v53, %v2981_v53 }
 0xed4   :  { %v2984_v41 = vpop.f32.mrf.mxu0  ;;  %v3047_v59 = vcombine.high %v2981_v53, %v2981_v53 }
 0xed5   :  { %v10001_v45 = vpack.c.bf16 %v2983_v37, %v2983_v37  ;;  %v2581_v47 = vpack.c.bf16 %v2547_v40, %v2545_v38  ;;  %v3050_v51 = vcombine.high %v2983_v37, %v2983_v37 }
 0xed6   :  { %v2985_v30 = vpop.f32.mrf.mxu0  ;;  %v10022_v62 = vpack.c.bf16 %v3047_v59, %v3047_v59 }
 0xed7   :  { %2717 = vmatprep.mubr.bf16.mxu1 %v2581_v47  ;;  %v3063_v49 = vsel %vm1162_vm6, %v10001_v45, 0  ;;  %v10009_v54 = vpack.c.bf16 %v3050_v51, %v3050_v51 }
 0xed8   :  { %7070 = vmatpush3.bf16.xpose.msra.mxu0 %v3063_v49  ;;  %2718 = vmatmul.mubr.bf16.vlgmr.msra.gmra.mxu1 %v2580_v50 }
 0xed9   :  { %7050 = vmatpush3.bf16.msra.mxu1 %v7600_v48  ;;  %7075 = vmatprep.subr.bf16.mxu0 %v9299_v1  ;;  %v3109_v56 = vsel %vm1162_vm6, %v10009_v54, 0 }
 0xeda   :  { %7051 = vmatprep.subr.bf16.mxu1 %v9299_v1  ;;  %7065 = vmatprep.mubr.msk.bf16.mxu1 %vm9300_vm0, %v9299_v1 }
 0xedd   :  { %7052 = vmatpush3.bf16.msra.mxu1 %v7601_v22 }
 0xede   :  { %7053 = vmatprep.subr.bf16.mxu1 %v9299_v1 }
 0xedf   :  { %7072 = vmatmul.mubr.msk.bf16.vlgmr.msra.gmra.mxu0 %vm1162_vm6, %v10011_v55 }
 0xee0   :  { %7076 = vmatpush3.bf16.xpose.msra.mxu0 %v3109_v56  ;;  %7077 = vmatprep.mubr.msk.bf16.mxu0 %vm9300_vm0, %v9299_v1 }
 0xee1   :  { %7054 = vmatpush3.bf16.msra.mxu1 %v7602_v57  ;;  %7081 = vmatprep.subr.bf16.mxu0 %v9299_v1 }
 0xee2   :  { %7055 = vmatprep.subr.bf16.mxu1 %v9299_v1 }
 0xee5   :  { %7056 = vmatpush3.bf16.msra.mxu1 %v7603_v60 }
 0xee6   :  { %7057 = vmatprep.subr.bf16.mxu1 %v9299_v1 }
 0xee7   :  { %7078 = vmatmul.mubr.msk.bf16.vlgmr.msra.gmra.mxu0 %vm1162_vm6, %v10022_v62 }
 0xee8   :  { %7083 = vmatprep.mubr.msk.bf16.mxu0 %vm9300_vm0, %v9299_v1 }
 0xee9   :  { %7058 = vmatpush3.bf16.msra.mxu1 %v7604_v18 }
 0xeea   :  { %7059 = vmatprep.subr.bf16.mxu1 %v9299_v1 }
 0xeed   :  { %7060 = vmatpush3.bf16.msra.mxu1 %v7605_v63 }
 0xeee   :  { %7061 = vmatprep.subr.bf16.mxu1 %v9299_v1 }
 0xef1   :  { %7062 = vmatpush3.bf16.msra.mxu1 %v7606_v39 }
 0xef2   :  { %7063 = vmatprep.subr.bf16.mxu1 %v9299_v1 }
 0xef5   :  { %7064 = vmatpush3.bf16.msra.mxu1 %v7607_v2 }
 0xef6   :  { %7093 = vmatprep.subr.bf16.mxu1 %v9299_v1 }
 0xef8   :  { %7066 = vmatmul.mubr.bf16.vlgmr.msra.gmra.mxu1 %v9986_v17 }
 0xef9   :  { %7095 = vmatprep.mubr.msk.bf16.mxu1 %vm9300_vm0, %v9299_v1 }
 0xf98   :  { %v6767_v58 = vpop.f32.mrf.mxu1 }
 0xf9a   :  { %v6768_v4 = vpop.f32.mrf.mxu1 }
 0xf9b   :  { %v10036_v35 = vadd.f32 %v6768_v4, %v6767_v58 }
 0xf9c   :  { %v6770_v6 = vpop.f32.mrf.mxu1 }
 0xf9e   :  { %v6771_v7 = vpop.f32.mrf.mxu1 }
 0xf9f   :  { %v10038_v8 = vadd.f32 %v6771_v7, %v6770_v6  ;;  %v3099_v9 = vpop.f32.mrf.mxu0 }
 0xfa0   :  { %v3152_v10 = vsel %vm3151_vm12, %v3099_v9, -inf }
 0xfa1   :  { %3153 = vmax.xlane.f32.xlu0 %v3152_v10  ;;  %v7073_v24 = vpop.f32.mrf.mxu0 }
 0xfa3   :  { %v3102_v11 = vpop.f32.mrf.mxu0 }
 0xfa5   :  { %v7074_v12 = vpop.f32.mrf.mxu0 }
 0xfa7   :  { %v3145_v17 = vpop.f32.mrf.mxu0 }
 0xfa8   :  { %v3155_v3 = vsel %vm3151_vm12, %v3145_v17, -inf }
 0xfa9   :  { %3156 = vmax.xlane.f32.xlu1 %v3155_v3  ;;  %v7079_v5 = vpop.f32.mrf.mxu0 }
 0xfab   :  { %v3148_v14 = vpop.f32.mrf.mxu0 }
 0xfad   :  { %v7080_v15 = vpop.f32.mrf.mxu0 }
 0xfb8   :  { %v3021_v20 = vpop.f32.mrf.mxu1 }
 0xfb9   :  { %v3022_v21 = vadd.f32 %v3021_v20, %v2814_v19 }
 0xfba   :  { %v7067_v23 = vpop.f32.mrf.mxu1 }
 0xfbb   :  { %v10044_v25 = vpack.c.bf16 %v3022_v21, %v3022_v21 }
 0xfbc   :  { %v3024_v27 = vpop.f32.mrf.mxu1 }
 0xfbd   :  { %v3182_v28 = vsel %vm1382_vm7, %v10044_v25, 0 }
 0xfbe   :  { %v7068_v29 = vpop.f32.mrf.mxu1  ;;  %7082 = vmatpush3.bf16.msra.mxu0 %v3182_v28 }
 0xfbf   :  { %7087 = vmatprep.subr.bf16.mxu0 %v9299_v1 }
0x102a   :  { %v3154_v31 = vpop.xlane.xlu0 %3153 }
0x102b   :  { %v3158_v34 = vsub.f32 %v3099_v9, %v3154_v31 }
0x102d   :  { %v3160_v36 = vmul.f32 1.442695, %v3158_v34 }
0x102f   :  { %7820 = vpow2.f32 %v3160_v36 }
0x1032   :  { %v3157_v37 = vpop.xlane.xlu1 %3156 }
0x1033   :  { %v3159_v38 = vsub.f32 %v3145_v17, %v3157_v37 }
0x1035   :  { %v3162_v13 = vmul.f32 1.442695, %v3159_v38 }
0x1037   :  { %7822 = vpow2.f32 %v3162_v13 }
0x103c   :  { %v7821_v40 = vpop.eup %7820 }
0x103d   :  { %v3164_v41 = vsel %vm3151_vm12, %v7821_v40, 0.0 }
0x103e   :  { %3165 = vadd.xlane.f32.xlu0 %v3164_v41 }
0x1044   :  { %v7823_v43 = vpop.eup %7822 }
0x1045   :  { %v3167_v44 = vsel %vm3151_vm12, %v7823_v43, 0.0 }
0x1046   :  { %3168 = vadd.xlane.f32.xlu1 %v3167_v44 }
0x1054   :  { %3274 = vrot.lane.b32.xlu0 %v10001_v45, %s9239_s24  ;;  %v3053_v45 = vcombine.high %v3022_v21, %v3022_v21 }
0x1056   :  { %v3177_v53 = vpack.c.bf16 %v3053_v45, %v3053_v45 }
0x1057   :  { %3326 = vrot.lane.b32.xlu1 %v10009_v54, %s9239_s24 }
0x1058   :  { %3323 = vrot.lane.b32.xlu0 %v10022_v62, %s9239_s24 }
0x105b   :  { %3271 = vrot.lane.b32.xlu1 %v10011_v55, %s9239_s24  ;;  %v3228_v55 = vsel %vm1382_vm7, %v3177_v53, 0 }
0x10c7   :  { %v3166_v47 = vpop.xlane.xlu0 %3165 }
0x10c8   :  { %7824 = vrcp.f32 %v3166_v47 }
0x10cb   :  { %v3275_v48 = vpop.permute.xlu0 %3274 }
0x10cc   :  { %v3280_v30 = vsel %vm1162_vm6, %v3275_v48, 0 }
0x10cd   :  { %7094 = vmatpush3.bf16.xpose.msra.mxu1 %v3280_v30 }
0x10ce   :  { %7105 = vmatprep.subr.bf16.mxu1 %v9299_v1 }
0x10cf   :  { %v3169_v50 = vpop.xlane.xlu1 %3168  ;;  %v3324_v18 = vpop.permute.xlu0 %3323 }
0x10d0   :  { %7826 = vrcp.f32 %v3169_v50 }
0x10d3   :  { %v3327_v51 = vpop.permute.xlu1 %3326 }
0x10d4   :  { %v3332_v62 = vsel %vm1162_vm6, %v3327_v51, 0 }
0x10d5   :  { %v7825_v49 = vpop.eup %7824 }
0x10d6   :  { %v3172_v22 = vmul.f32 %v7825_v49, %v7821_v40  ;;  %v7608_v49 = vld [vmem:[#allocation38 + $0x38] sm:$0xff]  }
0x10d7   :  { %v3272_v54 = vpop.permute.xlu1 %3271 }
0x10d8   :  { %7096 = vmatmul.mubr.msk.bf16.vlgmr.msra.gmra.mxu1 %vm1162_vm6, %v3272_v54  ;;  %v3174_v57 = vpack.c.bf16 %v3172_v22, %v3172_v22  ;;  %v7610_v22 = vld [vmem:[#allocation38 + $0x28] sm:$0xff]   ;;  %v7611_v54 = vld [vmem:[#allocation38 + $0x20] sm:$0xff]  }
0x10d9   :  { %7107 = vmatprep.mubr.msk.bf16.mxu1 %vm9300_vm0, %v9299_v1 }
0x10da   :  { %7084 = vmatmul.mubr.msk.bf16.vlgmr.msra.gmra.mxu0 %vm1378_vm9, %v3174_v57  ;;  %v7612_v57 = vld [vmem:[#allocation38 + $0x18] sm:$0xff]  }
0x10db   :  { %7088 = vmatpush3.bf16.msra.mxu0 %v3228_v55  ;;  %7089 = vmatprep.mubr.msk.bf16.mxu0 %vm9300_vm0, %v9299_v1  ;;  %v7613_v55 = vld [vmem:[#allocation38 + $0x10] sm:$0xff]  }
0x10dc   :  { %7099 = vmatprep.subr.bf16.mxu0 %v9299_v1 }
0x10dd   :  { %v7827_v56 = vpop.eup %7826 }
0x10de   :  { %v3173_v59 = vmul.f32 %v7827_v56, %v7823_v43  ;;  %v7614_v56 = vld [vmem:[#allocation38 + $0x8] sm:$0xff]  }
0x10e0   :  { %v3175_v60 = vpack.c.bf16 %v3173_v59, %v3173_v59 }
0x10e2   :  { %7090 = vmatmul.mubr.msk.bf16.vlgmr.msra.gmra.mxu0 %vm1378_vm9, %v3175_v60 }
0x10e3   :  { %7100 = vmatpush3.bf16.xpose.msra.mxu0 %v3332_v62  ;;  %7101 = vmatprep.mubr.msk.bf16.mxu0 %vm9300_vm0, %v9299_v1 }
0x10e4   :  { %7111 = vmatprep.subr.bf16.mxu0 %v9299_v1 }
0x10ea   :  { %7102 = vmatmul.mubr.msk.bf16.vlgmr.msra.gmra.mxu0 %vm1162_vm6, %v3324_v18 }
0x10eb   :  { %7113 = vmatprep.mubr.msk.bf16.mxu0 %vm9300_vm0, %v9299_v1 }
0x1198   :  { %v3316_v63 = vpop.f32.mrf.mxu1 }
0x1199   :  { %v3374_v39 = vsel %vm3151_vm12, %v3316_v63, -inf }
0x119a   :  { %v10078_v2 = vpop.f32.mrf.mxu0  ;;  %3375 = vmax.xlane.f32.xlu1 %v3374_v39  ;;  %v7097_v58 = vpop.f32.mrf.mxu1 }
0x119c   :  { %v7085_v4 = vpop.f32.mrf.mxu0  ;;  %v3319_v6 = vpop.f32.mrf.mxu1 }
0x119e   :  { %v3221_v7 = vpop.f32.mrf.mxu0  ;;  %v7098_v9 = vpop.f32.mrf.mxu1 }
0x11a0   :  { %v7086_v10 = vpop.f32.mrf.mxu0 }
0x11a2   :  { %v10080_v24 = vpop.f32.mrf.mxu0 }
0x11a3   :  { %v3498_v11 = vcombine.low %v10078_v2, %v10080_v24 }
0x11a4   :  { %v7091_v12 = vpop.f32.mrf.mxu0 }
0x11a6   :  { %v3267_v17 = vpop.f32.mrf.mxu0 }
0x11a7   :  { %v6528_v17 = vld [vmem:[#allocation32] ss:$0 sm:$0xff] }
0x11a8   :  { %v7092_v3 = vpop.f32.mrf.mxu0 }
0x11a9   :  { %v6477_v3 = vld [vmem:[#allocation22] ss:$0 sm:$0xff] }
0x11aa   :  { %v3368_v5 = vpop.f32.mrf.mxu0 }
0x11ab   :  { %v3377_v14 = vsel %vm3151_vm12, %v3368_v5, -inf }
0x11ac   :  { %3378 = vmax.xlane.f32.xlu0 %v3377_v14  ;;  %v7103_v15 = vpop.f32.mrf.mxu0 }
0x11ae   :  { %v3371_v19 = vpop.f32.mrf.mxu0 }
0x11af   :  { %v2720_v19 = vadd.f32 %v10036_v35, %v6477_v3  ;;  %v7619_v35 = vld [vmem:[#allocation47 + $0x60] ss:$8 sps:$4 sm:$0xff]  }
0x11b0   :  { %v7104_v20 = vpop.f32.mrf.mxu0 }
0x11b1   :  { %v2726_v2 = vadd.f32 %v2720_v19, %v9973_v52  ;;  %v3645_v19 = vld [vmem:[#allocation41] sm:$0x3] }
0x1223   :  { %v3376_v21 = vpop.xlane.xlu1 %3375 }
0x1224   :  { %v3380_v23 = vsub.f32 %v3316_v63, %v3376_v21  ;;  %v7615_v63 = vld [vmem:[#allocation38] sm:$0xff]  }
0x1226   :  { %v3382_v27 = vmul.f32 1.442695, %v3380_v23 }
0x1228   :  { %7828 = vpow2.f32 %v3382_v27  ;;  %v2723_v27 = vadd.f32 %v10038_v8, %v6477_v3  ;;  %v7652_v3 = vld [vmem:[#allocation49 + $0x48] sm:$0xff]  }
0x122a   :  { %v10115_v24 = vadd.f32 %v2723_v27, %v9975_v26 }
0x1235   :  { %v7829_v28 = vpop.eup %7828  ;;  %v3379_v29 = vpop.xlane.xlu0 %3378 }
0x1236   :  { %v3381_v31 = vsub.f32 %v3368_v5, %v3379_v29  ;;  %v3386_v34 = vsel %vm3151_vm12, %v7829_v28, 0.0  ;;  %v7621_v29 = vld [vmem:[#allocation47 + $0x64] ss:$8 sps:$4 sm:$0xff]  }
0x1237   :  { %3387 = vadd.xlane.f32.xlu0 %v3386_v34 }
0x1238   :  { %v3384_v36 = vmul.f32 1.442695, %v3381_v31 }
0x123a   :  { %7830 = vpow2.f32 %v3384_v36 }
0x1247   :  { %v7831_v37 = vpop.eup %7830 }
0x1248   :  { %v3389_v38 = vsel %vm3151_vm12, %v7831_v37, 0.0 }
0x1249   :  { %3390 = vadd.xlane.f32.xlu1 %v3389_v38  ;;  %v7624_v38 = vld [vmem:[#allocation47 + $0x54] ss:$8 sps:$4 sm:$0xff]  }
0x124d   :  { %3399 = vrot.lane.b32.xlu0 %v10044_v25, %s9239_s24 }
0x125a   :  { %3448 = vrot.lane.b32.xlu1 %v3177_v53, %s9239_s24  ;;  %v7609_v53 = vld [vmem:[#allocation38 + $0x30] sm:$0xff]  }
0x12c0   :  { %v3388_v13 = vpop.xlane.xlu0 %3387 }
0x12c1   :  { %7832 = vrcp.f32 %v3388_v13  ;;  %v7622_v13 = vld [vmem:[#allocation47 + $0x50] ss:$8 sps:$4 sm:$0xff]  }
0x12c4   :  { %v3400_v40 = vpop.permute.xlu0 %3399 }
0x12c5   :  { %v3405_v41 = vsel %vm1382_vm7, %v3400_v40, 0  ;;  %v7627_v40 = vld [vmem:[#allocation47 + $0x44] ss:$8 sps:$4 sm:$0xff]  }
0x12c6   :  { %7106 = vmatpush3.bf16.msra.mxu1 %v3405_v41  ;;  %v7625_v41 = vld [vmem:[#allocation47 + $0x40] ss:$8 sps:$4 sm:$0xff]  }
0x12c7   :  { %7117 = vmatprep.subr.bf16.mxu1 %v9299_v1 }
0x12ce   :  { %v7833_v43 = vpop.eup %7832 }
0x12cf   :  { %v3394_v44 = vmul.f32 %v7833_v43, %v7829_v28  ;;  %v7618_v28 = vld [vmem:[#allocation47 + $0x74] ss:$8 sps:$4 sm:$0xff]   ;;  %v7628_v43 = vld [vmem:[#allocation47 + $0x30] ss:$8 sps:$4 sm:$0xff]  }
0x12d1   :  { %v3396_v47 = vpack.c.bf16 %v3394_v44, %v3394_v44  ;;  %v7630_v44 = vld [vmem:[#allocation47 + $0x34] ss:$8 sps:$4 sm:$0xff]  }
0x12d2   :  { %v3391_v48 = vpop.xlane.xlu1 %3390 }
0x12d3   :  { %7834 = vrcp.f32 %v3391_v48  ;;  %7108 = vmatmul.mubr.msk.bf16.vlgmr.msra.gmra.mxu1 %vm1378_vm9, %v3396_v47  ;;  %v7633_v47 = vld [vmem:[#allocation47 + $0x24] ss:$8 sps:$4 sm:$0xff]   ;;  %v7631_v48 = vld [vmem:[#allocation47 + $0x20] ss:$8 sps:$4 sm:$0xff]  }
0x12d4   :  { %7133 = vmatprep.mubr.msk.bf16.mxu1 %vm9300_vm0, %v9299_v1  ;;  %7118 = vmatpush3.bf16.msra.mxu1 %v7608_v49 }
0x12d5   :  { %7119 = vmatprep.subr.bf16.mxu1 %v9299_v1 }
0x12d6   :  { %v3449_v25 = vpop.permute.xlu1 %3448 }
0x12d7   :  { %v3454_v30 = vsel %vm1382_vm7, %v3449_v25, 0  ;;  %v7636_v25 = vld [vmem:[#allocation47 + $0x14] ss:$8 sps:$4 sm:$0xff]  }
0x12d8   :  { %7112 = vmatpush3.bf16.msra.mxu0 %v3454_v30  ;;  %7120 = vmatpush3.bf16.msra.mxu1 %v7609_v53  ;;  %v7634_v30 = vld [vmem:[#allocation47 + $0x10] ss:$8 sps:$4 sm:$0xff]  }
0x12d9   :  { %7121 = vmatprep.subr.bf16.mxu1 %v9299_v1  ;;  %3737 = vmatprep.subr.bf16.mxu0 %v7618_v28 }
0x12dc   :  { %7122 = vmatpush3.bf16.msra.mxu1 %v7610_v22 }
0x12dd   :  { %7123 = vmatprep.subr.bf16.mxu1 %v9299_v1 }
0x12e0   :  { %v7835_v50 = vpop.eup %7834  ;;  %7124 = vmatpush3.bf16.msra.mxu1 %v7611_v54  ;;  %v6537_v54 = vld [vmem:[#allocation37] ss:$0 sm:$0xff] }
0x12e1   :  { %v3395_v45 = vmul.f32 %v7835_v50, %v7831_v37  ;;  %7125 = vmatprep.subr.bf16.mxu1 %v9299_v1  ;;  %v7639_v50 = vld [vmem:[#allocation47 + $0x4] ss:$8 sps:$4 sm:$0xff]  }
0x12e3   :  { %v3397_v51 = vpack.c.bf16 %v3395_v45, %v3395_v45  ;;  %v7637_v45 = vld [vmem:[#allocation47] ss:$8 sps:$4 sm:$0xff]  }
0x12e4   :  { %7126 = vmatpush3.bf16.msra.mxu1 %v7612_v57 }
0x12e5   :  { %7114 = vmatmul.mubr.msk.bf16.vlgmr.msra.gmra.mxu0 %vm1378_vm9, %v3397_v51  ;;  %7127 = vmatprep.subr.bf16.mxu1 %v9299_v1 }
0x12e6   :  { %3769 = vmatprep.mubr.bf16.mxu0 %v9298_v0 }
0x12e8   :  { %7128 = vmatpush3.bf16.msra.mxu1 %v7613_v55  ;;  %v6538_v55 = vld [vmem:[#allocation35] ss:$0 sm:$0xff] }
0x12e9   :  { %7129 = vmatprep.subr.bf16.mxu1 %v9299_v1 }
0x12ec   :  { %7130 = vmatpush3.bf16.msra.mxu1 %v7614_v56 }
0x12ed   :  { %7131 = vmatprep.subr.bf16.mxu1 %v9299_v1 }
0x12f0   :  { %7132 = vmatpush3.bf16.msra.mxu1 %v7615_v63  ;;  %v7642_v63 = vld [vmem:[#allocation49 + $0x70] sm:$0xff]  }
0x1393   :  { %v3441_v59 = vpop.f32.mrf.mxu1 }
0x1395   :  { %v7109_v60 = vpop.f32.mrf.mxu1 }
0x1397   :  { %v3444_v62 = vpop.f32.mrf.mxu1 }
0x1398   :  { %v7640_v62 = vld [vmem:[#allocation49 + $0x78] sm:$0xff]  }
0x1399   :  { %v7110_v18 = vpop.f32.mrf.mxu1  ;;  %6807 = vmatprep.subr.bf16.mxu1 %v7640_v62 }
0x139a   :  { %v7641_v18 = vld [vmem:[#allocation49 + $0x38] sm:$0xff]  }
0x13a5   :  { %v3490_v39 = vpop.f32.mrf.mxu0 }
0x13a6   :  { %v3502_v58 = vcombine.low %v3441_v59, %v3490_v39  ;;  %v7643_v39 = vld [vmem:[#allocation49 + $0x30] sm:$0xff]  }
0x13a7   :  { %v7115_v4 = vpop.f32.mrf.mxu0 }
0x13a8   :  { %3503 = vrot.lane.b32.xlu1 %v3502_v58, %s9239_s24  ;;  %v7644_v58 = vld [vmem:[#allocation49 + $0x68] sm:$0xff]  }
0x13a9   :  { %v3493_v6 = vpop.f32.mrf.mxu0  ;;  %v7645_v4 = vld [vmem:[#allocation49 + $0x28] sm:$0xff]  }
0x13aa   :  { %v7646_v6 = vld [vmem:[#allocation49 + $0x60] sm:$0xff]  }
0x13ab   :  { %v7116_v7 = vpop.f32.mrf.mxu0 }
0x13ac   :  { %v7647_v7 = vld [vmem:[#allocation49 + $0x20] sm:$0xff]  }
0x141a   :  { %v3504_v9 = vpop.permute.xlu1 %3503 }
0x141b   :  { %v3506_v10 = vsel %vm1162_vm6, %v3498_v11, %v3504_v9  ;;  %v7616_v11 = vld [vmem:[#allocation47 + $0x70] ss:$8 sps:$4 sm:$0xff]  }
0x141c   :  { %v3507_v12 = vpack.c.bf16 %v3506_v10, %v3506_v10  ;;  %3738 = vmatpush1.bf16.msra.mxu0 %v7616_v11  ;;  %v7648_v9 = vld [vmem:[#allocation49 + $0x58] sm:$0xff]  }
0x141d   :  { %3739 = vmatprep.subr.bf16.mxu0 %v7621_v29  ;;  %v7649_v10 = vld [vmem:[#allocation49 + $0x18] sm:$0xff]  }
0x141e   :  { %7134 = vmatmul.mubr.bf16.vlgmr.msra.gmra.mxu1 %v3507_v12  ;;  %v7650_v12 = vld [vmem:[#allocation49 + $0x50] sm:$0xff]  }
0x141f   :  { %6808 = vmatpush3.bf16.msra.mxu1 %v7641_v18 }
0x1420   :  { %3740 = vmatpush1.bf16.msra.mxu0 %v7619_v35  ;;  %6809 = vmatprep.subr.bf16.mxu1 %v7642_v63 }
0x1421   :  { %3741 = vmatprep.subr.bf16.mxu0 %v7624_v38 }
0x1423   :  { %6810 = vmatpush3.bf16.msra.mxu1 %v7643_v39 }
0x1424   :  { %3742 = vmatpush1.bf16.msra.mxu0 %v7622_v13  ;;  %6811 = vmatprep.subr.bf16.mxu1 %v7644_v58 }
0x1425   :  { %3743 = vmatprep.subr.bf16.mxu0 %v7627_v40 }
0x1427   :  { %6812 = vmatpush3.bf16.msra.mxu1 %v7645_v4  ;;  %v7661_v4 = vld [vmem:[%s10483_s6 + $0x64] ss:$8 sps:$4 sm:$0xff]  }
0x1428   :  { %3744 = vmatpush1.bf16.msra.mxu0 %v7625_v41  ;;  %6813 = vmatprep.subr.bf16.mxu1 %v7646_v6  ;;  %v7659_v6 = vld [vmem:[%s10483_s6 + $0x60] ss:$8 sps:$4 sm:$0xff]  }
0x1429   :  { %3745 = vmatprep.subr.bf16.mxu0 %v7630_v44 }
0x142b   :  { %6814 = vmatpush3.bf16.msra.mxu1 %v7647_v7  ;;  %v7664_v7 = vld [vmem:[%s10483_s6 + $0x54] ss:$8 sps:$4 sm:$0xff]  }
0x142c   :  { %3746 = vmatpush1.bf16.msra.mxu0 %v7628_v43  ;;  %6815 = vmatprep.subr.bf16.mxu1 %v7648_v9  ;;  %v7662_v9 = vld [vmem:[%s10483_s6 + $0x50] ss:$8 sps:$4 sm:$0xff]  }
0x142d   :  { %3747 = vmatprep.subr.bf16.mxu0 %v7633_v47 }
0x142f   :  { %6816 = vmatpush3.bf16.msra.mxu1 %v7649_v10  ;;  %v7667_v10 = vld [vmem:[%s10483_s6 + $0x44] ss:$8 sps:$4 sm:$0xff]  }
0x1430   :  { %3748 = vmatpush1.bf16.msra.mxu0 %v7631_v48  ;;  %6817 = vmatprep.subr.bf16.mxu1 %v7650_v12  ;;  %v7668_v12 = vld [vmem:[%s10483_s6 + $0x30] ss:$8 sps:$4 sm:$0xff]  }
0x1431   :  { %3749 = vmatprep.subr.bf16.mxu0 %v7636_v25 }
0x1434   :  { %3750 = vmatpush1.bf16.msra.mxu0 %v7634_v30 }
0x1435   :  { %3751 = vmatprep.subr.bf16.mxu0 %v7639_v50 }
0x1438   :  { %3752 = vmatpush1.bf16.msra.mxu0 %v7637_v45 }
0x14de   :  { %v3596_v5 = vpop.f32.mrf.mxu1 }
0x14df   :  { %v3597_v14 = vadd.f32 %v6528_v17, %v3596_v5  ;;  %v7651_v17 = vld [vmem:[#allocation49 + $0x10] sm:$0xff]   ;;  %v7653_v5 = vld [vmem:[#allocation49 + $0x8] sm:$0xff]  }
0x14e0   :  { %v7135_v15 = vpop.f32.mrf.mxu1  ;;  %6818 = vmatpush3.bf16.msra.mxu1 %v7651_v17  ;;  %v7673_v17 = vld [vmem:[%s10483_s6 + $0x24] ss:$8 sps:$4 sm:$0xff]  }
0x14e1   :  { %v3602_v20 = vadd.f32 %v3597_v14, %v9982_v16  ;;  %6819 = vmatprep.subr.bf16.mxu1 %v7652_v3  ;;  %v7654_v14 = vld [vmem:[#allocation49 + $0x40] sm:$0xff]  }
0x14e2   :  { %v3599_v21 = vpop.f32.mrf.mxu1  ;;  %v7655_v15 = vld [vmem:[#allocation49] sm:$0xff]  }
0x14e3   :  { %3603 = vadd.xlane.f32.xlu0 %v3602_v20  ;;  %v3654_v21 = vrot.slane %v3645_v19, %v9816_v33  ;;  %v7671_v3 = vld [vmem:[%s10483_s6 + $0x20] ss:$8 sps:$4 sm:$0xff]  }
0x14e4   :  { %v7136_v23 = vpop.f32.mrf.mxu1  ;;  %6820 = vmatpush3.bf16.msra.mxu1 %v7653_v5  ;;  %v7676_v5 = vld [vmem:[%s10483_s6 + $0x14] ss:$8 sps:$4 sm:$0xff]  }
0x14e5   :  { %6821 = vmatprep.subr.bf16.mxu1 %v7654_v14  ;;  %v7674_v14 = vld [vmem:[%s10483_s6 + $0x10] ss:$8 sps:$4 sm:$0xff]  }
0x14e7   :  { %2730 = vadd.xlane.f32.xlu0 %v2726_v2 }
0x14e8   :  { %6822 = vmatpush3.bf16.msra.mxu1 %v7655_v15  ;;  %v7679_v15 = vld [vmem:[%s10483_s6 + $0x4] ss:$8 sps:$4 sm:$0xff]  }
0x14eb   :  { %2732 = vadd.xlane.f32.xlu0 %v10115_v24 }
0x156c   :  { %v3604_v16 = vpop.xlane.xlu0 %3603 }
0x156d   :  { %v3605_v31 = vmul.f32 0.0078125, %v3604_v16 }
0x156f   :  { %v3606_v34 = vsub.f32 %v3602_v20, %v3605_v31  ;;  %v3650_v20 = vrot.slane %v3645_v19, %v9813_v32  ;;  %v7677_v19 = vld [vmem:[%s10483_s6] ss:$8 sps:$4 sm:$0xff]  }
0x1570   :  { %v2731_v8 = vpop.xlane.xlu0 %2730 }
0x1571   :  { %v2734_v36 = vmul.f32 0.0078125, %v2731_v8  ;;  %v3607_v52 = vmul.f32 %v3606_v34, %v3606_v34 }
0x1573   :  { %v10118_v37 = vsub.f32 %v2726_v2, %v2734_v36  ;;  %3608 = vadd.xlane.f32.xlu1 %v3607_v52 }
0x1575   :  { %v2738_v26 = vmul.f32 %v10118_v37, %v10118_v37 }
0x1577   :  { %2740 = vadd.xlane.f32.xlu0 %v2738_v26 }
0x15fc   :  { %v3609_v51 = vpop.xlane.xlu1 %3608 }
0x15fd   :  { %v3610_v49 = vmul.f32 0.0078125, %v3609_v51  ;;  %v7656_v51 = vld [vmem:[%s10483_s6 + $0x70] ss:$8 sps:$4 sm:$0xff]  }
0x15ff   :  { %v3611_v53 = vadd.f32 1e-12, %v3610_v49  ;;  %v7658_v49 = vld [vmem:[%s10483_s6 + $0x74] ss:$8 sps:$4 sm:$0xff]  }
0x1600   :  { %4229 = vmatprep.subr.bf16.mxu1 %v7658_v49 }
0x1601   :  { %7836 = vrsqrt.f32 %v3611_v53  ;;  %v2733_v53 = vpop.xlane.xlu0 %2732 }
0x160e   :  { %v7837_v22 = vpop.eup %7836 }
0x160f   :  { %v3613_v57 = vmul.f32 %v7837_v22, %v3606_v34 }
0x1611   :  { %v3620_v56 = vmul.f32 %v6537_v54, %v3613_v57  ;;  %v6555_v54 = vld [vmem:[#allocation43] ss:$0 sm:$0xff] }
0x1613   :  { %v10122_v59 = vadd.f32 %v6538_v55, %v3620_v56  ;;  %v2735_v55 = vmul.f32 0.0078125, %v2733_v53 }
0x1615   :  { %v3644_v60 = vpack.c.bf16 %v10122_v59, %v10122_v59  ;;  %v2737_v63 = vsub.f32 %v10115_v24, %v2735_v55  ;;  %v7665_v24 = vld [vmem:[%s10483_s6 + $0x40] ss:$8 sps:$4 sm:$0xff]   ;;  %v6573_v55 = vld [vmem:[#allocation44] ss:$0 sm:$0xff] }
0x1617   :  { %3770 = vmatmul.mubr.bf16.vlgmr.msra.gmra.mxu0 %v3644_v60  ;;  %v2739_v58 = vmul.f32 %v2737_v63, %v2737_v63 }
0x16d7   :  { %v3771_v23 = vpop.f32.mrf.mxu0 }
0x16d8   :  { %v3772_v27 = vadd.f32 %v3771_v23, %v3650_v20  ;;  %v7680_v20 = vld [vmem:[#allocation71 + $0x38] sm:$0xff]   ;;  %v2741_v23 = vpop.xlane.xlu0 %2740 }
0x16d9   :  { %v3773_v2 = vpop.f32.mrf.mxu0  ;;  %7137 = vmatprep.subr.bf16.mxu0 %v7680_v20 }
0x16da   :  { %v3780_v11 = vmul.f32 0.044715, %v3772_v27  ;;  %v3774_v28 = vadd.f32 %v3773_v2, %v3654_v21  ;;  %v3778_v44 = vmul.f32 0.5, %v3772_v27  ;;  %v7681_v21 = vld [vmem:[#allocation71 + $0x30] sm:$0xff]   ;;  %7138 = vmatpush3.bf16.msra.mxu0 %v7680_v20 }
0x16db   :  { %v3775_v29 = vpop.f32.mrf.mxu0  ;;  %7139 = vmatprep.subr.bf16.mxu0 %v7681_v21 }
0x16dc   :  { %v3782_v35 = vmul.f32 %v3780_v11, %v3772_v27  ;;  %v3781_v16 = vmul.f32 0.044715, %v3774_v28  ;;  %v3779_v47 = vmul.f32 0.5, %v3774_v28 }
0x16dd   :  { %v3776_v31 = vpop.f32.mrf.mxu0 }
0x16de   :  { %v3784_v34 = vmul.f32 %v3782_v35, %v3772_v27  ;;  %v3783_v8 = vmul.f32 %v3781_v16, %v3774_v28  ;;  %7140 = vmatpush3.bf16.msra.mxu0 %v7681_v21 }
0x16e0   :  { %v3786_v36 = vadd.f32 %v3784_v34, %v3772_v27  ;;  %v3785_v52 = vmul.f32 %v3783_v8, %v3774_v28  ;;  %v2744_v27 = vmul.f32 0.0078125, %v2741_v23 }
0x16e2   :  { %v3788_v26 = vmul.f32 0.7978846, %v3786_v36  ;;  %v3787_v38 = vadd.f32 %v3785_v52, %v3774_v28  ;;  %v2746_v2 = vadd.f32 1e-12, %v2744_v27  ;;  %v7682_v36 = vld [vmem:[#allocation71 + $0x28] sm:$0xff]  }
0x16e3   :  { %7141 = vmatprep.subr.bf16.mxu0 %v7682_v36 }
0x16e4   :  { %v3789_v13 = vmul.f32 0.7978846, %v3787_v38  ;;  %7838 = vtanh.f32 %v3788_v26  ;;  %v6494_v26 = vld [vmem:[#allocation25] ss:$0 sm:$0xff]  ;;  %7142 = vmatpush3.bf16.msra.mxu0 %v7682_v36  ;;  %v7683_v38 = vld [vmem:[#allocation71 + $0x20] sm:$0xff]  }
0x16e5   :  { %7143 = vmatprep.subr.bf16.mxu0 %v7683_v38 }
0x16e6   :  { %7840 = vtanh.f32 %v3789_v13 }
0x16e7   :  { %7842 = vrsqrt.f32 %v2746_v2 }
0x16e8   :  { %7144 = vmatpush3.bf16.msra.mxu0 %v7683_v38 }
0x16f1   :  { %v7839_v40 = vpop.eup %7838 }
0x16f2   :  { %v3792_v41 = vadd.f32 1.0, %v7839_v40  ;;  %v7684_v40 = vld [vmem:[#allocation71 + $0x18] sm:$0xff]  }
0x16f3   :  { %v7841_v43 = vpop.eup %7840  ;;  %7145 = vmatprep.subr.bf16.mxu0 %v7684_v40 }
0x16f4   :  { %v3793_v48 = vadd.f32 1.0, %v7841_v43  ;;  %v3794_v25 = vmul.f32 %v3792_v41, %v3778_v44  ;;  %v7843_v8 = vpop.eup %7842  ;;  %v6495_v44 = vld [vmem:[#allocation23] ss:$0 sm:$0xff]  ;;  %7146 = vmatpush3.bf16.msra.mxu0 %v7684_v40 }
0x16f5   :  { %v2750_v52 = vmul.f32 %v7843_v8, %v10118_v37 }
0x16f6   :  { %v3795_v30 = vmul.f32 %v3793_v48, %v3779_v47  ;;  %v3828_v45 = vpack.c.bf16 %v3794_v25, %v3794_v25  ;;  %v7685_v48 = vld [vmem:[#allocation71 + $0x10] sm:$0xff]  }
0x16f7   :  { %v2758_v43 = vmul.f32 %v6494_v26, %v2750_v52  ;;  %7147 = vmatprep.subr.bf16.mxu0 %v7685_v48 }
0x16f8   :  { %v3829_v50 = vpack.c.bf16 %v3795_v30, %v3795_v30  ;;  %7148 = vmatpush3.bf16.msra.mxu0 %v7685_v48 }
0x16f9   :  { %v10149_v25 = vadd.f32 %v6495_v44, %v2758_v43 }
0x16fa   :  { %3965 = vmatprep.mubr.bf16.mxu1 %v3829_v50  ;;  %v7686_v50 = vld [vmem:[#allocation71 + $0x8] sm:$0xff]  }
0x16fb   :  { %3966 = vmatmul.mubr.bf16.vlgmr.msra.gmra.mxu1 %v3828_v45  ;;  %7149 = vmatprep.subr.bf16.mxu0 %v7686_v50  ;;  %v7687_v45 = vld [vmem:[#allocation71] sm:$0xff]  }
0x16fc   :  { %4261 = vmatprep.mubr.bf16.mxu1 %v9298_v0  ;;  %4230 = vmatpush1.bf16.msra.mxu1 %v7656_v51 }
0x16fd   :  { %4231 = vmatprep.subr.bf16.mxu1 %v7661_v4  ;;  %7150 = vmatpush3.bf16.msra.mxu0 %v7686_v50  ;;  %v4137_v4 = vld [vmem:[#allocation62] sm:$0x3] }
0x16fe   :  { %7151 = vmatprep.subr.bf16.mxu0 %v7687_v45  ;;  %v4146_v23 = vrot.slane %v4137_v4, %v9816_v33 }
0x1700   :  { %4232 = vmatpush1.bf16.msra.mxu1 %v7659_v6  ;;  %v4142_v6 = vrot.slane %v4137_v4, %v9813_v32 }
0x1701   :  { %4233 = vmatprep.subr.bf16.mxu1 %v7664_v7  ;;  %7152 = vmatpush3.bf16.msra.mxu0 %v7687_v45 }
0x1702   :  { %7157 = vmatprep.subr.bf16.mxu0 %v9299_v1 }
0x1704   :  { %4234 = vmatpush1.bf16.msra.mxu1 %v7662_v9 }
0x1705   :  { %4235 = vmatprep.subr.bf16.mxu1 %v7667_v10 }
0x1708   :  { %4236 = vmatpush1.bf16.msra.mxu1 %v7665_v24 }
0x17bb   :  { %v6823_v22 = vpop.f32.mrf.mxu1 }
0x17bd   :  { %v6824_v57 = vpop.f32.mrf.mxu1 }
0x17be   :  { %v6825_v56 = vadd.f32 %v6824_v57, %v6823_v22 }
0x17bf   :  { %v6826_v60 = vpop.f32.mrf.mxu1 }
0x17c0   :  { %v3968_v62 = vadd.f32 %v6825_v56, %v6555_v54  ;;  %v6572_v54 = vld [vmem:[#allocation46] ss:$0 sm:$0xff] }
0x17c1   :  { %v6827_v18 = vpop.f32.mrf.mxu1 }
0x17c2   :  { %v3973_v39 = vadd.f32 %v3968_v62, %v10122_v59  ;;  %v7670_v59 = vld [vmem:[%s10483_s6 + $0x34] ss:$8 sps:$4 sm:$0xff]  }
0x17c3   :  { %4237 = vmatprep.subr.bf16.mxu1 %v7670_v59 }
0x17c4   :  { %3976 = vadd.xlane.f32.xlu1 %v3973_v39  ;;  %4238 = vmatpush1.bf16.msra.mxu1 %v7668_v12 }
0x17c5   :  { %4239 = vmatprep.subr.bf16.mxu1 %v7673_v17 }
0x17c8   :  { %2742 = vadd.xlane.f32.xlu1 %v2739_v58  ;;  %4240 = vmatpush1.bf16.msra.mxu1 %v7671_v3 }
0x17c9   :  { %4241 = vmatprep.subr.bf16.mxu1 %v7676_v5  ;;  %v6574_v5 = vld [vmem:[#allocation65] ss:$0 sm:$0xff] }
0x17cc   :  { %4242 = vmatpush1.bf16.msra.mxu1 %v7674_v14 }
0x17cd   :  { %4243 = vmatprep.subr.bf16.mxu1 %v7679_v15 }
0x17d0   :  { %4244 = vmatpush1.bf16.msra.mxu1 %v7677_v19 }
0x17d1   :  { %7187 = vmatprep.subr.bf16.mxu1 %v9299_v1 }
0x184d   :  { %v3977_v11 = vpop.xlane.xlu1 %3976 }
0x184e   :  { %v3978_v28 = vmul.f32 0.0078125, %v3977_v11 }
0x1850   :  { %v3979_v29 = vsub.f32 %v3973_v39, %v3978_v28 }
0x1851   :  { %v2743_v35 = vpop.xlane.xlu1 %2742 }
0x1852   :  { %v2745_v16 = vmul.f32 0.0078125, %v2743_v35  ;;  %v3980_v31 = vmul.f32 %v3979_v29, %v3979_v29 }
0x1854   :  { %v2747_v34 = vadd.f32 1e-12, %v2745_v16  ;;  %3981 = vadd.xlane.f32.xlu0 %v3980_v31 }
0x1856   :  { %7844 = vrsqrt.f32 %v2747_v34 }
0x1863   :  { %v7845_v13 = vpop.eup %7844 }
0x1864   :  { %v2751_v41 = vmul.f32 %v7845_v13, %v2737_v63 }
0x1866   :  { %v2759_v47 = vmul.f32 %v6494_v26, %v2751_v41 }
0x1868   :  { %v10151_v30 = vadd.f32 %v6495_v44, %v2759_v47 }
0x186a   :  { %v4017_v37 = vpack.c.bf16 %v10151_v30, %v10149_v25 }
0x186c   :  { %7153 = vmatprep.mubr.bf16.mxu0 %v4017_v37  ;;  %4262 = vmatmul.mubr.bf16.vlgmr.msra.gmra.mxu1 %v4017_v37 }
0x186d   :  { %4267 = vmatprep.mubr.bf16.mxu1 %v9298_v0 }
0x18dd   :  { %v3982_v51 = vpop.xlane.xlu0 %3981 }
0x18de   :  { %v3983_v49 = vmul.f32 0.0078125, %v3982_v51 }
0x18e0   :  { %v3984_v53 = vadd.f32 1e-12, %v3983_v49 }
0x18e2   :  { %7846 = vrsqrt.f32 %v3984_v53 }
0x18ef   :  { %v7847_v22 = vpop.eup %7846 }
0x18f0   :  { %v3986_v57 = vmul.f32 %v7847_v22, %v3979_v29 }
0x18f2   :  { %v3993_v56 = vmul.f32 %v6572_v54, %v3986_v57 }
0x18f4   :  { %v4000_v60 = vadd.f32 %v6573_v55, %v3993_v56 }
0x18f6   :  { %v4018_v62 = vpack.c.bf16 %v4000_v60, %v4000_v60 }
0x18f8   :  { %7154 = vmatmul.mubr.bf16.vlgmr.msra.gmra.mxu0 %v4018_v62  ;;  %4268 = vmatmul.mubr.bf16.gmra.mxu1 %v4018_v62 }
0x18f9   :  { %7159 = vmatprep.mubr.msk.bf16.mxu0 %vm9300_vm0, %v9299_v1  ;;  %7189 = vmatprep.mubr.msk.bf16.mxu1 %vm9300_vm0, %v9299_v1 }
0x192c   :  { %v4263_v18 = vpop.f32.mrf.mxu1 }
0x192e   :  { %v4264_v63 = vpop.f32.mrf.mxu1 }
0x1930   :  { %v4265_v39 = vpop.f32.mrf.mxu1 }
0x1932   :  { %v4266_v58 = vpop.f32.mrf.mxu1 }
0x19b8   :  { %v7155_v7 = vpop.f32.mrf.mxu0  ;;  %v4269_v9 = vpop.f32.mrf.mxu1 }
0x19b9   :  { %v4270_v24 = vadd.f32 %v4269_v9, %v4142_v6 }
0x19ba   :  { %v4108_v10 = vpop.f32.mrf.mxu0  ;;  %v4271_v59 = vpop.f32.mrf.mxu1 }
0x19bb   :  { %v4303_v12 = vpack.c.bf16 %v4270_v24, %v4270_v24  ;;  %v4296_v14 = vcombine.high %v4270_v24, %v4270_v24  ;;  %v4109_v20 = vadd.f32 %v6574_v5, %v4108_v10  ;;  %v4272_v11 = vadd.f32 %v4271_v59, %v4146_v23 }
0x19bc   :  { %v7156_v17 = vpop.f32.mrf.mxu0  ;;  %v4273_v3 = vpop.f32.mrf.mxu1 }
0x19bd   :  { %v4309_v19 = vsel %vm1162_vm6, %v4303_v12, 0  ;;  %v4304_v21 = vpack.c.bf16 %v4296_v14, %v4296_v14  ;;  %v4301_v27 = vpack.c.bf16 %v4109_v20, %v4109_v20  ;;  %v10170_v35 = vpack.c.bf16 %v4272_v11, %v4272_v11 }
0x19be   :  { %v4274_v15 = vpop.f32.mrf.mxu1  ;;  %7158 = vmatpush3.bf16.xpose.msra.mxu0 %v4309_v19  ;;  %v4111_v2 = vpop.f32.mrf.mxu0  ;;  %v4299_v56 = vcombine.high %v4272_v11, %v4272_v11 }
0x19bf   :  { %7163 = vmatprep.subr.bf16.mxu0 %v9299_v1  ;;  %v4355_v28 = vsel %vm1162_vm6, %v4304_v21, 0  ;;  %v4112_v29 = vadd.f32 %v6574_v5, %v4111_v2  ;;  %v4427_v31 = vsel %vm1382_vm7, %v10170_v35, 0 }
0x19c0   :  { %v4422_v39 = vpack.c.bf16 %v4299_v56, %v4299_v56  ;;  %v7689_v56 = vld [vmem:[#allocation70 + $0x30] sm:$0xff]  }
0x19c1   :  { %v4302_v16 = vpack.c.bf16 %v4112_v29, %v4112_v29 }
0x19c2   :  { %v4473_v6 = vsel %vm1382_vm7, %v4422_v39, 0 }
0x19c5   :  { %7160 = vmatmul.mubr.msk.bf16.vlgmr.msra.gmra.mxu0 %vm1162_vm6, %v4301_v27 }
0x19c6   :  { %7164 = vmatpush3.bf16.xpose.msra.mxu0 %v4355_v28  ;;  %7165 = vmatprep.mubr.msk.bf16.mxu0 %vm9300_vm0, %v9299_v1 }
0x19c7   :  { %7169 = vmatprep.subr.bf16.mxu0 %v9299_v1 }
0x19cd   :  { %7166 = vmatmul.mubr.msk.bf16.vlgmr.msra.gmra.mxu0 %vm1162_vm6, %v4302_v16 }
0x19ce   :  { %7170 = vmatpush3.bf16.msra.mxu0 %v4427_v31  ;;  %7171 = vmatprep.mubr.msk.bf16.mxu0 %vm9300_vm0, %v9299_v1 }
0x19cf   :  { %7175 = vmatprep.subr.bf16.mxu0 %v9299_v1 }
0x1a85   :  { %v4345_v34 = vpop.f32.mrf.mxu0 }
0x1a86   :  { %v4397_v8 = vsel %vm1378_vm9, %v4345_v34, -inf }
0x1a87   :  { %4398 = vmax.xlane.f32.xlu1 %v4397_v8  ;;  %v7161_v36 = vpop.f32.mrf.mxu0 }
0x1a89   :  { %v4348_v52 = vpop.f32.mrf.mxu0 }
0x1a8b   :  { %v7162_v26 = vpop.f32.mrf.mxu0 }
0x1a8d   :  { %v4391_v38 = vpop.f32.mrf.mxu0 }
0x1a8e   :  { %v4400_v13 = vsel %vm1378_vm9, %v4391_v38, -inf }
0x1a8f   :  { %4401 = vmax.xlane.f32.xlu0 %v4400_v13  ;;  %v7167_v40 = vpop.f32.mrf.mxu0 }
0x1a91   :  { %v4394_v41 = vpop.f32.mrf.mxu0 }
0x1a93   :  { %v7168_v43 = vpop.f32.mrf.mxu0 }
0x1b10   :  { %v4399_v44 = vpop.xlane.xlu1 %4398 }
0x1b11   :  { %v4403_v47 = vsub.f32 %v4345_v34, %v4399_v44 }
0x1b13   :  { %v4405_v48 = vmul.f32 1.442695, %v4403_v47 }
0x1b15   :  { %7848 = vpow2.f32 %v4405_v48 }
0x1b18   :  { %v4402_v37 = vpop.xlane.xlu0 %4401 }
0x1b19   :  { %v4404_v50 = vsub.f32 %v4391_v38, %v4402_v37 }
0x1b1b   :  { %v4407_v45 = vmul.f32 1.442695, %v4404_v50 }
0x1b1d   :  { %7850 = vpow2.f32 %v4407_v45 }
0x1b22   :  { %v7849_v51 = vpop.eup %7848 }
0x1b23   :  { %v4409_v49 = vsel %vm1378_vm9, %v7849_v51, 0.0 }
0x1b24   :  { %4410 = vadd.xlane.f32.xlu1 %v4409_v49 }
0x1b2a   :  { %v7851_v53 = vpop.eup %7850 }
0x1b2b   :  { %v4412_v22 = vsel %vm1378_vm9, %v7851_v53, 0.0 }
0x1b2c   :  { %4413 = vadd.xlane.f32.xlu0 %v4412_v22 }
0x1b35   :  { %4519 = vrot.lane.b32.xlu1 %v4303_v12, %s9239_s24 }
0x1b39   :  { %4516 = vrot.lane.b32.xlu1 %v4301_v27, %s9239_s24 }
0x1b3d   :  { %4568 = vrot.lane.b32.xlu1 %v4302_v16, %s9239_s24 }
0x1b42   :  { %4571 = vrot.lane.b32.xlu0 %v4304_v21, %s9239_s24 }
0x1bad   :  { %v4411_v54 = vpop.xlane.xlu1 %4410 }
0x1bae   :  { %7852 = vrcp.f32 %v4411_v54 }
0x1bb1   :  { %v4520_v57 = vpop.permute.xlu1 %4519 }
0x1bb2   :  { %v4525_v59 = vsel %vm1162_vm6, %v4520_v57, 0 }
0x1bb5   :  { %v4414_v55 = vpop.xlane.xlu0 %4413  ;;  %v4517_v63 = vpop.permute.xlu1 %4516 }
0x1bb6   :  { %7854 = vrcp.f32 %v4414_v55  ;;  %v7688_v55 = vld [vmem:[#allocation70 + $0x38] sm:$0xff]  }
0x1bb9   :  { %v4572_v60 = vpop.permute.xlu0 %4571  ;;  %v4569_v7 = vpop.permute.xlu1 %4568 }
0x1bba   :  { %v4577_v62 = vsel %vm1162_vm6, %v4572_v60, 0  ;;  %v7690_v60 = vld [vmem:[#allocation70 + $0x28] sm:$0xff]  }
0x1bbb   :  { %v7853_v18 = vpop.eup %7852  ;;  %7188 = vmatpush3.bf16.xpose.msra.mxu1 %v4577_v62  ;;  %v7691_v62 = vld [vmem:[#allocation70 + $0x20] sm:$0xff]  }
0x1bbc   :  { %v4417_v58 = vmul.f32 %v7853_v18, %v7849_v51  ;;  %7199 = vmatprep.subr.bf16.mxu1 %v9299_v1  ;;  %v7692_v18 = vld [vmem:[#allocation70 + $0x18] sm:$0xff]  }
0x1bbe   :  { %v4419_v4 = vpack.c.bf16 %v4417_v58, %v4417_v58 }
0x1bc0   :  { %7172 = vmatmul.mubr.msk.bf16.vlgmr.msra.gmra.mxu0 %vm1378_vm9, %v4419_v4  ;;  %v7695_v4 = vld [vmem:[#allocation70] sm:$0xff]  }
0x1bc1   :  { %7176 = vmatpush3.bf16.msra.mxu0 %v4473_v6  ;;  %7177 = vmatprep.mubr.msk.bf16.mxu0 %vm9300_vm0, %v9299_v1 }
0x1bc2   :  { %7190 = vmatmul.mubr.msk.bf16.vlgmr.msra.gmra.mxu1 %vm1162_vm6, %v4569_v7  ;;  %7181 = vmatprep.subr.bf16.mxu0 %v9299_v1 }
0x1bc3   :  { %v7855_v9 = vpop.eup %7854  ;;  %7201 = vmatprep.mubr.msk.bf16.mxu1 %vm9300_vm0, %v9299_v1 }
0x1bc4   :  { %v4418_v24 = vmul.f32 %v7855_v9, %v7851_v53 }
0x1bc6   :  { %v4420_v10 = vpack.c.bf16 %v4418_v24, %v4418_v24 }
0x1bc8   :  { %7178 = vmatmul.mubr.msk.bf16.vlgmr.msra.gmra.mxu0 %vm1378_vm9, %v4420_v10 }
0x1bc9   :  { %7182 = vmatpush3.bf16.xpose.msra.mxu0 %v4525_v59  ;;  %7183 = vmatprep.mubr.msk.bf16.mxu0 %vm9300_vm0, %v9299_v1 }
0x1bca   :  { %7193 = vmatprep.subr.bf16.mxu0 %v9299_v1 }
0x1bd0   :  { %7184 = vmatmul.mubr.msk.bf16.vlgmr.msra.gmra.mxu0 %vm1162_vm6, %v4517_v63  ;;  %v7693_v63 = vld [vmem:[#allocation70 + $0x10] sm:$0xff]  }
0x1bd1   :  { %7195 = vmatprep.mubr.msk.bf16.mxu0 %vm9300_vm0, %v9299_v1 }
0x1c80   :  { %v10204_v12 = vpop.f32.mrf.mxu0 }
0x1c82   :  { %v7173_v17 = vpop.f32.mrf.mxu0  ;;  %v4613_v3 = vpop.f32.mrf.mxu1 }
0x1c83   :  { %v4622_v5 = vsel %vm1378_vm9, %v4613_v3, -inf }
0x1c84   :  { %4623 = vmax.xlane.f32.xlu1 %v4622_v5  ;;  %v4466_v14 = vpop.f32.mrf.mxu0  ;;  %v7191_v15 = vpop.f32.mrf.mxu1 }
0x1c86   :  { %v7174_v19 = vpop.f32.mrf.mxu0  ;;  %v4616_v20 = vpop.f32.mrf.mxu1 }
0x1c88   :  { %v10207_v21 = vpop.f32.mrf.mxu0  ;;  %v7192_v23 = vpop.f32.mrf.mxu1 }
0x1c8a   :  { %v7179_v27 = vpop.f32.mrf.mxu0 }
0x1c8b   :  { %v6607_v27 = vld [vmem:[#allocation64] ss:$0 sm:$0xff] }
0x1c8c   :  { %v4512_v2 = vpop.f32.mrf.mxu0 }
0x1c8e   :  { %v7180_v11 = vpop.f32.mrf.mxu0 }
0x1c90   :  { %v4561_v28 = vpop.f32.mrf.mxu0 }
0x1c91   :  { %v4619_v29 = vsel %vm1378_vm9, %v4561_v28, -inf }
0x1c92   :  { %4620 = vmax.xlane.f32.xlu0 %v4619_v29  ;;  %v7185_v16 = vpop.f32.mrf.mxu0 }
0x1c94   :  { %v4564_v31 = vpop.f32.mrf.mxu0 }
0x1c95   :  { %4644 = vrot.lane.b32.xlu1 %v10170_v35, %s9239_s24 }
0x1c96   :  { %v7186_v34 = vpop.f32.mrf.mxu0 }
0x1d0d   :  { %v4624_v8 = vpop.xlane.xlu1 %4623 }
0x1d0e   :  { %v4626_v36 = vsub.f32 %v4613_v3, %v4624_v8  ;;  %v7696_v8 = vld [vmem:[#allocation79 + $0xa8] ss:$12 sps:$4 sm:$0xff]  }
0x1d10   :  { %v4629_v52 = vmul.f32 1.442695, %v4626_v36  ;;  %v7699_v36 = vld [vmem:[#allocation79 + $0xb0] ss:$12 sps:$4 sm:$0xff]  }
0x1d11   :  { %v4645_v26 = vpop.permute.xlu1 %4644 }
0x1d12   :  { %7856 = vpow2.f32 %v4629_v52  ;;  %v4650_v38 = vsel %vm1382_vm7, %v4645_v26, 0 }
0x1d13   :  { %7194 = vmatpush3.bf16.msra.mxu0 %v4650_v38 }
0x1d14   :  { %7205 = vmatprep.subr.bf16.mxu0 %v9299_v1 }
0x1d1b   :  { %v4621_v13 = vpop.xlane.xlu0 %4620 }
0x1d1c   :  { %v4625_v40 = vsub.f32 %v4561_v28, %v4621_v13 }
0x1d1e   :  { %v4627_v41 = vmul.f32 1.442695, %v4625_v40 }
0x1d1f   :  { %v7857_v43 = vpop.eup %7856 }
0x1d20   :  { %7858 = vpow2.f32 %v4627_v41  ;;  %v4634_v44 = vsel %vm1378_vm9, %v7857_v43, 0.0 }
0x1d21   :  { %4635 = vadd.xlane.f32.xlu0 %v4634_v44  ;;  %v7700_v44 = vld [vmem:[#allocation79 + $0x90] ss:$12 sps:$4 sm:$0xff]  }
0x1d2d   :  { %v7859_v35 = vpop.eup %7858 }
0x1d2e   :  { %v4631_v47 = vsel %vm1378_vm9, %v7859_v35, 0.0 }
0x1d2f   :  { %4632 = vadd.xlane.f32.xlu0 %v4631_v47  ;;  %v7706_v47 = vld [vmem:[#allocation79 + $0x7c] ss:$12 sps:$4 sm:$0xff]  }
0x1d45   :  { %4693 = vrot.lane.b32.xlu0 %v4422_v39, %s9239_s24  ;;  %v7694_v39 = vld [vmem:[#allocation70 + $0x8] sm:$0xff]  }
0x1daa   :  { %v4636_v48 = vpop.xlane.xlu0 %4635 }
0x1dab   :  { %7860 = vrcp.f32 %v4636_v48  ;;  %v7704_v48 = vld [vmem:[#allocation79 + $0x78] ss:$12 sps:$4 sm:$0xff]  }
0x1db8   :  { %v7861_v37 = vpop.eup %7860  ;;  %v4633_v50 = vpop.xlane.xlu0 %4632 }
0x1db9   :  { %7862 = vrcp.f32 %v4633_v50  ;;  %v4640_v45 = vmul.f32 %v7861_v37, %v7857_v43  ;;  %v7702_v43 = vld [vmem:[#allocation79 + $0x94] ss:$12 sps:$4 sm:$0xff]  }
0x1dba   :  { %v7707_v37 = vld [vmem:[#allocation79 + $0x80] ss:$12 sps:$4 sm:$0xff]  }
0x1dbb   :  { %v4642_v53 = vpack.c.bf16 %v4640_v45, %v4640_v45  ;;  %v7708_v50 = vld [vmem:[#allocation79 + $0x60] ss:$12 sps:$4 sm:$0xff]   ;;  %v7710_v45 = vld [vmem:[#allocation79 + $0x64] ss:$12 sps:$4 sm:$0xff]  }
0x1dbc   :  { %v4694_v51 = vpop.permute.xlu0 %4693 }
0x1dbd   :  { %v4699_v49 = vsel %vm1382_vm7, %v4694_v51, 0  ;;  %v7711_v51 = vld [vmem:[#allocation79 + $0x68] ss:$12 sps:$4 sm:$0xff]  }
0x1dbe   :  { %7200 = vmatpush3.bf16.msra.mxu1 %v4699_v49  ;;  %v7714_v49 = vld [vmem:[#allocation79 + $0x4c] ss:$12 sps:$4 sm:$0xff]  }
0x1dc1   :  { %7202 = vmatmul.mubr.msk.bf16.vlgmr.msra.gmra.mxu1 %vm1378_vm9, %v4642_v53  ;;  %v7712_v53 = vld [vmem:[#allocation79 + $0x48] ss:$12 sps:$4 sm:$0xff]  }
0x1dc2   :  { %5097 = vmatprep.mubr.bf16.mxu1 %v9298_v0 }
0x1dc6   :  { %v7863_v22 = vpop.eup %7862 }
0x1dc7   :  { %v4639_v54 = vmul.f32 %v7863_v22, %v7859_v35  ;;  %v7703_v35 = vld [vmem:[#allocation79 + $0x98] ss:$12 sps:$4 sm:$0xff]   ;;  %v7715_v22 = vld [vmem:[#allocation79 + $0x50] ss:$12 sps:$4 sm:$0xff]  }
0x1dc9   :  { %v4641_v57 = vpack.c.bf16 %v4639_v54, %v4639_v54  ;;  %v7718_v54 = vld [vmem:[#allocation79 + $0x34] ss:$12 sps:$4 sm:$0xff]  }
0x1dcb   :  { %7196 = vmatmul.mubr.msk.bf16.vlgmr.msra.gmra.mxu0 %vm1378_vm9, %v4641_v57  ;;  %v7716_v57 = vld [vmem:[#allocation79 + $0x30] ss:$12 sps:$4 sm:$0xff]  }
0x1dcc   :  { %7221 = vmatprep.mubr.msk.bf16.mxu0 %vm9300_vm0, %v9299_v1  ;;  %7206 = vmatpush3.bf16.msra.mxu0 %v7688_v55  ;;  %v7719_v55 = vld [vmem:[#allocation79 + $0x38] ss:$12 sps:$4 sm:$0xff]  }
0x1dcd   :  { %7207 = vmatprep.subr.bf16.mxu0 %v9299_v1 }
0x1dd0   :  { %7208 = vmatpush3.bf16.msra.mxu0 %v7689_v56  ;;  %v7722_v56 = vld [vmem:[#allocation79 + $0x1c] ss:$12 sps:$4 sm:$0xff]  }
0x1dd1   :  { %7209 = vmatprep.subr.bf16.mxu0 %v9299_v1 }
0x1dd4   :  { %7210 = vmatpush3.bf16.msra.mxu0 %v7690_v60  ;;  %v7720_v60 = vld [vmem:[#allocation79 + $0x18] ss:$12 sps:$4 sm:$0xff]  }
0x1dd5   :  { %7211 = vmatprep.subr.bf16.mxu0 %v9299_v1 }
0x1dd8   :  { %7212 = vmatpush3.bf16.msra.mxu0 %v7691_v62  ;;  %v7723_v62 = vld [vmem:[#allocation79 + $0x20] ss:$12 sps:$4 sm:$0xff]  }
0x1dd9   :  { %7213 = vmatprep.subr.bf16.mxu0 %v9299_v1 }
0x1ddc   :  { %7214 = vmatpush3.bf16.msra.mxu0 %v7692_v18  ;;  %v7726_v18 = vld [vmem:[#allocation79 + $0x4] ss:$12 sps:$4 sm:$0xff]  }
0x1ddd   :  { %7215 = vmatprep.subr.bf16.mxu0 %v9299_v1 }
0x1de0   :  { %7216 = vmatpush3.bf16.msra.mxu0 %v7693_v63  ;;  %v7724_v63 = vld [vmem:[#allocation79] ss:$12 sps:$4 sm:$0xff]  }
0x1de1   :  { %7217 = vmatprep.subr.bf16.mxu0 %v9299_v1 }
0x1de4   :  { %7218 = vmatpush3.bf16.msra.mxu0 %v7694_v39  ;;  %v7727_v39 = vld [vmem:[#allocation79 + $0x8] ss:$12 sps:$4 sm:$0xff]  }
0x1de5   :  { %7219 = vmatprep.subr.bf16.mxu0 %v9299_v1 }
0x1de8   :  { %7220 = vmatpush3.bf16.msra.mxu0 %v7695_v4 }
0x1de9   :  { %7225 = vmatprep.subr.bf16.mxu0 %v9299_v1 }
0x1e81   :  { %v4735_v58 = vpop.f32.mrf.mxu1 }
0x1e83   :  { %v7203_v6 = vpop.f32.mrf.mxu1 }
0x1e85   :  { %v4738_v7 = vpop.f32.mrf.mxu1 }
0x1e87   :  { %v7204_v9 = vpop.f32.mrf.mxu1 }
0x1e8b   :  { %v4686_v24 = vpop.f32.mrf.mxu0 }
0x1e8c   :  { %v7479_v10 = vpack.i.bf16 %v4735_v58, %v4686_v24 }
0x1e8d   :  { %v7197_v59 = vpop.f32.mrf.mxu0 }
0x1e8e   :  { %7480 = vrot.lane.b32.xlu1 %v7479_v10, %s9239_s24 }
0x1e8f   :  { %v4689_v17 = vpop.f32.mrf.mxu0 }
0x1e90   :  { %v6616_v17 = vld [vmem:[#allocation68] ss:$0 sm:$0xff] }
0x1e91   :  { %v7198_v3 = vpop.f32.mrf.mxu0 }
0x1f00   :  { %v7481_v5 = vpop.permute.xlu1 %7480 }
0x1f01   :  { %v7483_v14 = vunpack.i.h.bf16 %v7481_v5  ;;  %v7482_v15 = vunpack.i.l.bf16 %v7481_v5 }
0x1f03   :  { %v4750_v19 = vsel %vm1162_vm6, %v10207_v21, %v7483_v14  ;;  %v4749_v20 = vsel %vm1162_vm6, %v10204_v12, %v7482_v15  ;;  %v7698_v12 = vld [vmem:[#allocation79 + $0xac] ss:$12 sps:$4 sm:$0xff]   ;;  %v6617_v15 = vld [vmem:[#allocation67] ss:$0 sm:$0xff] }
0x1f04   :  { %v4751_v23 = vpack.c.bf16 %v4750_v19, %v4749_v20  ;;  %5065 = vmatprep.subr.bf16.mxu1 %v7698_v12 }
0x1f05   :  { %5066 = vmatpush1.bf16.msra.mxu1 %v7696_v8 }
0x1f06   :  { %7222 = vmatmul.mubr.bf16.vlgmr.msra.gmra.mxu0 %v4751_v23  ;;  %5067 = vmatprep.subr.bf16.mxu1 %v7702_v43 }
0x1f07   :  { %7241 = vmatprep.mubr.msk.bf16.mxu0 %vm9300_vm0, %v9299_v1  ;;  %7226 = vmatpush3.bf16.msra.mxu0 %v7699_v36 }
0x1f08   :  { %7227 = vmatprep.subr.bf16.mxu0 %v9299_v1 }
0x1f09   :  { %5068 = vmatpush1.bf16.msra.mxu1 %v7700_v44 }
0x1f0a   :  { %5069 = vmatprep.subr.bf16.mxu1 %v7706_v47 }
0x1f0b   :  { %7228 = vmatpush3.bf16.msra.mxu0 %v7703_v35 }
0x1f0c   :  { %7229 = vmatprep.subr.bf16.mxu0 %v9299_v1 }
0x1f0d   :  { %5070 = vmatpush1.bf16.msra.mxu1 %v7704_v48 }
0x1f0e   :  { %5071 = vmatprep.subr.bf16.mxu1 %v7710_v45 }
0x1f0f   :  { %7230 = vmatpush3.bf16.msra.mxu0 %v7707_v37 }
0x1f10   :  { %7231 = vmatprep.subr.bf16.mxu0 %v9299_v1 }
0x1f11   :  { %5072 = vmatpush1.bf16.msra.mxu1 %v7708_v50 }
0x1f12   :  { %5073 = vmatprep.subr.bf16.mxu1 %v7714_v49 }
0x1f13   :  { %7232 = vmatpush3.bf16.msra.mxu0 %v7711_v51 }
0x1f14   :  { %7233 = vmatprep.subr.bf16.mxu0 %v9299_v1 }
0x1f15   :  { %5074 = vmatpush1.bf16.msra.mxu1 %v7712_v53 }
0x1f16   :  { %5075 = vmatprep.subr.bf16.mxu1 %v7718_v54 }
0x1f17   :  { %7234 = vmatpush3.bf16.msra.mxu0 %v7715_v22 }
0x1f18   :  { %7235 = vmatprep.subr.bf16.mxu0 %v9299_v1 }
0x1f19   :  { %5076 = vmatpush1.bf16.msra.mxu1 %v7716_v57 }
0x1f1a   :  { %5077 = vmatprep.subr.bf16.mxu1 %v7722_v56 }
0x1f1b   :  { %7236 = vmatpush3.bf16.msra.mxu0 %v7719_v55 }
0x1f1c   :  { %7237 = vmatprep.subr.bf16.mxu0 %v9299_v1 }
0x1f1d   :  { %5078 = vmatpush1.bf16.msra.mxu1 %v7720_v60 }
0x1f1e   :  { %5079 = vmatprep.subr.bf16.mxu1 %v7726_v18 }
0x1f1f   :  { %7238 = vmatpush3.bf16.msra.mxu0 %v7723_v62 }
0x1f20   :  { %7239 = vmatprep.subr.bf16.mxu0 %v9299_v1 }
0x1f21   :  { %5080 = vmatpush1.bf16.msra.mxu1 %v7724_v63 }
0x1f22   :  { %7245 = vmatprep.subr.bf16.mxu1 %v9299_v1 }
0x1f23   :  { %7240 = vmatpush3.bf16.msra.mxu0 %v7727_v39 }
0x1f24   :  { %7269 = vmatprep.subr.bf16.mxu0 %v9299_v1 }
0x1fc6   :  { %v4840_v2 = vpop.f32.mrf.mxu0 }
0x1fc7   :  { %v4841_v11 = vadd.f32 %v6607_v27, %v4840_v2  ;;  %v4920_v2 = vld [vmem:[%s10484_s22] sm:$0x7] }
0x1fc8   :  { %v7223_v28 = vpop.f32.mrf.mxu0  ;;  %v4925_v36 = vrot.slane %v4920_v2, %v9813_v32 }
0x1fc9   :  { %v4847_v29 = vadd.f32 %v4841_v11, %v10149_v25  ;;  %v4929_v11 = vrot.slane %v4920_v2, %v9816_v33 }
0x1fca   :  { %v4843_v16 = vpop.f32.mrf.mxu0 }
0x1fcb   :  { %v4844_v31 = vadd.f32 %v6607_v27, %v4843_v16  ;;  %4849 = vadd.xlane.f32.xlu1 %v4847_v29 }
0x1fcc   :  { %v7224_v34 = vpop.f32.mrf.mxu0 }
0x1fcd   :  { %v4848_v21 = vadd.f32 %v4844_v31, %v10151_v30  ;;  %v4933_v34 = vrot.slane %v4920_v2, %v9864_v61 }
0x1fcf   :  { %4851 = vadd.xlane.f32.xlu0 %v4848_v21 }
0x2054   :  { %v4850_v52 = vpop.xlane.xlu1 %4849 }
0x2055   :  { %v4853_v26 = vmul.f32 0.0078125, %v4850_v52 }
0x2057   :  { %v10241_v38 = vsub.f32 %v4847_v29, %v4853_v26 }
0x2058   :  { %v4852_v25 = vpop.xlane.xlu0 %4851 }
0x2059   :  { %v4854_v13 = vmul.f32 0.0078125, %v4852_v25  ;;  %v4857_v40 = vmul.f32 %v10241_v38, %v10241_v38 }
0x205b   :  { %v10245_v41 = vsub.f32 %v4848_v21, %v4854_v13  ;;  %4859 = vadd.xlane.f32.xlu0 %v4857_v40 }
0x205d   :  { %v4858_v30 = vmul.f32 %v10245_v41, %v10245_v41 }
0x205f   :  { %4861 = vadd.xlane.f32.xlu1 %v4858_v30 }
0x20e4   :  { %v4860_v58 = vpop.xlane.xlu0 %4859 }
0x20e5   :  { %v4863_v4 = vmul.f32 0.0078125, %v4860_v58 }
0x20e7   :  { %v4865_v6 = vadd.f32 1e-12, %v4863_v4 }
0x20e8   :  { %v4862_v7 = vpop.xlane.xlu1 %4861 }
0x20e9   :  { %7864 = vrsqrt.f32 %v4865_v6  ;;  %v4864_v9 = vmul.f32 0.0078125, %v4862_v7 }
0x20eb   :  { %v4866_v24 = vadd.f32 1e-12, %v4864_v9 }
0x20ed   :  { %7866 = vrsqrt.f32 %v4866_v24 }
0x20f6   :  { %v7865_v10 = vpop.eup %7864 }
0x20f7   :  { %v4869_v59 = vmul.f32 %v7865_v10, %v10241_v38 }
0x20f9   :  { %v4877_v14 = vmul.f32 %v6616_v17, %v4869_v59 }
0x20fa   :  { %v7867_v3 = vpop.eup %7866 }
0x20fb   :  { %v4870_v5 = vmul.f32 %v7867_v3, %v10245_v41  ;;  %v10259_v20 = vadd.f32 %v6617_v15, %v4877_v14 }
0x20fd   :  { %v4878_v19 = vmul.f32 %v6616_v17, %v4870_v5 }
0x20ff   :  { %v10261_v23 = vadd.f32 %v6617_v15, %v4878_v19 }
0x2101   :  { %v4919_v27 = vpack.c.bf16 %v10261_v23, %v10259_v20 }
0x2103   :  { %5098 = vmatmul.mubr.bf16.vlgmr.msra.gmra.mxu1 %v4919_v27  ;;  %7242 = vmatmul.mubr.bf16.vlgmr.msra.gmra.mxu0 %v4919_v27 }
0x2104   :  { %7247 = vmatprep.mubr.msk.bf16.mxu1 %vm9300_vm0, %v9299_v1  ;;  %7271 = vmatprep.mubr.msk.bf16.mxu0 %vm9300_vm0, %v9299_v1 }
0x21c3   :  { %v5099_v28 = vpop.f32.mrf.mxu1  ;;  %v5142_v29 = vpop.f32.mrf.mxu0 }
0x21c4   :  { %v5100_v41 = vadd.f32 %v5099_v28, %v4925_v36  ;;  %v5143_v61 = vadd.f32 %v5142_v29, %v4933_v34 }
0x21c5   :  { %v5101_v16 = vpop.f32.mrf.mxu1  ;;  %v7243_v31 = vpop.f32.mrf.mxu0 }
0x21c6   :  { %v5102_v21 = vadd.f32 %v5101_v16, %v4929_v11  ;;  %v5168_v43 = vpack.c.bf16 %v5100_v41, %v5100_v41  ;;  %v10282_v47 = vpack.c.bf16 %v5143_v61, %v5143_v61 }
0x21c7   :  { %v5103_v8 = vpop.f32.mrf.mxu1  ;;  %v5145_v12 = vpop.f32.mrf.mxu0 }
0x21c8   :  { %v5170_v52 = vpack.c.bf16 %v5102_v21, %v5102_v21  ;;  %v10273_v26 = vadd.f32 %v5145_v12, %v4933_v34  ;;  %v5104_v35 = vadd.f32 %v5103_v8, %v4925_v36  ;;  %v5294_v37 = vsel %vm1898_vm10, %v10282_v47, 0 }
0x21c9   :  { %v5105_v38 = vpop.f32.mrf.mxu1  ;;  %v7244_v25 = vpop.f32.mrf.mxu0 }
0x21ca   :  { %v5176_v13 = vsel %vm1162_vm6, %v5170_v52, 0  ;;  %v5106_v40 = vadd.f32 %v5105_v38, %v4929_v11  ;;  %v5169_v48 = vpack.c.bf16 %v5104_v35, %v5104_v35  ;;  %v5289_v19 = vpack.c.bf16 %v10273_v26, %v10273_v26 }
0x21cb   :  { %7246 = vmatpush3.bf16.xpose.msra.mxu1 %v5176_v13 }
0x21cc   :  { %7251 = vmatprep.subr.bf16.mxu1 %v9299_v1  ;;  %v5171_v30 = vpack.c.bf16 %v5106_v40, %v5106_v40  ;;  %v5340_v28 = vsel %vm1898_vm10, %v5289_v19, 0 }
0x21ce   :  { %v5222_v44 = vsel %vm1162_vm6, %v5171_v30, 0 }
0x21d2   :  { %7248 = vmatmul.mubr.msk.bf16.vlgmr.msra.gmra.mxu1 %vm1162_vm6, %v5168_v43 }
0x21d3   :  { %7252 = vmatpush3.bf16.xpose.msra.mxu1 %v5222_v44  ;;  %7253 = vmatprep.mubr.msk.bf16.mxu1 %vm9300_vm0, %v9299_v1 }
0x21d4   :  { %7257 = vmatprep.subr.bf16.mxu1 %v9299_v1 }
0x21da   :  { %7254 = vmatmul.mubr.msk.bf16.vlgmr.msra.gmra.mxu1 %vm1162_vm6, %v5169_v48 }
0x21db   :  { %7258 = vmatpush3.bf16.msra.mxu1 %v5294_v37  ;;  %7259 = vmatprep.mubr.msk.bf16.mxu1 %vm9300_vm0, %v9299_v1 }
0x21dc   :  { %7263 = vmatprep.subr.bf16.mxu1 %v9299_v1 }
0x2292   :  { %v5212_v50 = vpop.f32.mrf.mxu1 }
0x2293   :  { %v5213_v45 = vadd.f32 %v5212_v50, %v9895_v42 }
0x2294   :  { %v7249_v51 = vpop.f32.mrf.mxu1 }
0x2295   :  { %v5264_v49 = vsel %vm1868_vm11, %v5213_v45, -inf }
0x2296   :  { %5265 = vmax.xlane.f32.xlu0 %v5264_v49  ;;  %v5215_v53 = vpop.f32.mrf.mxu1 }
0x2298   :  { %v7250_v22 = vpop.f32.mrf.mxu1 }
0x229a   :  { %v5258_v54 = vpop.f32.mrf.mxu1 }
0x229b   :  { %v5259_v57 = vadd.f32 %v5258_v54, %v9899_v46 }
0x229c   :  { %v7255_v55 = vpop.f32.mrf.mxu1 }
0x229d   :  { %v5267_v56 = vsel %vm1868_vm11, %v5259_v57, -inf }
0x229e   :  { %5268 = vmax.xlane.f32.xlu1 %v5267_v56  ;;  %v5261_v60 = vpop.f32.mrf.mxu1 }
0x22a0   :  { %v7256_v62 = vpop.f32.mrf.mxu1 }
0x231f   :  { %v5266_v18 = vpop.xlane.xlu0 %5265 }
0x2320   :  { %v5270_v63 = vsub.f32 %v5213_v45, %v5266_v18 }
0x2322   :  { %v5272_v39 = vmul.f32 1.442695, %v5270_v63 }
0x2324   :  { %7868 = vpow2.f32 %v5272_v39 }
0x2327   :  { %v5269_v58 = vpop.xlane.xlu1 %5268 }
0x2328   :  { %v5271_v4 = vsub.f32 %v5259_v57, %v5269_v58 }
0x232a   :  { %v5274_v6 = vmul.f32 1.442695, %v5271_v4 }
0x232c   :  { %7870 = vpow2.f32 %v5274_v6 }
0x2331   :  { %v7869_v7 = vpop.eup %7868 }
0x2332   :  { %v5276_v9 = vsel %vm1868_vm11, %v7869_v7, 0.0 }
0x2333   :  { %5277 = vadd.xlane.f32.xlu0 %v5276_v9 }
0x2339   :  { %v7871_v24 = vpop.eup %7870 }
0x233a   :  { %v5279_v10 = vsel %vm1868_vm11, %v7871_v24, 0.0 }
0x233b   :  { %5280 = vadd.xlane.f32.xlu1 %v5279_v10 }
0x2349   :  { %5386 = vrot.lane.b32.xlu0 %v5170_v52, %s9239_s24 }
0x234c   :  { %5438 = vrot.lane.b32.xlu1 %v5171_v30, %s9239_s24 }
0x234d   :  { %5435 = vrot.lane.b32.xlu0 %v5169_v48, %s9239_s24 }
0x2350   :  { %5383 = vrot.lane.b32.xlu1 %v5168_v43, %s9239_s24 }
0x23bc   :  { %v5278_v59 = vpop.xlane.xlu0 %5277 }
0x23bd   :  { %7872 = vrcp.f32 %v5278_v59  ;;  %v7728_v59 = vld [vmem:[#allocation77 + $0x38] sm:$0xff]  }
0x23c0   :  { %v5387_v17 = vpop.permute.xlu0 %5386 }
0x23c1   :  { %v5392_v3 = vsel %vm1162_vm6, %v5387_v17, 0  ;;  %v7729_v17 = vld [vmem:[#allocation77 + $0x30] sm:$0xff]  }
0x23c2   :  { %7270 = vmatpush3.bf16.xpose.msra.mxu0 %v5392_v3  ;;  %v7730_v3 = vld [vmem:[#allocation77 + $0x28] sm:$0xff]  }
0x23c3   :  { %7281 = vmatprep.subr.bf16.mxu0 %v9299_v1 }
0x23c4   :  { %v5281_v5 = vpop.xlane.xlu1 %5280  ;;  %v5436_v21 = vpop.permute.xlu0 %5435 }
0x23c5   :  { %7874 = vrcp.f32 %v5281_v5  ;;  %v7731_v5 = vld [vmem:[#allocation77 + $0x20] sm:$0xff]  }
0x23c8   :  { %v5439_v14 = vpop.permute.xlu1 %5438 }
0x23c9   :  { %v5444_v34 = vsel %vm1162_vm6, %v5439_v14, 0  ;;  %v7732_v14 = vld [vmem:[#allocation77 + $0x18] sm:$0xff]  }
0x23ca   :  { %v7873_v15 = vpop.eup %7872 }
0x23cb   :  { %v5284_v27 = vmul.f32 %v7873_v15, %v7869_v7  ;;  %v7733_v15 = vld [vmem:[#allocation77 + $0x10] sm:$0xff]  }
0x23cc   :  { %v5384_v2 = vpop.permute.xlu1 %5383 }
0x23cd   :  { %7272 = vmatmul.mubr.msk.bf16.vlgmr.msra.gmra.mxu0 %vm1162_vm6, %v5384_v2  ;;  %v5286_v11 = vpack.c.bf16 %v5284_v27, %v5284_v27 }
0x23ce   :  { %7283 = vmatprep.mubr.msk.bf16.mxu0 %vm9300_vm0, %v9299_v1 }
0x23cf   :  { %7260 = vmatmul.mubr.msk.bf16.vlgmr.msra.gmra.mxu1 %vm1868_vm11, %v5286_v11 }
0x23d0   :  { %7264 = vmatpush3.bf16.msra.mxu1 %v5340_v28  ;;  %7265 = vmatprep.mubr.msk.bf16.mxu1 %vm9300_vm0, %v9299_v1  ;;  %v7735_v28 = vld [vmem:[#allocation77] sm:$0xff]  }
0x23d1   :  { %7275 = vmatprep.subr.bf16.mxu1 %v9299_v1 }
0x23d2   :  { %v7875_v29 = vpop.eup %7874 }
0x23d3   :  { %v5285_v16 = vmul.f32 %v7875_v29, %v7871_v24 }
0x23d5   :  { %v5287_v31 = vpack.c.bf16 %v5285_v16, %v5285_v16 }
0x23d7   :  { %7266 = vmatmul.mubr.msk.bf16.vlgmr.msra.gmra.mxu1 %vm1868_vm11, %v5287_v31 }
0x23d8   :  { %7276 = vmatpush3.bf16.xpose.msra.mxu1 %v5444_v34  ;;  %7277 = vmatprep.mubr.msk.bf16.mxu1 %vm9300_vm0, %v9299_v1 }
0x23d9   :  { %7287 = vmatprep.subr.bf16.mxu1 %v9299_v1 }
0x23df   :  { %7278 = vmatmul.mubr.msk.bf16.vlgmr.msra.gmra.mxu1 %vm1162_vm6, %v5436_v21 }
0x23e0   :  { %7289 = vmatprep.mubr.msk.bf16.mxu1 %vm9300_vm0, %v9299_v1 }
0x248d   :  { %v5428_v8 = vpop.f32.mrf.mxu0 }
0x248e   :  { %v5429_v12 = vadd.f32 %v5428_v8, %v9895_v42 }
0x248f   :  { %v10321_v36 = vpop.f32.mrf.mxu1  ;;  %v7273_v52 = vpop.f32.mrf.mxu0 }
0x2490   :  { %v5486_v26 = vsel %vm1868_vm11, %v5429_v12, -inf }
0x2491   :  { %v7261_v38 = vpop.f32.mrf.mxu1  ;;  %5487 = vmax.xlane.f32.xlu1 %v5486_v26  ;;  %v5431_v25 = vpop.f32.mrf.mxu0 }
0x2493   :  { %v5333_v13 = vpop.f32.mrf.mxu1  ;;  %v7274_v40 = vpop.f32.mrf.mxu0 }
0x2494   :  { %v6650_v13 = vld [vmem:[#allocation73] ss:$0 sm:$0xff] }
0x2495   :  { %v7262_v41 = vpop.f32.mrf.mxu1 }
0x2497   :  { %v10324_v30 = vpop.f32.mrf.mxu1 }
0x2499   :  { %v7267_v43 = vpop.f32.mrf.mxu1 }
0x249b   :  { %v5379_v61 = vpop.f32.mrf.mxu1 }
0x249d   :  { %v7268_v44 = vpop.f32.mrf.mxu1 }
0x249f   :  { %v5480_v35 = vpop.f32.mrf.mxu1 }
0x24a0   :  { %v5481_v48 = vadd.f32 %v5480_v35, %v9899_v46 }
0x24a1   :  { %v7279_v42 = vpop.f32.mrf.mxu1 }
0x24a2   :  { %v5489_v37 = vsel %vm1868_vm11, %v5481_v48, -inf }
0x24a3   :  { %5490 = vmax.xlane.f32.xlu0 %v5489_v37  ;;  %v5483_v50 = vpop.f32.mrf.mxu1  ;;  %v7736_v37 = vld [vmem:[#allocation83 + $0x70] ss:$8 sps:$4 sm:$0xff]  }
0x24a5   :  { %v7280_v45 = vpop.f32.mrf.mxu1 }
0x251a   :  { %v5488_v51 = vpop.xlane.xlu1 %5487 }
0x251b   :  { %v5492_v49 = vsub.f32 %v5429_v12, %v5488_v51 }
0x251d   :  { %v5494_v53 = vmul.f32 1.442695, %v5492_v49 }
0x251f   :  { %7876 = vpow2.f32 %v5494_v53 }
0x252c   :  { %v7877_v22 = vpop.eup %7876  ;;  %v5491_v54 = vpop.xlane.xlu0 %5490 }
0x252d   :  { %v5493_v57 = vsub.f32 %v5481_v48, %v5491_v54  ;;  %v5498_v55 = vsel %vm1868_vm11, %v7877_v22, 0.0  ;;  %v7741_v54 = vld [vmem:[#allocation83 + $0x64] ss:$8 sps:$4 sm:$0xff]  }
0x252e   :  { %5499 = vadd.xlane.f32.xlu0 %v5498_v55  ;;  %v7742_v55 = vld [vmem:[#allocation83 + $0x50] ss:$8 sps:$4 sm:$0xff]  }
0x252f   :  { %v5496_v56 = vmul.f32 1.442695, %v5493_v57  ;;  %v7739_v57 = vld [vmem:[#allocation83 + $0x60] ss:$8 sps:$4 sm:$0xff]  }
0x2531   :  { %7878 = vpow2.f32 %v5496_v56  ;;  %v7745_v56 = vld [vmem:[#allocation83 + $0x40] ss:$8 sps:$4 sm:$0xff]  }
0x253e   :  { %v7879_v60 = vpop.eup %7878 }
0x253f   :  { %v5501_v46 = vsel %vm1868_vm11, %v7879_v60, 0.0 }
0x2540   :  { %5502 = vadd.xlane.f32.xlu1 %v5501_v46  ;;  %v7750_v46 = vld [vmem:[#allocation83 + $0x34] ss:$8 sps:$4 sm:$0xff]  }
0x2544   :  { %5511 = vrot.lane.b32.xlu0 %v10282_v47, %s9239_s24 }
0x2551   :  { %5560 = vrot.lane.b32.xlu1 %v5289_v19, %s9239_s24 }
0x25b7   :  { %v5500_v62 = vpop.xlane.xlu0 %5499 }
0x25b8   :  { %7880 = vrcp.f32 %v5500_v62  ;;  %v7748_v62 = vld [vmem:[#allocation83 + $0x30] ss:$8 sps:$4 sm:$0xff]  }
0x25bb   :  { %v5512_v18 = vpop.permute.xlu0 %5511 }
0x25bc   :  { %v5517_v63 = vsel %vm1898_vm10, %v5512_v18, 0  ;;  %v7753_v18 = vld [vmem:[#allocation83 + $0x24] ss:$8 sps:$4 sm:$0xff]  }
0x25bd   :  { %7282 = vmatpush3.bf16.msra.mxu0 %v5517_v63  ;;  %v7751_v63 = vld [vmem:[#allocation83 + $0x20] ss:$8 sps:$4 sm:$0xff]  }
0x25be   :  { %7293 = vmatprep.subr.bf16.mxu0 %v9299_v1 }
0x25c5   :  { %v7881_v39 = vpop.eup %7880 }
0x25c6   :  { %v5506_v58 = vmul.f32 %v7881_v39, %v7877_v22  ;;  %v7756_v39 = vld [vmem:[#allocation83 + $0x14] ss:$8 sps:$4 sm:$0xff]  }
0x25c8   :  { %v5508_v4 = vpack.c.bf16 %v5506_v58, %v5506_v58  ;;  %v7754_v58 = vld [vmem:[#allocation83 + $0x10] ss:$8 sps:$4 sm:$0xff]  }
0x25c9   :  { %v5503_v6 = vpop.xlane.xlu1 %5502 }
0x25ca   :  { %7882 = vrcp.f32 %v5503_v6  ;;  %7284 = vmatmul.mubr.msk.bf16.vlgmr.msra.gmra.mxu0 %vm1868_vm11, %v5508_v4  ;;  %v7759_v4 = vld [vmem:[#allocation83 + $0x4] ss:$8 sps:$4 sm:$0xff]   ;;  %v7757_v6 = vld [vmem:[#allocation83] ss:$8 sps:$4 sm:$0xff]  }
0x25cb   :  { %7309 = vmatprep.mubr.msk.bf16.mxu0 %vm9300_vm0, %v9299_v1  ;;  %7294 = vmatpush3.bf16.msra.mxu0 %v7728_v59 }
0x25cc   :  { %7295 = vmatprep.subr.bf16.mxu0 %v9299_v1 }
0x25cd   :  { %v5561_v47 = vpop.permute.xlu1 %5560 }
0x25ce   :  { %v5566_v7 = vsel %vm1898_vm10, %v5561_v47, 0 }
0x25cf   :  { %7288 = vmatpush3.bf16.msra.mxu1 %v5566_v7  ;;  %7296 = vmatpush3.bf16.msra.mxu0 %v7729_v17 }
0x25d0   :  { %7297 = vmatprep.subr.bf16.mxu0 %v9299_v1 }
0x25d3   :  { %7298 = vmatpush3.bf16.msra.mxu0 %v7730_v3 }
0x25d4   :  { %7299 = vmatprep.subr.bf16.mxu0 %v9299_v1 }
0x25d7   :  { %v7883_v9 = vpop.eup %7882  ;;  %7300 = vmatpush3.bf16.msra.mxu0 %v7731_v5  ;;  %v6659_v5 = vld [vmem:[#allocation76] ss:$0 sm:$0xff] }
0x25d8   :  { %v5507_v24 = vmul.f32 %v7883_v9, %v7879_v60  ;;  %7301 = vmatprep.subr.bf16.mxu0 %v9299_v1  ;;  %v7747_v60 = vld [vmem:[#allocation83 + $0x44] ss:$8 sps:$4 sm:$0xff]  }
0x25da   :  { %v5509_v10 = vpack.c.bf16 %v5507_v24, %v5507_v24 }
0x25db   :  { %7302 = vmatpush3.bf16.msra.mxu0 %v7732_v14 }
0x25dc   :  { %7290 = vmatmul.mubr.msk.bf16.vlgmr.msra.gmra.mxu1 %vm1868_vm11, %v5509_v10  ;;  %7303 = vmatprep.subr.bf16.mxu0 %v9299_v1 }
0x25dd   :  { %5895 = vmatprep.mubr.bf16.mxu1 %v9298_v0  ;;  %v7734_v0 = vld [vmem:[#allocation77 + $0x8] sm:$0xff]  }
0x25df   :  { %7304 = vmatpush3.bf16.msra.mxu0 %v7733_v15 }
0x25e0   :  { %7305 = vmatprep.subr.bf16.mxu0 %v9299_v1 }
0x25e3   :  { %7306 = vmatpush3.bf16.msra.mxu0 %v7734_v0 }
0x25e4   :  { %7307 = vmatprep.subr.bf16.mxu0 %v9299_v1 }
0x25e7   :  { %7308 = vmatpush3.bf16.msra.mxu0 %v7735_v28 }
0x268a   :  { %v5553_v19 = vpop.f32.mrf.mxu0 }
0x268c   :  { %v7285_v27 = vpop.f32.mrf.mxu0 }
0x268e   :  { %v5556_v2 = vpop.f32.mrf.mxu0 }
0x2690   :  { %v7286_v11 = vpop.f32.mrf.mxu0 }
0x269c   :  { %v5602_v29 = vpop.f32.mrf.mxu1 }
0x269d   :  { %v7484_v16 = vpack.i.bf16 %v5602_v29, %v5553_v19  ;;  %v6660_v19 = vld [vmem:[#allocation74] ss:$0 sm:$0xff] }
0x269e   :  { %v7291_v31 = vpop.f32.mrf.mxu1  ;;  %v7760_v29 = vld [vmem:[#allocation85 + $0x78] sm:$0xff]  }
0x269f   :  { %7485 = vrot.lane.b32.xlu1 %v7484_v16, %s9239_s24  ;;  %v7761_v16 = vld [vmem:[#allocation85 + $0x38] sm:$0xff]   ;;  %6898 = vmatprep.subr.bf16.mxu0 %v7760_v29  ;;  %v7762_v31 = vld [vmem:[#allocation85 + $0x70] sm:$0xff]   ;;  %s10485_s24 = sld [smem:[#allocation169_spill]] }
0x26a0   :  { %v5605_v34 = vpop.f32.mrf.mxu1 }
0x26a1   :  { %v7763_v34 = vld [vmem:[#allocation85 + $0x30] sm:$0xff]  }
0x26a2   :  { %v7292_v21 = vpop.f32.mrf.mxu1 }
0x26a3   :  { %v7764_v21 = vld [vmem:[#allocation85 + $0x68] sm:$0xff]  }
0x2711   :  { %v7486_v8 = vpop.permute.xlu1 %7485 }
0x2712   :  { %v7488_v12 = vunpack.i.h.bf16 %v7486_v8  ;;  %v7487_v52 = vunpack.i.l.bf16 %v7486_v8  ;;  %v7765_v8 = vld [vmem:[#allocation85 + $0x28] sm:$0xff]  }
0x2714   :  { %v5617_v26 = vsel %vm1162_vm6, %v10324_v30, %v7488_v12  ;;  %v5616_v38 = vsel %vm1162_vm6, %v10321_v36, %v7487_v52  ;;  %v7738_v30 = vld [vmem:[#allocation83 + $0x74] ss:$8 sps:$4 sm:$0xff]   ;;  %v7766_v12 = vld [vmem:[#allocation85 + $0x60] sm:$0xff]  }
0x2715   :  { %v5618_v25 = vpack.c.bf16 %v5617_v26, %v5616_v38  ;;  %5863 = vmatprep.subr.bf16.mxu1 %v7738_v30  ;;  %v7767_v52 = vld [vmem:[#allocation85 + $0x20] sm:$0xff]   ;;  %v7768_v26 = vld [vmem:[#allocation85 + $0x58] sm:$0xff]  }
0x2716   :  { %5864 = vmatpush1.bf16.msra.mxu1 %v7736_v37  ;;  %v7769_v38 = vld [vmem:[#allocation85 + $0x18] sm:$0xff]  }
0x2717   :  { %7310 = vmatmul.mubr.bf16.vlgmr.msra.gmra.mxu0 %v5618_v25  ;;  %5865 = vmatprep.subr.bf16.mxu1 %v7741_v54  ;;  %v7770_v25 = vld [vmem:[#allocation85 + $0x50] sm:$0xff]  }
0x2718   :  { %6899 = vmatpush3.bf16.msra.mxu0 %v7761_v16 }
0x2719   :  { %6900 = vmatprep.subr.bf16.mxu0 %v7762_v31 }
0x271a   :  { %5866 = vmatpush1.bf16.msra.mxu1 %v7739_v57 }
0x271c   :  { %6901 = vmatpush3.bf16.msra.mxu0 %v7763_v34 }
0x271d   :  { %6902 = vmatprep.subr.bf16.mxu0 %v7764_v21 }
0x2720   :  { %6903 = vmatpush3.bf16.msra.mxu0 %v7765_v8  ;;  %v6677_v8 = vld [vmem:[#allocation80] ss:$0 sm:$0xff] }
0x2721   :  { %6904 = vmatprep.subr.bf16.mxu0 %v7766_v12 }
0x2724   :  { %6905 = vmatpush3.bf16.msra.mxu0 %v7767_v52 }
0x2725   :  { %6906 = vmatprep.subr.bf16.mxu0 %v7768_v26 }
0x2728   :  { %6907 = vmatpush3.bf16.msra.mxu0 %v7769_v38 }
0x2729   :  { %6908 = vmatprep.subr.bf16.mxu0 %v7770_v25 }
0x27d7   :  { %v5707_v40 = vpop.f32.mrf.mxu0 }
0x27d8   :  { %v5708_v41 = vadd.f32 %v6650_v13, %v5707_v40  ;;  %v7772_v40 = vld [vmem:[#allocation85 + $0x48] sm:$0xff]  }
0x27d9   :  { %v7311_v43 = vpop.f32.mrf.mxu0 }
0x27da   :  { %v5714_v61 = vadd.f32 %v5708_v41, %v10259_v20  ;;  %v7773_v41 = vld [vmem:[#allocation85 + $0x8] sm:$0xff]   ;;  %v7774_v43 = vld [vmem:[#allocation85 + $0x40] sm:$0xff]  }
0x27db   :  { %v5710_v44 = vpop.f32.mrf.mxu0 }
0x27dc   :  { %v5711_v35 = vadd.f32 %v6650_v13, %v5710_v44  ;;  %5716 = vadd.xlane.f32.xlu0 %v5714_v61  ;;  %v7771_v13 = vld [vmem:[#allocation85 + $0x10] sm:$0xff]   ;;  %v5771_v44 = vld [vmem:[%s10485_s24] sm:$0x3] }
0x27dd   :  { %v7312_v48 = vpop.f32.mrf.mxu0  ;;  %6909 = vmatpush3.bf16.msra.mxu0 %v7771_v13 }
0x27de   :  { %v5715_v42 = vadd.f32 %v5711_v35, %v10261_v23  ;;  %v7744_v23 = vld [vmem:[#allocation83 + $0x54] ss:$8 sps:$4 sm:$0xff]   ;;  %6910 = vmatprep.subr.bf16.mxu0 %v7772_v40  ;;  %v5776_v35 = vrot.slane %v5771_v44, %v9813_v32  ;;  %v5780_v48 = vrot.slane %v5771_v44, %v9816_v33 }
0x27df   :  { %5867 = vmatprep.subr.bf16.mxu1 %v7744_v23 }
0x27e0   :  { %5718 = vadd.xlane.f32.xlu1 %v5715_v42  ;;  %5868 = vmatpush1.bf16.msra.mxu1 %v7742_v55 }
0x27e1   :  { %5869 = vmatprep.subr.bf16.mxu1 %v7747_v60  ;;  %6911 = vmatpush3.bf16.msra.mxu0 %v7773_v41 }
0x27e2   :  { %6912 = vmatprep.subr.bf16.mxu0 %v7774_v43 }
0x27e4   :  { %5870 = vmatpush1.bf16.msra.mxu1 %v7745_v56 }
0x27e5   :  { %5871 = vmatprep.subr.bf16.mxu1 %v7750_v46 }
0x27e8   :  { %5872 = vmatpush1.bf16.msra.mxu1 %v7748_v62 }
0x27e9   :  { %5873 = vmatprep.subr.bf16.mxu1 %v7753_v18 }
0x27ec   :  { %5874 = vmatpush1.bf16.msra.mxu1 %v7751_v63 }
0x27ed   :  { %5875 = vmatprep.subr.bf16.mxu1 %v7756_v39 }
0x27f0   :  { %5876 = vmatpush1.bf16.msra.mxu1 %v7754_v58 }
0x27f1   :  { %5877 = vmatprep.subr.bf16.mxu1 %v7759_v4 }
0x27f4   :  { %5878 = vmatpush1.bf16.msra.mxu1 %v7757_v6 }
0x27f5   :  { %7313 = vmatprep.subr.bf16.mxu1 %v9299_v1 }
0x2865   :  { %v5717_v36 = vpop.xlane.xlu0 %5716 }
0x2866   :  { %v5720_v50 = vmul.f32 0.0078125, %v5717_v36 }
0x2868   :  { %v5722_v45 = vsub.f32 %v5714_v61, %v5720_v50  ;;  %v7775_v61 = vld [vmem:[#allocation85] sm:$0xff]  }
0x2869   :  { %v5719_v51 = vpop.xlane.xlu1 %5718  ;;  %6913 = vmatpush3.bf16.msra.mxu0 %v7775_v61 }
0x286a   :  { %v5721_v49 = vmul.f32 0.0078125, %v5719_v51  ;;  %v5724_v53 = vmul.f32 %v5722_v45, %v5722_v45 }
0x286c   :  { %v5723_v22 = vsub.f32 %v5715_v42, %v5721_v49  ;;  %5726 = vadd.xlane.f32.xlu0 %v5724_v53 }
0x286e   :  { %v5725_v20 = vmul.f32 %v5723_v22, %v5723_v22 }
0x2870   :  { %5728 = vadd.xlane.f32.xlu0 %v5725_v20 }
0x28f5   :  { %v5727_v47 = vpop.xlane.xlu0 %5726 }
0x28f6   :  { %v5730_v7 = vmul.f32 0.0078125, %v5727_v47 }
0x28f8   :  { %v5732_v9 = vadd.f32 1e-12, %v5730_v7 }
0x28f9   :  { %v5729_v24 = vpop.xlane.xlu0 %5728 }
0x28fa   :  { %7884 = vrsqrt.f32 %v5732_v9  ;;  %v5731_v10 = vmul.f32 0.0078125, %v5729_v24 }
0x28fc   :  { %v5733_v59 = vadd.f32 1e-12, %v5731_v10 }
0x28fe   :  { %7886 = vrsqrt.f32 %v5733_v59 }
0x2907   :  { %v7885_v17 = vpop.eup %7884 }
0x2908   :  { %v5736_v3 = vmul.f32 %v7885_v17, %v5722_v45 }
0x290a   :  { %v5744_v0 = vmul.f32 %v6659_v5, %v5736_v3 }
0x290b   :  { %v7887_v14 = vpop.eup %7886 }
0x290c   :  { %v5737_v15 = vmul.f32 %v7887_v14, %v5723_v22  ;;  %v10356_v2 = vadd.f32 %v6660_v19, %v5744_v0 }
0x290e   :  { %v5745_v27 = vmul.f32 %v6659_v5, %v5737_v15 }
0x2910   :  { %v10358_v11 = vadd.f32 %v6660_v19, %v5745_v27 }
0x2912   :  { %v5770_v28 = vpack.c.bf16 %v10358_v11, %v10356_v2 }
0x2914   :  { %5896 = vmatmul.mubr.bf16.vlgmr.msra.gmra.mxu1 %v5770_v28 }
0x2915   :  { %7329 = vmatprep.mubr.msk.bf16.mxu1 %vm9300_vm0, %v9299_v1 }
0x29d4   :  { %v5897_v42 = vpop.f32.mrf.mxu1 }
0x29d5   :  { %v5898_v37 = vadd.f32 %v5897_v42, %v5776_v35 }
0x29d6   :  { %v5899_v30 = vpop.f32.mrf.mxu1 }
0x29d7   :  { %v5910_v36 = vmul.f32 0.044715, %v5898_v37  ;;  %v5900_v50 = vadd.f32 %v5899_v30, %v5780_v48  ;;  %v5906_v19 = vmul.f32 0.5, %v5898_v37 }
0x29d8   :  { %v5901_v45 = vpop.f32.mrf.mxu1 }
0x29d9   :  { %v5914_v51 = vmul.f32 %v5910_v36, %v5898_v37  ;;  %v5911_v49 = vmul.f32 0.044715, %v5900_v50  ;;  %v5902_v53 = vadd.f32 %v5901_v45, %v5776_v35  ;;  %v5907_v14 = vmul.f32 0.5, %v5900_v50  ;;  %v7779_v45 = vld [vmem:[#allocation31 + $0x20] sm:$0xff]  }
0x29da   :  { %v5903_v22 = vpop.f32.mrf.mxu1 }
0x29db   :  { %v5918_v20 = vmul.f32 %v5914_v51, %v5898_v37  ;;  %v5915_v54 = vmul.f32 %v5911_v49, %v5900_v50  ;;  %v5912_v57 = vmul.f32 0.044715, %v5902_v53  ;;  %v5904_v23 = vadd.f32 %v5903_v22, %v5780_v48  ;;  %v7780_v51 = vld [vmem:[#allocation31 + $0x18] sm:$0xff]   ;;  %v7781_v49 = vld [vmem:[#allocation31 + $0x10] sm:$0xff]   ;;  %v7783_v22 = vld [vmem:[#allocation31] sm:$0xff]  }
0x29dc   :  { %v5908_v3 = vmul.f32 0.5, %v5902_v53 }
0x29dd   :  { %v5922_v55 = vadd.f32 %v5918_v20, %v5898_v37  ;;  %v5919_v56 = vmul.f32 %v5915_v54, %v5900_v50  ;;  %v5916_v60 = vmul.f32 %v5912_v57, %v5902_v53  ;;  %v5913_v32 = vmul.f32 0.044715, %v5904_v23 }
0x29de   :  { %v5909_v15 = vmul.f32 0.5, %v5904_v23 }
0x29df   :  { %v5926_v46 = vmul.f32 0.7978846, %v5922_v55  ;;  %v5920_v33 = vmul.f32 %v5916_v60, %v5902_v53  ;;  %v5923_v62 = vadd.f32 %v5919_v56, %v5900_v50  ;;  %v5917_v18 = vmul.f32 %v5913_v32, %v5904_v23  ;;  %v7776_v50 = vld [vmem:[#allocation31 + $0x38] sm:$0xff]   ;;  %v6694_v32 = vld [vmem:[%s10486_s23] ss:$0 sm:$0xff] }
0x29e0   :  { %7314 = vmatpush3.bf16.msra.mxu1 %v7776_v50 }
0x29e1   :  { %v5924_v63 = vadd.f32 %v5920_v33, %v5902_v53  ;;  %v5927_v39 = vmul.f32 0.7978846, %v5923_v62  ;;  %v5921_v58 = vmul.f32 %v5917_v18, %v5904_v23  ;;  %7888 = vtanh.f32 %v5926_v46  ;;  %7315 = vmatprep.subr.bf16.mxu1 %v9299_v1  ;;  %v7782_v53 = vld [vmem:[#allocation31 + $0x8] sm:$0xff]   ;;  %v6695_v18 = vld [vmem:[#allocation82] ss:$0 sm:$0xff] }
0x29e3   :  { %v5928_v4 = vmul.f32 0.7978846, %v5924_v63  ;;  %v5925_v6 = vadd.f32 %v5921_v58, %v5904_v23  ;;  %7890 = vtanh.f32 %v5927_v39 }
0x29e5   :  { %7892 = vtanh.f32 %v5928_v4  ;;  %v5929_v47 = vmul.f32 0.7978846, %v5925_v6 }
0x29e7   :  { %7894 = vtanh.f32 %v5929_v47 }
0x29ee   :  { %v7889_v7 = vpop.eup %7888 }
0x29ef   :  { %v5934_v5 = vadd.f32 1.0, %v7889_v7 }
0x29f0   :  { %v7891_v9 = vpop.eup %7890 }
0x29f1   :  { %v5935_v59 = vadd.f32 1.0, %v7891_v9  ;;  %v5938_v16 = vmul.f32 %v5934_v5, %v5906_v19 }
0x29f2   :  { %v7893_v24 = vpop.eup %7892 }
0x29f3   :  { %v5936_v10 = vadd.f32 1.0, %v7893_v24  ;;  %v5939_v28 = vmul.f32 %v5935_v59, %v5907_v14  ;;  %v6696_v59 = vld [vmem:[#allocation29] ss:$0 sm:$0xff] }
0x29f4   :  { %v7895_v17 = vpop.eup %7894 }
0x29f5   :  { %v5937_v0 = vadd.f32 1.0, %v7895_v17  ;;  %v5940_v27 = vmul.f32 %v5936_v10, %v5908_v3 }
0x29f7   :  { %v5941_v29 = vmul.f32 %v5937_v0, %v5909_v15  ;;  %v5974_v34 = vpack.c.bf16 %v5940_v27, %v5938_v16 }
0x29f9   :  { %v5975_v31 = vpack.c.bf16 %v5941_v29, %v5939_v28 }
0x29fb   :  { %6111 = vmatprep.mubr.bf16.mxu0 %v5975_v31 }
0x29fc   :  { %6112 = vmatmul.mubr.bf16.vlgmr.msra.gmra.mxu0 %v5974_v34 }
0x2abc   :  { %v6914_v21 = vpop.f32.mrf.mxu0 }
0x2abe   :  { %v6915_v12 = vpop.f32.mrf.mxu0 }
0x2abf   :  { %v6916_v52 = vadd.f32 %v6915_v12, %v6914_v21 }
0x2ac0   :  { %v6917_v26 = vpop.f32.mrf.mxu0 }
0x2ac1   :  { %v6114_v38 = vadd.f32 %v6916_v52, %v6677_v8 }
0x2ac2   :  { %v6918_v25 = vpop.f32.mrf.mxu0 }
0x2ac3   :  { %v6919_v13 = vadd.f32 %v6918_v25, %v6917_v26  ;;  %v6120_v40 = vadd.f32 %v6114_v38, %v10356_v2  ;;  %v7777_v2 = vld [vmem:[#allocation31 + $0x30] sm:$0xff]  }
0x2ac4   :  { %7316 = vmatpush3.bf16.msra.mxu1 %v7777_v2 }
0x2ac5   :  { %v6117_v41 = vadd.f32 %v6919_v13, %v6677_v8  ;;  %6124 = vadd.xlane.f32.xlu0 %v6120_v40  ;;  %7317 = vmatprep.subr.bf16.mxu1 %v9299_v1 }
0x2ac7   :  { %v6121_v43 = vadd.f32 %v6117_v41, %v10358_v11  ;;  %v7778_v11 = vld [vmem:[#allocation31 + $0x28] sm:$0xff]  }
0x2ac8   :  { %7318 = vmatpush3.bf16.msra.mxu1 %v7778_v11 }
0x2ac9   :  { %6126 = vadd.xlane.f32.xlu1 %v6121_v43  ;;  %7319 = vmatprep.subr.bf16.mxu1 %v9299_v1 }
0x2acc   :  { %7320 = vmatpush3.bf16.msra.mxu1 %v7779_v45 }
0x2acd   :  { %7321 = vmatprep.subr.bf16.mxu1 %v9299_v1 }
0x2ad0   :  { %7322 = vmatpush3.bf16.msra.mxu1 %v7780_v51 }
0x2ad1   :  { %7323 = vmatprep.subr.bf16.mxu1 %v9299_v1 }
0x2ad4   :  { %7324 = vmatpush3.bf16.msra.mxu1 %v7781_v49 }
0x2ad5   :  { %7325 = vmatprep.subr.bf16.mxu1 %v9299_v1 }
0x2ad8   :  { %7326 = vmatpush3.bf16.msra.mxu1 %v7782_v53 }
0x2ad9   :  { %7327 = vmatprep.subr.bf16.mxu1 %v9299_v1 }
0x2adc   :  { %7328 = vmatpush3.bf16.msra.mxu1 %v7783_v22 }
0x2b4e   :  { %v6125_v61 = vpop.xlane.xlu0 %6124 }
0x2b4f   :  { %v6128_v44 = vmul.f32 0.0078125, %v6125_v61 }
0x2b51   :  { %v6130_v35 = vsub.f32 %v6120_v40, %v6128_v44 }
0x2b52   :  { %v6127_v48 = vpop.xlane.xlu1 %6126 }
0x2b53   :  { %v6129_v42 = vmul.f32 0.0078125, %v6127_v48  ;;  %v6132_v37 = vmul.f32 %v6130_v35, %v6130_v35 }
0x2b55   :  { %v6131_v30 = vsub.f32 %v6121_v43, %v6129_v42  ;;  %6134 = vadd.xlane.f32.xlu0 %v6132_v37 }
0x2b57   :  { %v6133_v36 = vmul.f32 %v6131_v30, %v6131_v30 }
0x2b59   :  { %6136 = vadd.xlane.f32.xlu1 %v6133_v36 }
0x2bde   :  { %v6135_v20 = vpop.xlane.xlu0 %6134 }
0x2bdf   :  { %v6138_v54 = vmul.f32 0.0078125, %v6135_v20 }
0x2be1   :  { %v6140_v57 = vadd.f32 1e-12, %v6138_v54 }
0x2be2   :  { %v6137_v23 = vpop.xlane.xlu1 %6136 }
0x2be3   :  { %7896 = vrsqrt.f32 %v6140_v57  ;;  %v6139_v55 = vmul.f32 0.0078125, %v6137_v23 }
0x2be5   :  { %v6141_v56 = vadd.f32 1e-12, %v6139_v55 }
0x2be7   :  { %7898 = vrsqrt.f32 %v6141_v56 }
0x2bf0   :  { %v7897_v60 = vpop.eup %7896 }
0x2bf1   :  { %v6144_v46 = vmul.f32 %v7897_v60, %v6130_v35 }
0x2bf3   :  { %v6152_v33 = vmul.f32 %v6694_v32, %v6144_v46 }
0x2bf4   :  { %v7899_v62 = vpop.eup %7898 }
0x2bf5   :  { %v6145_v63 = vmul.f32 %v7899_v62, %v6131_v30  ;;  %v6160_v58 = vadd.f32 %v6695_v18, %v6152_v33 }
0x2bf7   :  { %v6153_v39 = vmul.f32 %v6694_v32, %v6145_v63  ;;  %v6178_v1 = vpack.c.bf16 %v6160_v58, %v6160_v58 }
0x2bf9   :  { %v6161_v4 = vadd.f32 %v6695_v18, %v6153_v39  ;;  %v6189_v7 = vunpack.c.l.b16 %v6178_v1 }
0x2bfb   :  { %v6179_v6 = vpack.c.bf16 %v6161_v4, %v6161_v4 }
0x2bfd   :  { %v6190_v47 = vunpack.c.l.b16 %v6179_v6 }
0x2bff   :  { %v6191_v9 = vrot.slane %v6190_v47, 7 }
0x2c01   :  { %v6193_v24 = vsel %vm6192_vm13, %v6191_v9, %v6189_v7 }
0x2c02   :  { %v6194_v10 = vpack.c.b16 %v6193_v24, %v6193_v24 }
0x2c04   :  { %7330 = vmatmul.mubr.bf16.vlgmr.msra.gmra.mxu1 %v6194_v10 }
0x2cc4   :  { %v6278_v17 = vpop.f32.mrf.mxu1 }
0x2cc5   :  { %v6279_v3 = vadd.f32 %v6696_v59, %v6278_v17 }
0x2cc6   :  { %v7331_v5 = vpop.f32.mrf.mxu1 }
0x2cc7   :  { %7900 = vtanh.f32 %v6279_v3 }
0x2cc8   :  { %v6281_v14 = vpop.f32.mrf.mxu1 }
0x2cca   :  { %v7332_v15 = vpop.f32.mrf.mxu1 }
0x2cd4   :  { %v7901_v0 = vpop.eup %7900 }
0x2cd5   :  { %6285 = vst [vmem:[#allocation92] sm:$0x3] %v7901_v0 }
0x2cd6   :  { %9093 = shalt.err (!%p9090_p5)
}
0x2cd7   :  { %6295 = dma.vmem_to_hbm [thread:$0]  %s6293_s28, 32, %s9656_s29, [#allocation4]  }
0x2cd8   :  { %9162 = dma.done.wait [#allocation4], 32  }
0x2cd9   :  { %9163 = vsyncadd [#allocation4], 4294967264 }
0x2cda   :  { %6299 = vsyncpa [#allocation3], 1 }
0x2cdb   :  { %6300 = vsyncpa [#allocation6], 1 }
0x2cdc   :  { %6301 = vsyncpa [#allocation9], 1 }
0x2cdd   :  { %6302 = vsyncpa [#allocation12], 1 }
0x2cde   :  { %6303 = vsyncpa [#allocation15], 1 }
0x2cdf   :  { %6304 = vsyncpa [#allocation18], 1 }
0x2ce0   :  { %6305 = vsyncpa [#allocation21], 1 }
0x2ce1   :  { %6306 = vsyncpa [#allocation24], 1 }
0x2ce2   :  { %6307 = vsyncpa [#allocation27], 1 }
0x2ce3   :  { %6308 = vsyncpa [#allocation30], 1 }
0x2ce4   :  { %6309 = vsyncpa [#allocation33], 1 }
0x2ce5   :  { %6310 = vsyncpa [#allocation36], 1 }
0x2ce6   :  { %6311 = vsyncpa [#allocation39], 1 }
0x2ce7   :  { %6312 = vsyncpa [#allocation42], 1 }
0x2ce8   :  { %6313 = vsyncpa [#allocation45], 1 }
0x2ce9   :  { %6314 = vsyncpa [#allocation48], 1 }
0x2cea   :  { %6315 = vsyncpa [#allocation51], 1 }
0x2ceb   :  { %6316 = vsyncpa [#allocation54], 1 }
0x2cec   :  { %6317 = vsyncpa [#allocation57], 1 }
0x2ced   :  { %6318 = vsyncpa [#allocation60], 1 }
0x2cee   :  { %6319 = vsyncpa [#allocation63], 1 }
0x2cef   :  { %6320 = vsyncpa [#allocation66], 1 }
0x2cf0   :  { %6321 = vsyncpa [#allocation69], 1 }
0x2cf1   :  { %6322 = vsyncpa [#allocation72], 1 }
0x2cf2   :  { %6323 = vsyncpa [#allocation75], 1 }
0x2cf3   :  { %6324 = vsyncpa [#allocation78], 1 }
0x2cf4   :  { %6325 = vsyncpa [#allocation81], 1 }
0x2cf5   :  { %6326 = vsyncpa [#allocation84], 1 }
0x2cf6   :  { %6327 = vsyncpa [#allocation87], 1 }
0x2cf7   :  { %6328 = vsyncpa [#allocation90], 1 }
0x2cf8   :  { %6329 = vsyncpa [#allocation4], 1 }

</bundles_post_ra>
